<compile_context>
chip_gen: v6e
topology: v6e:2x2x1
jax: 0.10.0
libtpu: 0.0.40
codegen_flags: <defaults>
</compile_context>

<pallas_src>
import jax
import jax.numpy as jnp
from jax import lax
from jax.experimental import pallas as pl
from jax.experimental.pallas import tpu as pltpu


def _round_up(n, m):
    return ((n + m - 1) // m) * m


def _pick_chunk(T, target):
    """Largest divisor of T that is <= target (bounds the in-kernel trip count)."""
    for c in range(min(T, target), 0, -1):
        if T % c == 0:
            return c
    return 1


def _pad_gate_cols(w, H, Hp):
    """w: (rows, 4*H) in torch gate order [i,f,g,o] -> (rows, 4*Hp), zero-padded
    per gate block so each gate occupies a full lane-aligned tile."""
    rows = w.shape[0]
    w4 = w.reshape(rows, 4, H)
    w4 = jnp.pad(w4, ((0, 0), (0, 0), (0, Hp - H)))
    return w4.reshape(rows, 4 * Hp)


def lstm_kernel(x_ref, wx_ref, wh_ref, b_ref, wfc_ref, bfc_ref, out_ref,
                xproj_scr, h_scr, c_scr):
    ti = pl.program_id(1)
    nt = pl.num_programs(1)
    Bb, Hp = h_scr.shape
    Tc = xproj_scr.shape[0] // Bb

    # (1) Batched input projection for this time chunk: one MXU matmul; the
    #     pipeline overlaps it with the HBM->VMEM stream of the next x chunk.
    xproj_scr[...] = (
        jnp.dot(x_ref[...], wx_ref[...], preferred_element_type=jnp.float32)
        + b_ref[...])

    # (2) Initialise the persistent h/c state at the first chunk of this batch block.
    @pl.when(ti == 0)
    def _():
        h_scr[...] = jnp.zeros_like(h_scr)
        c_scr[...] = jnp.zeros_like(c_scr)

    # (3) Serial recurrence within the chunk (trip count bounded by Tc).
    def step(t, carry):
        h, c = carry
        row = pl.multiple_of(t * Bb, Bb)
        # wh_ref is read inside the step (not hoisted): Mosaic streams it from
        # VMEM into the MXU; hoisting it made a >=64-vreg live value.
        gates = (xproj_scr[pl.ds(row, Bb), :]
                 + jnp.dot(h.astype(wh_ref.dtype), wh_ref[...],
                           preferred_element_type=jnp.float32))
        # PyTorch gate order [i, f, g, o]; each slice is a full 128-lane tile.
        i_g = jax.nn.sigmoid(gates[:, 0 * Hp:1 * Hp])
        f_g = jax.nn.sigmoid(gates[:, 1 * Hp:2 * Hp])
        g_g = jnp.tanh(gates[:, 2 * Hp:3 * Hp])
        o_g = jax.nn.sigmoid(gates[:, 3 * Hp:4 * Hp])
        c_new = f_g * c + i_g * g_g
        h_new = o_g * jnp.tanh(c_new)
        return (h_new, c_new)

    h, c = lax.fori_loop(0, Tc, step, (h_scr[...], c_scr[...]), unroll=True)
    h_scr[...] = h
    c_scr[...] = c

    # (4) FC head on the last hidden state; lane-dense output store on last chunk.
    @pl.when(ti == nt - 1)
    def _():
        out_ref[...] = (
            jnp.dot(h, wfc_ref[...], preferred_element_type=jnp.float32)
            + bfc_ref[...]).astype(out_ref.dtype)


def lstm_model_forward(tokens, emb_table, w_ih, w_hh, b_ih, b_hh, w_fc, b_fc,
                       *, mxu_dtype=jnp.float32, time_chunk_target=16):
    """tokens: (B, T) int32; weights in PyTorch layout:
       w_ih (4H, E), w_hh (4H, H), b_ih/b_hh (4H,), w_fc (O, H), b_fc (O,)."""
    B, T = tokens.shape
    E = emb_table.shape[1]
    H = w_hh.shape[1]
    O = w_fc.shape[0]
    Hp = _round_up(H, 128)
    Op = _round_up(O, 128)

    # Batch split across a "parallel" grid axis (uses both TCs on v7x).
    NB = 2 if B >= 16 else 1
    Bp = _round_up(B, 8 * NB)          # keep per-block batch a multiple of 8 sublanes
    Bb = Bp // NB

    Tc = _pick_chunk(T, time_chunk_target)
    NT = T // Tc

    # --- parameter prep (one-time glue): transpose, fuse biases, lane-pad ---
    wx = _pad_gate_cols(jnp.transpose(w_ih), H, Hp).astype(mxu_dtype)      # (E, 4Hp)
    wh = _pad_gate_cols(jnp.transpose(w_hh), H, Hp)                        # (H, 4Hp)
    wh = jnp.pad(wh, ((0, Hp - H), (0, 0))).astype(mxu_dtype)              # (Hp, 4Hp)
    b = _pad_gate_cols((b_ih + b_hh).reshape(1, 4 * H), H, Hp)             # (1, 4Hp) f32
    wfc = jnp.pad(jnp.transpose(w_fc), ((0, Hp - H), (0, Op - O)))         # (Hp, Op) f32
    bfc = jnp.pad(b_fc.reshape(1, O), ((0, 0), (0, Op - O)))               # (1, Op) f32

    # --- embedding gather, laid out as (batch_block, time_chunk, t, b, E) rows ---
    tok = jnp.pad(tokens, ((0, Bp - B), (0, 0)))
    x = jnp.take(emb_table, tok, axis=0).astype(mxu_dtype)                 # (Bp, T, E)
    x = x.reshape(NB, Bb, NT, Tc, E).transpose(0, 2, 3, 1, 4)
    x = x.reshape(NB * NT * Tc * Bb, E)

    # Explicit scoped-VMEM budget with headroom (v5e default is only 16 MiB).
    wbytes = jnp.dtype(mxu_dtype).itemsize
    est = (2 * Tc * Bb * E * wbytes                                   # x double buffer
           + Tc * Bb * 4 * Hp * 4                                     # xproj scratch
           + 2 * Bb * Hp * 4                                          # h/c scratch
           + 2 * ((E + Hp) * 4 * Hp * wbytes + Hp * Op * 4 + (4 * Hp + Op) * 4)
           + 2 * Bb * Op * 4)                                         # out block
    vmem_limit = int(min(48 * 2**20, max(24 * 2**20, 2 * est)))

    grid_spec = pltpu.PrefetchScalarGridSpec(
        num_scalar_prefetch=0,
        grid=(NB, NT),
        in_specs=[
            pl.BlockSpec((Tc * Bb, E), lambda bi, ti: (bi * NT + ti, 0)),  # x chunk
            pl.BlockSpec((E, 4 * Hp), lambda bi, ti: (0, 0)),              # wx
            pl.BlockSpec((Hp, 4 * Hp), lambda bi, ti: (0, 0)),             # wh
            pl.BlockSpec((1, 4 * Hp), lambda bi, ti: (0, 0)),              # b
            pl.BlockSpec((Hp, Op), lambda bi, ti: (0, 0)),                 # wfc
            pl.BlockSpec((1, Op), lambda bi, ti: (0, 0)),                  # bfc
        ],
        out_specs=pl.BlockSpec((Bb, Op), lambda bi, ti: (bi, 0)),
        scratch_shapes=[
            pltpu.VMEM((Tc * Bb, 4 * Hp), jnp.float32),   # per-chunk gate pre-acts
            pltpu.VMEM((Bb, Hp), jnp.float32),            # persistent h
            pltpu.VMEM((Bb, Hp), jnp.float32),            # persistent c
        ],
    )

    out_padded = pl.pallas_call(
        lstm_kernel,
        out_shape=jax.ShapeDtypeStruct((Bp, Op), jnp.float32),
        grid_spec=grid_spec,
        compiler_params=pltpu.CompilerParams(
            dimension_semantics=("parallel", "arbitrary"),
            vmem_limit_bytes=vmem_limit),
    )(x, wx, wh, b, wfc, bfc)

    return out_padded[:B, :O]


def reference_forward(tokens, emb_table, w_ih, w_hh, b_ih, b_hh, w_fc, b_fc):
    """Pure-JAX reference matching PyTorch LSTMModel.forward semantics."""
    x = jnp.take(emb_table, tokens, axis=0).astype(jnp.float32)        # (B, T, E)
    B, T, E = x.shape
    H = w_hh.shape[1]
    wx = jnp.transpose(w_ih)
    wh = jnp.transpose(w_hh)
    b = b_ih + b_hh

    def step(carry, x_t):
        h, c = carry
        gates = x_t @ wx + h @ wh + b
        i_g = jax.nn.sigmoid(gates[:, 0 * H:1 * H])
        f_g = jax.nn.sigmoid(gates[:, 1 * H:2 * H])
        g_g = jnp.tanh(gates[:, 2 * H:3 * H])
        o_g = jax.nn.sigmoid(gates[:, 3 * H:4 * H])
        c = f_g * c + i_g * g_g
        h = o_g * jnp.tanh(c)
        return (h, c), None

    h0 = jnp.zeros((B, H), jnp.float32)
    c0 = jnp.zeros((B, H), jnp.float32)
    (h_last, _), _ = lax.scan(step, (h0, c0), jnp.transpose(x, (1, 0, 2)))
    return h_last @ jnp.transpose(w_fc) + b_fc


if __name__ == "__main__":
    # Small, forward-consistent shapes (B>=16 exercises the batch-split axis,
    # T=32 with Tc=16 exercises the h/c carry across time chunks).
    VOCAB, B, T, E, H, O = 50, 16, 32, 32, 32, 4

    key = jax.random.PRNGKey(0)
    k_tok, k_emb, k_wih, k_whh, k_bih, k_bhh, k_wfc, k_bfc = jax.random.split(key, 8)

    tokens = jax.random.randint(k_tok, (B, T), 0, VOCAB, dtype=jnp.int32)

    # Deterministic parameter init (uniform, ~ PyTorch default scale 1/sqrt(H))
    s = 1.0 / jnp.sqrt(jnp.float32(H))
    emb_table = jax.random.normal(k_emb, (VOCAB, E), jnp.float32)
    w_ih = jax.random.uniform(k_wih, (4 * H, E), jnp.float32, -s, s)   # torch layout
    w_hh = jax.random.uniform(k_whh, (4 * H, H), jnp.float32, -s, s)
    b_ih = jax.random.uniform(k_bih, (4 * H,), jnp.float32, -s, s)
    b_hh = jax.random.uniform(k_bhh, (4 * H,), jnp.float32, -s, s)
    w_fc = jax.random.uniform(k_wfc, (O, H), jnp.float32, -s, s)       # torch layout
    b_fc = jax.random.uniform(k_bfc, (O,), jnp.float32, -s, s)

    ref = reference_forward(tokens, emb_table, w_ih, w_hh, b_ih, b_hh, w_fc, b_fc)

    # f32 MXU path (exact-match check).
    out = lstm_model_forward(tokens, emb_table, w_ih, w_hh, b_ih, b_hh, w_fc, b_fc)
    out = jax.block_until_ready(out)
    assert out.shape == (B, O)
    assert jnp.allclose(out, ref, atol=2e-4, rtol=2e-4), "f32 mismatch vs reference"

    # bf16 MXU-operand fast path (v6e/v7x); looser tolerance for bf16 operands.
    out_bf16 = lstm_model_forward(tokens, emb_table, w_ih, w_hh, b_ih, b_hh,
                                  w_fc, b_fc, mxu_dtype=jnp.bfloat16)
    out_bf16 = jax.block_until_ready(out_bf16)
    assert jnp.allclose(out_bf16, ref, atol=5e-2, rtol=5e-2), "bf16 mismatch vs reference"

    print("KERNEL_OK")
</pallas_src>

<mosaic_0001>
module attributes {stable_mosaic.version = 11 : i64} {
  func.func @lstm_kernel(%arg0: i32, %arg1: i32, %arg2: memref<128x32xf32, #tpu.memory_space<vmem>>, %arg3: memref<32x512xf32, #tpu.memory_space<vmem>>, %arg4: memref<128x512xf32, #tpu.memory_space<vmem>>, %arg5: memref<1x512xf32, #tpu.memory_space<vmem>>, %arg6: memref<128x128xf32, #tpu.memory_space<vmem>>, %arg7: memref<1x128xf32, #tpu.memory_space<vmem>>, %arg8: memref<8x128xf32, #tpu.memory_space<vmem>>, %arg9: memref<128x512xf32, #tpu.memory_space<vmem>>, %arg10: memref<8x128xf32, #tpu.memory_space<vmem>>, %arg11: memref<8x128xf32, #tpu.memory_space<vmem>>) attributes {dimension_semantics = [#tpu.dimension_semantics<parallel>, #tpu.dimension_semantics<arbitrary>], iteration_bounds = array<i64: 2, 2>, scalar_prefetch = 0 : i64, scratch_operands = 3 : i64, tpu.core_type = #tpu.core_type<tc>, window_params = [{transform_indices = @transform_0, window_bounds = array<i64: 128, 32>}, {pipeline_mode = #tpu.pipeline_mode<synchronous>, transform_indices = @transform_1, window_bounds = array<i64: 32, 512>}, {pipeline_mode = #tpu.pipeline_mode<synchronous>, transform_indices = @transform_2, window_bounds = array<i64: 128, 512>}, {pipeline_mode = #tpu.pipeline_mode<synchronous>, transform_indices = @transform_3, window_bounds = array<i64: 1, 512>}, {pipeline_mode = #tpu.pipeline_mode<synchronous>, transform_indices = @transform_4, window_bounds = array<i64: 128, 128>}, {pipeline_mode = #tpu.pipeline_mode<synchronous>, transform_indices = @transform_5, window_bounds = array<i64: 1, 128>}, {transform_indices = @transform_6, window_bounds = array<i64: 8, 128>}]} {
    %c0 = arith.constant 0 : index
    %c0_0 = arith.constant 0 : index
    %0 = vector.load %arg2[%c0, %c0_0] : memref<128x32xf32, #tpu.memory_space<vmem>>, vector<128x32xf32>
    %c0_1 = arith.constant 0 : index
    %c0_2 = arith.constant 0 : index
    %1 = vector.load %arg3[%c0_1, %c0_2] : memref<32x512xf32, #tpu.memory_space<vmem>>, vector<32x512xf32>
    %cst = arith.constant dense<0.000000e+00> : vector<128x512xf32>
    %2 = tpu.matmul %0, %1, %cst {dimension_numbers = #tpu.dot_dimension_numbers<[1], [0], [0], [1], [0, 0, 1, 1], [], []>} : vector<128x32xf32>, vector<32x512xf32>, vector<128x512xf32> -> vector<128x512xf32>
    %c0_3 = arith.constant 0 : index
    %c0_4 = arith.constant 0 : index
    %3 = vector.load %arg5[%c0_3, %c0_4] : memref<1x512xf32, #tpu.memory_space<vmem>>, vector<1x512xf32>
    %4 = vector.broadcast %3 : vector<1x512xf32> to vector<128x512xf32>
    %5 = arith.addf %2, %4 : vector<128x512xf32>
    %c0_5 = arith.constant 0 : index
    %c0_6 = arith.constant 0 : index
    %6 = vector.load %arg9[%c0_5, %c0_6] : memref<128x512xf32, #tpu.memory_space<vmem>>, vector<128x512xf32>
    tpu.vector_store %arg9[%c0_5, %c0_6], %5 {strides = array<i32>} : memref<128x512xf32, #tpu.memory_space<vmem>>, vector<128x512xf32>,
    %c0_i32 = arith.constant 0 : i32
    %7 = arith.cmpi eq, %arg1, %c0_i32 : i32
    %8 = arith.extui %7 : i1 to i32
    %c0_i32_7 = arith.constant 0 : i32
    %9 = arith.cmpi ne, %8, %c0_i32_7 : i32
    scf.if %9 {
      %cst_147 = arith.constant 0.000000e+00 : f32
      %529 = vector.broadcast %cst_147 : f32 to vector<8x128xf32>
      %c0_148 = arith.constant 0 : index
      %c0_149 = arith.constant 0 : index
      %530 = vector.load %arg10[%c0_148, %c0_149] : memref<8x128xf32, #tpu.memory_space<vmem>>, vector<8x128xf32>
      tpu.vector_store %arg10[%c0_148, %c0_149], %529 {strides = array<i32>} : memref<8x128xf32, #tpu.memory_space<vmem>>, vector<8x128xf32>,
      %cst_150 = arith.constant 0.000000e+00 : f32
      %531 = vector.broadcast %cst_150 : f32 to vector<8x128xf32>
      %c0_151 = arith.constant 0 : index
      %c0_152 = arith.constant 0 : index
      %532 = vector.load %arg11[%c0_151, %c0_152] : memref<8x128xf32, #tpu.memory_space<vmem>>, vector<8x128xf32>
      tpu.vector_store %arg11[%c0_151, %c0_152], %531 {strides = array<i32>} : memref<8x128xf32, #tpu.memory_space<vmem>>, vector<8x128xf32>,
    } else {
    }
    %c0_8 = arith.constant 0 : index
    %c0_9 = arith.constant 0 : index
    %10 = vector.load %arg10[%c0_8, %c0_9] : memref<8x128xf32, #tpu.memory_space<vmem>>, vector<8x128xf32>
    %c0_10 = arith.constant 0 : index
    %c0_11 = arith.constant 0 : index
    %11 = vector.load %arg11[%c0_10, %c0_11] : memref<8x128xf32, #tpu.memory_space<vmem>>, vector<8x128xf32>
    %c0_i32_12 = arith.constant 0 : i32
    %c8_i32 = arith.constant 8 : i32
    %12 = arith.muli %c0_i32_12, %c8_i32 : i32
    %13 = tpu.assume_multiple %12, 8 : i32
    %14 = arith.index_cast %13 : i32 to index
    %c0_13 = arith.constant 0 : index
    %15 = vector.load %arg9[%14, %c0_13] : memref<128x512xf32, #tpu.memory_space<vmem>>, vector<8x512xf32>
    %c0_14 = arith.constant 0 : index
    %c0_15 = arith.constant 0 : index
    %16 = vector.load %arg4[%c0_14, %c0_15] : memref<128x512xf32, #tpu.memory_space<vmem>>, vector<128x512xf32>
    %cst_16 = arith.constant dense<0.000000e+00> : vector<8x512xf32>
    %17 = tpu.matmul %10, %16, %cst_16 {dimension_numbers = #tpu.dot_dimension_numbers<[1], [0], [0], [1], [0, 0, 1, 1], [], []>} : vector<8x128xf32>, vector<128x512xf32>, vector<8x512xf32> -> vector<8x512xf32>
    %18 = arith.addf %15, %17 : vector<8x512xf32>
    %19 = vector.extract_strided_slice %18 {offsets = [0, 0], sizes = [8, 128], strides = [1, 1]} : vector<8x512xf32> to vector<8x128xf32>
    %20 = arith.negf %19 : vector<8x128xf32>
    %21 = math.exp %20 : vector<8x128xf32>
    %cst_17 = arith.constant 1.000000e+00 : f32
    %22 = vector.broadcast %cst_17 : f32 to vector<8x128xf32>
    %23 = arith.addf %22, %21 : vector<8x128xf32>
    %24 = arith.divf %22, %23 : vector<8x128xf32>
    %25 = vector.extract_strided_slice %18 {offsets = [0, 128], sizes = [8, 128], strides = [1, 1]} : vector<8x512xf32> to vector<8x128xf32>
    %26 = arith.negf %25 : vector<8x128xf32>
    %27 = math.exp %26 : vector<8x128xf32>
    %cst_18 = arith.constant 1.000000e+00 : f32
    %28 = vector.broadcast %cst_18 : f32 to vector<8x128xf32>
    %29 = arith.addf %28, %27 : vector<8x128xf32>
    %30 = arith.divf %28, %29 : vector<8x128xf32>
    %31 = vector.extract_strided_slice %18 {offsets = [0, 256], sizes = [8, 128], strides = [1, 1]} : vector<8x512xf32> to vector<8x128xf32>
    %32 = math.tanh %31 : vector<8x128xf32>
    %33 = vector.extract_strided_slice %18 {offsets = [0, 384], sizes = [8, 128], strides = [1, 1]} : vector<8x512xf32> to vector<8x128xf32>
    %34 = arith.negf %33 : vector<8x128xf32>
    %35 = math.exp %34 : vector<8x128xf32>
    %cst_19 = arith.constant 1.000000e+00 : f32
    %36 = vector.broadcast %cst_19 : f32 to vector<8x128xf32>
    %37 = arith.addf %36, %35 : vector<8x128xf32>
    %38 = arith.divf %36, %37 : vector<8x128xf32>
    %39 = arith.mulf %30, %11 : vector<8x128xf32>
    %40 = arith.mulf %24, %32 : vector<8x128xf32>
    %41 = arith.addf %39, %40 : vector<8x128xf32>
    %42 = math.tanh %41 : vector<8x128xf32>
    %43 = arith.mulf %38, %42 : vector<8x128xf32>
    %c1_i32 = arith.constant 1 : i32
    %c8_i32_20 = arith.constant 8 : i32
    %44 = arith.muli %c1_i32, %c8_i32_20 : i32
    %45 = tpu.assume_multiple %44, 8 : i32
    %46 = arith.index_cast %45 : i32 to index
    %c0_21 = arith.constant 0 : index
    %47 = vector.load %arg9[%46, %c0_21] : memref<128x512xf32, #tpu.memory_space<vmem>>, vector<8x512xf32>
    %c0_22 = arith.constant 0 : index
    %c0_23 = arith.constant 0 : index
    %48 = vector.load %arg4[%c0_22, %c0_23] : memref<128x512xf32, #tpu.memory_space<vmem>>, vector<128x512xf32>
    %cst_24 = arith.constant dense<0.000000e+00> : vector<8x512xf32>
    %49 = tpu.matmul %43, %48, %cst_24 {dimension_numbers = #tpu.dot_dimension_numbers<[1], [0], [0], [1], [0, 0, 1, 1], [], []>} : vector<8x128xf32>, vector<128x512xf32>, vector<8x512xf32> -> vector<8x512xf32>
    %50 = arith.addf %47, %49 : vector<8x512xf32>
    %51 = vector.extract_strided_slice %50 {offsets = [0, 0], sizes = [8, 128], strides = [1, 1]} : vector<8x512xf32> to vector<8x128xf32>
    %52 = arith.negf %51 : vector<8x128xf32>
    %53 = math.exp %52 : vector<8x128xf32>
    %cst_25 = arith.constant 1.000000e+00 : f32
    %54 = vector.broadcast %cst_25 : f32 to vector<8x128xf32>
    %55 = arith.addf %54, %53 : vector<8x128xf32>
    %56 = arith.divf %54, %55 : vector<8x128xf32>
    %57 = vector.extract_strided_slice %50 {offsets = [0, 128], sizes = [8, 128], strides = [1, 1]} : vector<8x512xf32> to vector<8x128xf32>
    %58 = arith.negf %57 : vector<8x128xf32>
    %59 = math.exp %58 : vector<8x128xf32>
    %cst_26 = arith.constant 1.000000e+00 : f32
    %60 = vector.broadcast %cst_26 : f32 to vector<8x128xf32>
    %61 = arith.addf %60, %59 : vector<8x128xf32>
    %62 = arith.divf %60, %61 : vector<8x128xf32>
    %63 = vector.extract_strided_slice %50 {offsets = [0, 256], sizes = [8, 128], strides = [1, 1]} : vector<8x512xf32> to vector<8x128xf32>
    %64 = math.tanh %63 : vector<8x128xf32>
    %65 = vector.extract_strided_slice %50 {offsets = [0, 384], sizes = [8, 128], strides = [1, 1]} : vector<8x512xf32> to vector<8x128xf32>
    %66 = arith.negf %65 : vector<8x128xf32>
    %67 = math.exp %66 : vector<8x128xf32>
    %cst_27 = arith.constant 1.000000e+00 : f32
    %68 = vector.broadcast %cst_27 : f32 to vector<8x128xf32>
    %69 = arith.addf %68, %67 : vector<8x128xf32>
    %70 = arith.divf %68, %69 : vector<8x128xf32>
    %71 = arith.mulf %62, %41 : vector<8x128xf32>
    %72 = arith.mulf %56, %64 : vector<8x128xf32>
    %73 = arith.addf %71, %72 : vector<8x128xf32>
    %74 = math.tanh %73 : vector<8x128xf32>
    %75 = arith.mulf %70, %74 : vector<8x128xf32>
    %c2_i32 = arith.constant 2 : i32
    %c8_i32_28 = arith.constant 8 : i32
    %76 = arith.muli %c2_i32, %c8_i32_28 : i32
    %77 = tpu.assume_multiple %76, 8 : i32
    %78 = arith.index_cast %77 : i32 to index
    %c0_29 = arith.constant 0 : index
    %79 = vector.load %arg9[%78, %c0_29] : memref<128x512xf32, #tpu.memory_space<vmem>>, vector<8x512xf32>
    %c0_30 = arith.constant 0 : index
    %c0_31 = arith.constant 0 : index
    %80 = vector.load %arg4[%c0_30, %c0_31] : memref<128x512xf32, #tpu.memory_space<vmem>>, vector<128x512xf32>
    %cst_32 = arith.constant dense<0.000000e+00> : vector<8x512xf32>
    %81 = tpu.matmul %75, %80, %cst_32 {dimension_numbers = #tpu.dot_dimension_numbers<[1], [0], [0], [1], [0, 0, 1, 1], [], []>} : vector<8x128xf32>, vector<128x512xf32>, vector<8x512xf32> -> vector<8x512xf32>
    %82 = arith.addf %79, %81 : vector<8x512xf32>
    %83 = vector.extract_strided_slice %82 {offsets = [0, 0], sizes = [8, 128], strides = [1, 1]} : vector<8x512xf32> to vector<8x128xf32>
    %84 = arith.negf %83 : vector<8x128xf32>
    %85 = math.exp %84 : vector<8x128xf32>
    %cst_33 = arith.constant 1.000000e+00 : f32
    %86 = vector.broadcast %cst_33 : f32 to vector<8x128xf32>
    %87 = arith.addf %86, %85 : vector<8x128xf32>
    %88 = arith.divf %86, %87 : vector<8x128xf32>
    %89 = vector.extract_strided_slice %82 {offsets = [0, 128], sizes = [8, 128], strides = [1, 1]} : vector<8x512xf32> to vector<8x128xf32>
    %90 = arith.negf %89 : vector<8x128xf32>
    %91 = math.exp %90 : vector<8x128xf32>
    %cst_34 = arith.constant 1.000000e+00 : f32
    %92 = vector.broadcast %cst_34 : f32 to vector<8x128xf32>
    %93 = arith.addf %92, %91 : vector<8x128xf32>
    %94 = arith.divf %92, %93 : vector<8x128xf32>
    %95 = vector.extract_strided_slice %82 {offsets = [0, 256], sizes = [8, 128], strides = [1, 1]} : vector<8x512xf32> to vector<8x128xf32>
    %96 = math.tanh %95 : vector<8x128xf32>
    %97 = vector.extract_strided_slice %82 {offsets = [0, 384], sizes = [8, 128], strides = [1, 1]} : vector<8x512xf32> to vector<8x128xf32>
    %98 = arith.negf %97 : vector<8x128xf32>
    %99 = math.exp %98 : vector<8x128xf32>
    %cst_35 = arith.constant 1.000000e+00 : f32
    %100 = vector.broadcast %cst_35 : f32 to vector<8x128xf32>
    %101 = arith.addf %100, %99 : vector<8x128xf32>
    %102 = arith.divf %100, %101 : vector<8x128xf32>
    %103 = arith.mulf %94, %73 : vector<8x128xf32>
    %104 = arith.mulf %88, %96 : vector<8x128xf32>
    %105 = arith.addf %103, %104 : vector<8x128xf32>
    %106 = math.tanh %105 : vector<8x128xf32>
    %107 = arith.mulf %102, %106 : vector<8x128xf32>
    %c3_i32 = arith.constant 3 : i32
    %c8_i32_36 = arith.constant 8 : i32
    %108 = arith.muli %c3_i32, %c8_i32_36 : i32
    %109 = tpu.assume_multiple %108, 8 : i32
    %110 = arith.index_cast %109 : i32 to index
    %c0_37 = arith.constant 0 : index
    %111 = vector.load %arg9[%110, %c0_37] : memref<128x512xf32, #tpu.memory_space<vmem>>, vector<8x512xf32>
    %c0_38 = arith.constant 0 : index
    %c0_39 = arith.constant 0 : index
    %112 = vector.load %arg4[%c0_38, %c0_39] : memref<128x512xf32, #tpu.memory_space<vmem>>, vector<128x512xf32>
    %cst_40 = arith.constant dense<0.000000e+00> : vector<8x512xf32>
    %113 = tpu.matmul %107, %112, %cst_40 {dimension_numbers = #tpu.dot_dimension_numbers<[1], [0], [0], [1], [0, 0, 1, 1], [], []>} : vector<8x128xf32>, vector<128x512xf32>, vector<8x512xf32> -> vector<8x512xf32>
    %114 = arith.addf %111, %113 : vector<8x512xf32>
    %115 = vector.extract_strided_slice %114 {offsets = [0, 0], sizes = [8, 128], strides = [1, 1]} : vector<8x512xf32> to vector<8x128xf32>
    %116 = arith.negf %115 : vector<8x128xf32>
    %117 = math.exp %116 : vector<8x128xf32>
    %cst_41 = arith.constant 1.000000e+00 : f32
    %118 = vector.broadcast %cst_41 : f32 to vector<8x128xf32>
    %119 = arith.addf %118, %117 : vector<8x128xf32>
    %120 = arith.divf %118, %119 : vector<8x128xf32>
    %121 = vector.extract_strided_slice %114 {offsets = [0, 128], sizes = [8, 128], strides = [1, 1]} : vector<8x512xf32> to vector<8x128xf32>
    %122 = arith.negf %121 : vector<8x128xf32>
    %123 = math.exp %122 : vector<8x128xf32>
    %cst_42 = arith.constant 1.000000e+00 : f32
    %124 = vector.broadcast %cst_42 : f32 to vector<8x128xf32>
    %125 = arith.addf %124, %123 : vector<8x128xf32>
    %126 = arith.divf %124, %125 : vector<8x128xf32>
    %127 = vector.extract_strided_slice %114 {offsets = [0, 256], sizes = [8, 128], strides = [1, 1]} : vector<8x512xf32> to vector<8x128xf32>
    %128 = math.tanh %127 : vector<8x128xf32>
    %129 = vector.extract_strided_slice %114 {offsets = [0, 384], sizes = [8, 128], strides = [1, 1]} : vector<8x512xf32> to vector<8x128xf32>
    %130 = arith.negf %129 : vector<8x128xf32>
    %131 = math.exp %130 : vector<8x128xf32>
    %cst_43 = arith.constant 1.000000e+00 : f32
    %132 = vector.broadcast %cst_43 : f32 to vector<8x128xf32>
    %133 = arith.addf %132, %131 : vector<8x128xf32>
    %134 = arith.divf %132, %133 : vector<8x128xf32>
    %135 = arith.mulf %126, %105 : vector<8x128xf32>
    %136 = arith.mulf %120, %128 : vector<8x128xf32>
    %137 = arith.addf %135, %136 : vector<8x128xf32>
    %138 = math.tanh %137 : vector<8x128xf32>
    %139 = arith.mulf %134, %138 : vector<8x128xf32>
    %c4_i32 = arith.constant 4 : i32
    %c8_i32_44 = arith.constant 8 : i32
    %140 = arith.muli %c4_i32, %c8_i32_44 : i32
    %141 = tpu.assume_multiple %140, 8 : i32
    %142 = arith.index_cast %141 : i32 to index
    %c0_45 = arith.constant 0 : index
    %143 = vector.load %arg9[%142, %c0_45] : memref<128x512xf32, #tpu.memory_space<vmem>>, vector<8x512xf32>
    %c0_46 = arith.constant 0 : index
    %c0_47 = arith.constant 0 : index
    %144 = vector.load %arg4[%c0_46, %c0_47] : memref<128x512xf32, #tpu.memory_space<vmem>>, vector<128x512xf32>
    %cst_48 = arith.constant dense<0.000000e+00> : vector<8x512xf32>
    %145 = tpu.matmul %139, %144, %cst_48 {dimension_numbers = #tpu.dot_dimension_numbers<[1], [0], [0], [1], [0, 0, 1, 1], [], []>} : vector<8x128xf32>, vector<128x512xf32>, vector<8x512xf32> -> vector<8x512xf32>
    %146 = arith.addf %143, %145 : vector<8x512xf32>
    %147 = vector.extract_strided_slice %146 {offsets = [0, 0], sizes = [8, 128], strides = [1, 1]} : vector<8x512xf32> to vector<8x128xf32>
    %148 = arith.negf %147 : vector<8x128xf32>
    %149 = math.exp %148 : vector<8x128xf32>
    %cst_49 = arith.constant 1.000000e+00 : f32
    %150 = vector.broadcast %cst_49 : f32 to vector<8x128xf32>
    %151 = arith.addf %150, %149 : vector<8x128xf32>
    %152 = arith.divf %150, %151 : vector<8x128xf32>
    %153 = vector.extract_strided_slice %146 {offsets = [0, 128], sizes = [8, 128], strides = [1, 1]} : vector<8x512xf32> to vector<8x128xf32>
    %154 = arith.negf %153 : vector<8x128xf32>
    %155 = math.exp %154 : vector<8x128xf32>
    %cst_50 = arith.constant 1.000000e+00 : f32
    %156 = vector.broadcast %cst_50 : f32 to vector<8x128xf32>
    %157 = arith.addf %156, %155 : vector<8x128xf32>
    %158 = arith.divf %156, %157 : vector<8x128xf32>
    %159 = vector.extract_strided_slice %146 {offsets = [0, 256], sizes = [8, 128], strides = [1, 1]} : vector<8x512xf32> to vector<8x128xf32>
    %160 = math.tanh %159 : vector<8x128xf32>
    %161 = vector.extract_strided_slice %146 {offsets = [0, 384], sizes = [8, 128], strides = [1, 1]} : vector<8x512xf32> to vector<8x128xf32>
    %162 = arith.negf %161 : vector<8x128xf32>
    %163 = math.exp %162 : vector<8x128xf32>
    %cst_51 = arith.constant 1.000000e+00 : f32
    %164 = vector.broadcast %cst_51 : f32 to vector<8x128xf32>
    %165 = arith.addf %164, %163 : vector<8x128xf32>
    %166 = arith.divf %164, %165 : vector<8x128xf32>
    %167 = arith.mulf %158, %137 : vector<8x128xf32>
    %168 = arith.mulf %152, %160 : vector<8x128xf32>
    %169 = arith.addf %167, %168 : vector<8x128xf32>
    %170 = math.tanh %169 : vector<8x128xf32>
    %171 = arith.mulf %166, %170 : vector<8x128xf32>
    %c5_i32 = arith.constant 5 : i32
    %c8_i32_52 = arith.constant 8 : i32
    %172 = arith.muli %c5_i32, %c8_i32_52 : i32
    %173 = tpu.assume_multiple %172, 8 : i32
    %174 = arith.index_cast %173 : i32 to index
    %c0_53 = arith.constant 0 : index
    %175 = vector.load %arg9[%174, %c0_53] : memref<128x512xf32, #tpu.memory_space<vmem>>, vector<8x512xf32>
    %c0_54 = arith.constant 0 : index
    %c0_55 = arith.constant 0 : index
    %176 = vector.load %arg4[%c0_54, %c0_55] : memref<128x512xf32, #tpu.memory_space<vmem>>, vector<128x512xf32>
    %cst_56 = arith.constant dense<0.000000e+00> : vector<8x512xf32>
    %177 = tpu.matmul %171, %176, %cst_56 {dimension_numbers = #tpu.dot_dimension_numbers<[1], [0], [0], [1], [0, 0, 1, 1], [], []>} : vector<8x128xf32>, vector<128x512xf32>, vector<8x512xf32> -> vector<8x512xf32>
    %178 = arith.addf %175, %177 : vector<8x512xf32>
    %179 = vector.extract_strided_slice %178 {offsets = [0, 0], sizes = [8, 128], strides = [1, 1]} : vector<8x512xf32> to vector<8x128xf32>
    %180 = arith.negf %179 : vector<8x128xf32>
    %181 = math.exp %180 : vector<8x128xf32>
    %cst_57 = arith.constant 1.000000e+00 : f32
    %182 = vector.broadcast %cst_57 : f32 to vector<8x128xf32>
    %183 = arith.addf %182, %181 : vector<8x128xf32>
    %184 = arith.divf %182, %183 : vector<8x128xf32>
    %185 = vector.extract_strided_slice %178 {offsets = [0, 128], sizes = [8, 128], strides = [1, 1]} : vector<8x512xf32> to vector<8x128xf32>
    %186 = arith.negf %185 : vector<8x128xf32>
    %187 = math.exp %186 : vector<8x128xf32>
    %cst_58 = arith.constant 1.000000e+00 : f32
    %188 = vector.broadcast %cst_58 : f32 to vector<8x128xf32>
    %189 = arith.addf %188, %187 : vector<8x128xf32>
    %190 = arith.divf %188, %189 : vector<8x128xf32>
    %191 = vector.extract_strided_slice %178 {offsets = [0, 256], sizes = [8, 128], strides = [1, 1]} : vector<8x512xf32> to vector<8x128xf32>
    %192 = math.tanh %191 : vector<8x128xf32>
    %193 = vector.extract_strided_slice %178 {offsets = [0, 384], sizes = [8, 128], strides = [1, 1]} : vector<8x512xf32> to vector<8x128xf32>
    %194 = arith.negf %193 : vector<8x128xf32>
    %195 = math.exp %194 : vector<8x128xf32>
    %cst_59 = arith.constant 1.000000e+00 : f32
    %196 = vector.broadcast %cst_59 : f32 to vector<8x128xf32>
    %197 = arith.addf %196, %195 : vector<8x128xf32>
    %198 = arith.divf %196, %197 : vector<8x128xf32>
    %199 = arith.mulf %190, %169 : vector<8x128xf32>
    %200 = arith.mulf %184, %192 : vector<8x128xf32>
    %201 = arith.addf %199, %200 : vector<8x128xf32>
    %202 = math.tanh %201 : vector<8x128xf32>
    %203 = arith.mulf %198, %202 : vector<8x128xf32>
    %c6_i32 = arith.constant 6 : i32
    %c8_i32_60 = arith.constant 8 : i32
    %204 = arith.muli %c6_i32, %c8_i32_60 : i32
    %205 = tpu.assume_multiple %204, 8 : i32
    %206 = arith.index_cast %205 : i32 to index
    %c0_61 = arith.constant 0 : index
    %207 = vector.load %arg9[%206, %c0_61] : memref<128x512xf32, #tpu.memory_space<vmem>>, vector<8x512xf32>
    %c0_62 = arith.constant 0 : index
    %c0_63 = arith.constant 0 : index
    %208 = vector.load %arg4[%c0_62, %c0_63] : memref<128x512xf32, #tpu.memory_space<vmem>>, vector<128x512xf32>
    %cst_64 = arith.constant dense<0.000000e+00> : vector<8x512xf32>
    %209 = tpu.matmul %203, %208, %cst_64 {dimension_numbers = #tpu.dot_dimension_numbers<[1], [0], [0], [1], [0, 0, 1, 1], [], []>} : vector<8x128xf32>, vector<128x512xf32>, vector<8x512xf32> -> vector<8x512xf32>
    %210 = arith.addf %207, %209 : vector<8x512xf32>
    %211 = vector.extract_strided_slice %210 {offsets = [0, 0], sizes = [8, 128], strides = [1, 1]} : vector<8x512xf32> to vector<8x128xf32>
    %212 = arith.negf %211 : vector<8x128xf32>
    %213 = math.exp %212 : vector<8x128xf32>
    %cst_65 = arith.constant 1.000000e+00 : f32
    %214 = vector.broadcast %cst_65 : f32 to vector<8x128xf32>
    %215 = arith.addf %214, %213 : vector<8x128xf32>
    %216 = arith.divf %214, %215 : vector<8x128xf32>
    %217 = vector.extract_strided_slice %210 {offsets = [0, 128], sizes = [8, 128], strides = [1, 1]} : vector<8x512xf32> to vector<8x128xf32>
    %218 = arith.negf %217 : vector<8x128xf32>
    %219 = math.exp %218 : vector<8x128xf32>
    %cst_66 = arith.constant 1.000000e+00 : f32
    %220 = vector.broadcast %cst_66 : f32 to vector<8x128xf32>
    %221 = arith.addf %220, %219 : vector<8x128xf32>
    %222 = arith.divf %220, %221 : vector<8x128xf32>
    %223 = vector.extract_strided_slice %210 {offsets = [0, 256], sizes = [8, 128], strides = [1, 1]} : vector<8x512xf32> to vector<8x128xf32>
    %224 = math.tanh %223 : vector<8x128xf32>
    %225 = vector.extract_strided_slice %210 {offsets = [0, 384], sizes = [8, 128], strides = [1, 1]} : vector<8x512xf32> to vector<8x128xf32>
    %226 = arith.negf %225 : vector<8x128xf32>
    %227 = math.exp %226 : vector<8x128xf32>
    %cst_67 = arith.constant 1.000000e+00 : f32
    %228 = vector.broadcast %cst_67 : f32 to vector<8x128xf32>
    %229 = arith.addf %228, %227 : vector<8x128xf32>
    %230 = arith.divf %228, %229 : vector<8x128xf32>
    %231 = arith.mulf %222, %201 : vector<8x128xf32>
    %232 = arith.mulf %216, %224 : vector<8x128xf32>
    %233 = arith.addf %231, %232 : vector<8x128xf32>
    %234 = math.tanh %233 : vector<8x128xf32>
    %235 = arith.mulf %230, %234 : vector<8x128xf32>
    %c7_i32 = arith.constant 7 : i32
    %c8_i32_68 = arith.constant 8 : i32
    %236 = arith.muli %c7_i32, %c8_i32_68 : i32
    %237 = tpu.assume_multiple %236, 8 : i32
    %238 = arith.index_cast %237 : i32 to index
    %c0_69 = arith.constant 0 : index
    %239 = vector.load %arg9[%238, %c0_69] : memref<128x512xf32, #tpu.memory_space<vmem>>, vector<8x512xf32>
    %c0_70 = arith.constant 0 : index
    %c0_71 = arith.constant 0 : index
    %240 = vector.load %arg4[%c0_70, %c0_71] : memref<128x512xf32, #tpu.memory_space<vmem>>, vector<128x512xf32>
    %cst_72 = arith.constant dense<0.000000e+00> : vector<8x512xf32>
    %241 = tpu.matmul %235, %240, %cst_72 {dimension_numbers = #tpu.dot_dimension_numbers<[1], [0], [0], [1], [0, 0, 1, 1], [], []>} : vector<8x128xf32>, vector<128x512xf32>, vector<8x512xf32> -> vector<8x512xf32>
    %242 = arith.addf %239, %241 : vector<8x512xf32>
    %243 = vector.extract_strided_slice %242 {offsets = [0, 0], sizes = [8, 128], strides = [1, 1]} : vector<8x512xf32> to vector<8x128xf32>
    %244 = arith.negf %243 : vector<8x128xf32>
    %245 = math.exp %244 : vector<8x128xf32>
    %cst_73 = arith.constant 1.000000e+00 : f32
    %246 = vector.broadcast %cst_73 : f32 to vector<8x128xf32>
    %247 = arith.addf %246, %245 : vector<8x128xf32>
    %248 = arith.divf %246, %247 : vector<8x128xf32>
    %249 = vector.extract_strided_slice %242 {offsets = [0, 128], sizes = [8, 128], strides = [1, 1]} : vector<8x512xf32> to vector<8x128xf32>
    %250 = arith.negf %249 : vector<8x128xf32>
    %251 = math.exp %250 : vector<8x128xf32>
    %cst_74 = arith.constant 1.000000e+00 : f32
    %252 = vector.broadcast %cst_74 : f32 to vector<8x128xf32>
    %253 = arith.addf %252, %251 : vector<8x128xf32>
    %254 = arith.divf %252, %253 : vector<8x128xf32>
    %255 = vector.extract_strided_slice %242 {offsets = [0, 256], sizes = [8, 128], strides = [1, 1]} : vector<8x512xf32> to vector<8x128xf32>
    %256 = math.tanh %255 : vector<8x128xf32>
    %257 = vector.extract_strided_slice %242 {offsets = [0, 384], sizes = [8, 128], strides = [1, 1]} : vector<8x512xf32> to vector<8x128xf32>
    %258 = arith.negf %257 : vector<8x128xf32>
    %259 = math.exp %258 : vector<8x128xf32>
    %cst_75 = arith.constant 1.000000e+00 : f32
    %260 = vector.broadcast %cst_75 : f32 to vector<8x128xf32>
    %261 = arith.addf %260, %259 : vector<8x128xf32>
    %262 = arith.divf %260, %261 : vector<8x128xf32>
    %263 = arith.mulf %254, %233 : vector<8x128xf32>
    %264 = arith.mulf %248, %256 : vector<8x128xf32>
    %265 = arith.addf %263, %264 : vector<8x128xf32>
    %266 = math.tanh %265 : vector<8x128xf32>
    %267 = arith.mulf %262, %266 : vector<8x128xf32>
    %c8_i32_76 = arith.constant 8 : i32
    %c8_i32_77 = arith.constant 8 : i32
    %268 = arith.muli %c8_i32_76, %c8_i32_77 : i32
    %269 = tpu.assume_multiple %268, 8 : i32
    %270 = arith.index_cast %269 : i32 to index
    %c0_78 = arith.constant 0 : index
    %271 = vector.load %arg9[%270, %c0_78] : memref<128x512xf32, #tpu.memory_space<vmem>>, vector<8x512xf32>
    %c0_79 = arith.constant 0 : index
    %c0_80 = arith.constant 0 : index
    %272 = vector.load %arg4[%c0_79, %c0_80] : memref<128x512xf32, #tpu.memory_space<vmem>>, vector<128x512xf32>
    %cst_81 = arith.constant dense<0.000000e+00> : vector<8x512xf32>
    %273 = tpu.matmul %267, %272, %cst_81 {dimension_numbers = #tpu.dot_dimension_numbers<[1], [0], [0], [1], [0, 0, 1, 1], [], []>} : vector<8x128xf32>, vector<128x512xf32>, vector<8x512xf32> -> vector<8x512xf32>
    %274 = arith.addf %271, %273 : vector<8x512xf32>
    %275 = vector.extract_strided_slice %274 {offsets = [0, 0], sizes = [8, 128], strides = [1, 1]} : vector<8x512xf32> to vector<8x128xf32>
    %276 = arith.negf %275 : vector<8x128xf32>
    %277 = math.exp %276 : vector<8x128xf32>
    %cst_82 = arith.constant 1.000000e+00 : f32
    %278 = vector.broadcast %cst_82 : f32 to vector<8x128xf32>
    %279 = arith.addf %278, %277 : vector<8x128xf32>
    %280 = arith.divf %278, %279 : vector<8x128xf32>
    %281 = vector.extract_strided_slice %274 {offsets = [0, 128], sizes = [8, 128], strides = [1, 1]} : vector<8x512xf32> to vector<8x128xf32>
    %282 = arith.negf %281 : vector<8x128xf32>
    %283 = math.exp %282 : vector<8x128xf32>
    %cst_83 = arith.constant 1.000000e+00 : f32
    %284 = vector.broadcast %cst_83 : f32 to vector<8x128xf32>
    %285 = arith.addf %284, %283 : vector<8x128xf32>
    %286 = arith.divf %284, %285 : vector<8x128xf32>
    %287 = vector.extract_strided_slice %274 {offsets = [0, 256], sizes = [8, 128], strides = [1, 1]} : vector<8x512xf32> to vector<8x128xf32>
    %288 = math.tanh %287 : vector<8x128xf32>
    %289 = vector.extract_strided_slice %274 {offsets = [0, 384], sizes = [8, 128], strides = [1, 1]} : vector<8x512xf32> to vector<8x128xf32>
    %290 = arith.negf %289 : vector<8x128xf32>
    %291 = math.exp %290 : vector<8x128xf32>
    %cst_84 = arith.constant 1.000000e+00 : f32
    %292 = vector.broadcast %cst_84 : f32 to vector<8x128xf32>
    %293 = arith.addf %292, %291 : vector<8x128xf32>
    %294 = arith.divf %292, %293 : vector<8x128xf32>
    %295 = arith.mulf %286, %265 : vector<8x128xf32>
    %296 = arith.mulf %280, %288 : vector<8x128xf32>
    %297 = arith.addf %295, %296 : vector<8x128xf32>
    %298 = math.tanh %297 : vector<8x128xf32>
    %299 = arith.mulf %294, %298 : vector<8x128xf32>
    %c9_i32 = arith.constant 9 : i32
    %c8_i32_85 = arith.constant 8 : i32
    %300 = arith.muli %c9_i32, %c8_i32_85 : i32
    %301 = tpu.assume_multiple %300, 8 : i32
    %302 = arith.index_cast %301 : i32 to index
    %c0_86 = arith.constant 0 : index
    %303 = vector.load %arg9[%302, %c0_86] : memref<128x512xf32, #tpu.memory_space<vmem>>, vector<8x512xf32>
    %c0_87 = arith.constant 0 : index
    %c0_88 = arith.constant 0 : index
    %304 = vector.load %arg4[%c0_87, %c0_88] : memref<128x512xf32, #tpu.memory_space<vmem>>, vector<128x512xf32>
    %cst_89 = arith.constant dense<0.000000e+00> : vector<8x512xf32>
    %305 = tpu.matmul %299, %304, %cst_89 {dimension_numbers = #tpu.dot_dimension_numbers<[1], [0], [0], [1], [0, 0, 1, 1], [], []>} : vector<8x128xf32>, vector<128x512xf32>, vector<8x512xf32> -> vector<8x512xf32>
    %306 = arith.addf %303, %305 : vector<8x512xf32>
    %307 = vector.extract_strided_slice %306 {offsets = [0, 0], sizes = [8, 128], strides = [1, 1]} : vector<8x512xf32> to vector<8x128xf32>
    %308 = arith.negf %307 : vector<8x128xf32>
    %309 = math.exp %308 : vector<8x128xf32>
    %cst_90 = arith.constant 1.000000e+00 : f32
    %310 = vector.broadcast %cst_90 : f32 to vector<8x128xf32>
    %311 = arith.addf %310, %309 : vector<8x128xf32>
    %312 = arith.divf %310, %311 : vector<8x128xf32>
    %313 = vector.extract_strided_slice %306 {offsets = [0, 128], sizes = [8, 128], strides = [1, 1]} : vector<8x512xf32> to vector<8x128xf32>
    %314 = arith.negf %313 : vector<8x128xf32>
    %315 = math.exp %314 : vector<8x128xf32>
    %cst_91 = arith.constant 1.000000e+00 : f32
    %316 = vector.broadcast %cst_91 : f32 to vector<8x128xf32>
    %317 = arith.addf %316, %315 : vector<8x128xf32>
    %318 = arith.divf %316, %317 : vector<8x128xf32>
    %319 = vector.extract_strided_slice %306 {offsets = [0, 256], sizes = [8, 128], strides = [1, 1]} : vector<8x512xf32> to vector<8x128xf32>
    %320 = math.tanh %319 : vector<8x128xf32>
    %321 = vector.extract_strided_slice %306 {offsets = [0, 384], sizes = [8, 128], strides = [1, 1]} : vector<8x512xf32> to vector<8x128xf32>
    %322 = arith.negf %321 : vector<8x128xf32>
    %323 = math.exp %322 : vector<8x128xf32>
    %cst_92 = arith.constant 1.000000e+00 : f32
    %324 = vector.broadcast %cst_92 : f32 to vector<8x128xf32>
    %325 = arith.addf %324, %323 : vector<8x128xf32>
    %326 = arith.divf %324, %325 : vector<8x128xf32>
    %327 = arith.mulf %318, %297 : vector<8x128xf32>
    %328 = arith.mulf %312, %320 : vector<8x128xf32>
    %329 = arith.addf %327, %328 : vector<8x128xf32>
    %330 = math.tanh %329 : vector<8x128xf32>
    %331 = arith.mulf %326, %330 : vector<8x128xf32>
    %c10_i32 = arith.constant 10 : i32
    %c8_i32_93 = arith.constant 8 : i32
    %332 = arith.muli %c10_i32, %c8_i32_93 : i32
    %333 = tpu.assume_multiple %332, 8 : i32
    %334 = arith.index_cast %333 : i32 to index
    %c0_94 = arith.constant 0 : index
    %335 = vector.load %arg9[%334, %c0_94] : memref<128x512xf32, #tpu.memory_space<vmem>>, vector<8x512xf32>
    %c0_95 = arith.constant 0 : index
    %c0_96 = arith.constant 0 : index
    %336 = vector.load %arg4[%c0_95, %c0_96] : memref<128x512xf32, #tpu.memory_space<vmem>>, vector<128x512xf32>
    %cst_97 = arith.constant dense<0.000000e+00> : vector<8x512xf32>
    %337 = tpu.matmul %331, %336, %cst_97 {dimension_numbers = #tpu.dot_dimension_numbers<[1], [0], [0], [1], [0, 0, 1, 1], [], []>} : vector<8x128xf32>, vector<128x512xf32>, vector<8x512xf32> -> vector<8x512xf32>
    %338 = arith.addf %335, %337 : vector<8x512xf32>
    %339 = vector.extract_strided_slice %338 {offsets = [0, 0], sizes = [8, 128], strides = [1, 1]} : vector<8x512xf32> to vector<8x128xf32>
    %340 = arith.negf %339 : vector<8x128xf32>
    %341 = math.exp %340 : vector<8x128xf32>
    %cst_98 = arith.constant 1.000000e+00 : f32
    %342 = vector.broadcast %cst_98 : f32 to vector<8x128xf32>
    %343 = arith.addf %342, %341 : vector<8x128xf32>
    %344 = arith.divf %342, %343 : vector<8x128xf32>
    %345 = vector.extract_strided_slice %338 {offsets = [0, 128], sizes = [8, 128], strides = [1, 1]} : vector<8x512xf32> to vector<8x128xf32>
    %346 = arith.negf %345 : vector<8x128xf32>
    %347 = math.exp %346 : vector<8x128xf32>
    %cst_99 = arith.constant 1.000000e+00 : f32
    %348 = vector.broadcast %cst_99 : f32 to vector<8x128xf32>
    %349 = arith.addf %348, %347 : vector<8x128xf32>
    %350 = arith.divf %348, %349 : vector<8x128xf32>
    %351 = vector.extract_strided_slice %338 {offsets = [0, 256], sizes = [8, 128], strides = [1, 1]} : vector<8x512xf32> to vector<8x128xf32>
    %352 = math.tanh %351 : vector<8x128xf32>
    %353 = vector.extract_strided_slice %338 {offsets = [0, 384], sizes = [8, 128], strides = [1, 1]} : vector<8x512xf32> to vector<8x128xf32>
    %354 = arith.negf %353 : vector<8x128xf32>
    %355 = math.exp %354 : vector<8x128xf32>
    %cst_100 = arith.constant 1.000000e+00 : f32
    %356 = vector.broadcast %cst_100 : f32 to vector<8x128xf32>
    %357 = arith.addf %356, %355 : vector<8x128xf32>
    %358 = arith.divf %356, %357 : vector<8x128xf32>
    %359 = arith.mulf %350, %329 : vector<8x128xf32>
    %360 = arith.mulf %344, %352 : vector<8x128xf32>
    %361 = arith.addf %359, %360 : vector<8x128xf32>
    %362 = math.tanh %361 : vector<8x128xf32>
    %363 = arith.mulf %358, %362 : vector<8x128xf32>
    %c11_i32 = arith.constant 11 : i32
    %c8_i32_101 = arith.constant 8 : i32
    %364 = arith.muli %c11_i32, %c8_i32_101 : i32
    %365 = tpu.assume_multiple %364, 8 : i32
    %366 = arith.index_cast %365 : i32 to index
    %c0_102 = arith.constant 0 : index
    %367 = vector.load %arg9[%366, %c0_102] : memref<128x512xf32, #tpu.memory_space<vmem>>, vector<8x512xf32>
    %c0_103 = arith.constant 0 : index
    %c0_104 = arith.constant 0 : index
    %368 = vector.load %arg4[%c0_103, %c0_104] : memref<128x512xf32, #tpu.memory_space<vmem>>, vector<128x512xf32>
    %cst_105 = arith.constant dense<0.000000e+00> : vector<8x512xf32>
    %369 = tpu.matmul %363, %368, %cst_105 {dimension_numbers = #tpu.dot_dimension_numbers<[1], [0], [0], [1], [0, 0, 1, 1], [], []>} : vector<8x128xf32>, vector<128x512xf32>, vector<8x512xf32> -> vector<8x512xf32>
    %370 = arith.addf %367, %369 : vector<8x512xf32>
    %371 = vector.extract_strided_slice %370 {offsets = [0, 0], sizes = [8, 128], strides = [1, 1]} : vector<8x512xf32> to vector<8x128xf32>
    %372 = arith.negf %371 : vector<8x128xf32>
    %373 = math.exp %372 : vector<8x128xf32>
    %cst_106 = arith.constant 1.000000e+00 : f32
    %374 = vector.broadcast %cst_106 : f32 to vector<8x128xf32>
    %375 = arith.addf %374, %373 : vector<8x128xf32>
    %376 = arith.divf %374, %375 : vector<8x128xf32>
    %377 = vector.extract_strided_slice %370 {offsets = [0, 128], sizes = [8, 128], strides = [1, 1]} : vector<8x512xf32> to vector<8x128xf32>
    %378 = arith.negf %377 : vector<8x128xf32>
    %379 = math.exp %378 : vector<8x128xf32>
    %cst_107 = arith.constant 1.000000e+00 : f32
    %380 = vector.broadcast %cst_107 : f32 to vector<8x128xf32>
    %381 = arith.addf %380, %379 : vector<8x128xf32>
    %382 = arith.divf %380, %381 : vector<8x128xf32>
    %383 = vector.extract_strided_slice %370 {offsets = [0, 256], sizes = [8, 128], strides = [1, 1]} : vector<8x512xf32> to vector<8x128xf32>
    %384 = math.tanh %383 : vector<8x128xf32>
    %385 = vector.extract_strided_slice %370 {offsets = [0, 384], sizes = [8, 128], strides = [1, 1]} : vector<8x512xf32> to vector<8x128xf32>
    %386 = arith.negf %385 : vector<8x128xf32>
    %387 = math.exp %386 : vector<8x128xf32>
    %cst_108 = arith.constant 1.000000e+00 : f32
    %388 = vector.broadcast %cst_108 : f32 to vector<8x128xf32>
    %389 = arith.addf %388, %387 : vector<8x128xf32>
    %390 = arith.divf %388, %389 : vector<8x128xf32>
    %391 = arith.mulf %382, %361 : vector<8x128xf32>
    %392 = arith.mulf %376, %384 : vector<8x128xf32>
    %393 = arith.addf %391, %392 : vector<8x128xf32>
    %394 = math.tanh %393 : vector<8x128xf32>
    %395 = arith.mulf %390, %394 : vector<8x128xf32>
    %c12_i32 = arith.constant 12 : i32
    %c8_i32_109 = arith.constant 8 : i32
    %396 = arith.muli %c12_i32, %c8_i32_109 : i32
    %397 = tpu.assume_multiple %396, 8 : i32
    %398 = arith.index_cast %397 : i32 to index
    %c0_110 = arith.constant 0 : index
    %399 = vector.load %arg9[%398, %c0_110] : memref<128x512xf32, #tpu.memory_space<vmem>>, vector<8x512xf32>
    %c0_111 = arith.constant 0 : index
    %c0_112 = arith.constant 0 : index
    %400 = vector.load %arg4[%c0_111, %c0_112] : memref<128x512xf32, #tpu.memory_space<vmem>>, vector<128x512xf32>
    %cst_113 = arith.constant dense<0.000000e+00> : vector<8x512xf32>
    %401 = tpu.matmul %395, %400, %cst_113 {dimension_numbers = #tpu.dot_dimension_numbers<[1], [0], [0], [1], [0, 0, 1, 1], [], []>} : vector<8x128xf32>, vector<128x512xf32>, vector<8x512xf32> -> vector<8x512xf32>
    %402 = arith.addf %399, %401 : vector<8x512xf32>
    %403 = vector.extract_strided_slice %402 {offsets = [0, 0], sizes = [8, 128], strides = [1, 1]} : vector<8x512xf32> to vector<8x128xf32>
    %404 = arith.negf %403 : vector<8x128xf32>
    %405 = math.exp %404 : vector<8x128xf32>
    %cst_114 = arith.constant 1.000000e+00 : f32
    %406 = vector.broadcast %cst_114 : f32 to vector<8x128xf32>
    %407 = arith.addf %406, %405 : vector<8x128xf32>
    %408 = arith.divf %406, %407 : vector<8x128xf32>
    %409 = vector.extract_strided_slice %402 {offsets = [0, 128], sizes = [8, 128], strides = [1, 1]} : vector<8x512xf32> to vector<8x128xf32>
    %410 = arith.negf %409 : vector<8x128xf32>
    %411 = math.exp %410 : vector<8x128xf32>
    %cst_115 = arith.constant 1.000000e+00 : f32
    %412 = vector.broadcast %cst_115 : f32 to vector<8x128xf32>
    %413 = arith.addf %412, %411 : vector<8x128xf32>
    %414 = arith.divf %412, %413 : vector<8x128xf32>
    %415 = vector.extract_strided_slice %402 {offsets = [0, 256], sizes = [8, 128], strides = [1, 1]} : vector<8x512xf32> to vector<8x128xf32>
    %416 = math.tanh %415 : vector<8x128xf32>
    %417 = vector.extract_strided_slice %402 {offsets = [0, 384], sizes = [8, 128], strides = [1, 1]} : vector<8x512xf32> to vector<8x128xf32>
    %418 = arith.negf %417 : vector<8x128xf32>
    %419 = math.exp %418 : vector<8x128xf32>
    %cst_116 = arith.constant 1.000000e+00 : f32
    %420 = vector.broadcast %cst_116 : f32 to vector<8x128xf32>
    %421 = arith.addf %420, %419 : vector<8x128xf32>
    %422 = arith.divf %420, %421 : vector<8x128xf32>
    %423 = arith.mulf %414, %393 : vector<8x128xf32>
    %424 = arith.mulf %408, %416 : vector<8x128xf32>
    %425 = arith.addf %423, %424 : vector<8x128xf32>
    %426 = math.tanh %425 : vector<8x128xf32>
    %427 = arith.mulf %422, %426 : vector<8x128xf32>
    %c13_i32 = arith.constant 13 : i32
    %c8_i32_117 = arith.constant 8 : i32
    %428 = arith.muli %c13_i32, %c8_i32_117 : i32
    %429 = tpu.assume_multiple %428, 8 : i32
    %430 = arith.index_cast %429 : i32 to index
    %c0_118 = arith.constant 0 : index
    %431 = vector.load %arg9[%430, %c0_118] : memref<128x512xf32, #tpu.memory_space<vmem>>, vector<8x512xf32>
    %c0_119 = arith.constant 0 : index
    %c0_120 = arith.constant 0 : index
    %432 = vector.load %arg4[%c0_119, %c0_120] : memref<128x512xf32, #tpu.memory_space<vmem>>, vector<128x512xf32>
    %cst_121 = arith.constant dense<0.000000e+00> : vector<8x512xf32>
    %433 = tpu.matmul %427, %432, %cst_121 {dimension_numbers = #tpu.dot_dimension_numbers<[1], [0], [0], [1], [0, 0, 1, 1], [], []>} : vector<8x128xf32>, vector<128x512xf32>, vector<8x512xf32> -> vector<8x512xf32>
    %434 = arith.addf %431, %433 : vector<8x512xf32>
    %435 = vector.extract_strided_slice %434 {offsets = [0, 0], sizes = [8, 128], strides = [1, 1]} : vector<8x512xf32> to vector<8x128xf32>
    %436 = arith.negf %435 : vector<8x128xf32>
    %437 = math.exp %436 : vector<8x128xf32>
    %cst_122 = arith.constant 1.000000e+00 : f32
    %438 = vector.broadcast %cst_122 : f32 to vector<8x128xf32>
    %439 = arith.addf %438, %437 : vector<8x128xf32>
    %440 = arith.divf %438, %439 : vector<8x128xf32>
    %441 = vector.extract_strided_slice %434 {offsets = [0, 128], sizes = [8, 128], strides = [1, 1]} : vector<8x512xf32> to vector<8x128xf32>
    %442 = arith.negf %441 : vector<8x128xf32>
    %443 = math.exp %442 : vector<8x128xf32>
    %cst_123 = arith.constant 1.000000e+00 : f32
    %444 = vector.broadcast %cst_123 : f32 to vector<8x128xf32>
    %445 = arith.addf %444, %443 : vector<8x128xf32>
    %446 = arith.divf %444, %445 : vector<8x128xf32>
    %447 = vector.extract_strided_slice %434 {offsets = [0, 256], sizes = [8, 128], strides = [1, 1]} : vector<8x512xf32> to vector<8x128xf32>
    %448 = math.tanh %447 : vector<8x128xf32>
    %449 = vector.extract_strided_slice %434 {offsets = [0, 384], sizes = [8, 128], strides = [1, 1]} : vector<8x512xf32> to vector<8x128xf32>
    %450 = arith.negf %449 : vector<8x128xf32>
    %451 = math.exp %450 : vector<8x128xf32>
    %cst_124 = arith.constant 1.000000e+00 : f32
    %452 = vector.broadcast %cst_124 : f32 to vector<8x128xf32>
    %453 = arith.addf %452, %451 : vector<8x128xf32>
    %454 = arith.divf %452, %453 : vector<8x128xf32>
    %455 = arith.mulf %446, %425 : vector<8x128xf32>
    %456 = arith.mulf %440, %448 : vector<8x128xf32>
    %457 = arith.addf %455, %456 : vector<8x128xf32>
    %458 = math.tanh %457 : vector<8x128xf32>
    %459 = arith.mulf %454, %458 : vector<8x128xf32>
    %c14_i32 = arith.constant 14 : i32
    %c8_i32_125 = arith.constant 8 : i32
    %460 = arith.muli %c14_i32, %c8_i32_125 : i32
    %461 = tpu.assume_multiple %460, 8 : i32
    %462 = arith.index_cast %461 : i32 to index
    %c0_126 = arith.constant 0 : index
    %463 = vector.load %arg9[%462, %c0_126] : memref<128x512xf32, #tpu.memory_space<vmem>>, vector<8x512xf32>
    %c0_127 = arith.constant 0 : index
    %c0_128 = arith.constant 0 : index
    %464 = vector.load %arg4[%c0_127, %c0_128] : memref<128x512xf32, #tpu.memory_space<vmem>>, vector<128x512xf32>
    %cst_129 = arith.constant dense<0.000000e+00> : vector<8x512xf32>
    %465 = tpu.matmul %459, %464, %cst_129 {dimension_numbers = #tpu.dot_dimension_numbers<[1], [0], [0], [1], [0, 0, 1, 1], [], []>} : vector<8x128xf32>, vector<128x512xf32>, vector<8x512xf32> -> vector<8x512xf32>
    %466 = arith.addf %463, %465 : vector<8x512xf32>
    %467 = vector.extract_strided_slice %466 {offsets = [0, 0], sizes = [8, 128], strides = [1, 1]} : vector<8x512xf32> to vector<8x128xf32>
    %468 = arith.negf %467 : vector<8x128xf32>
    %469 = math.exp %468 : vector<8x128xf32>
    %cst_130 = arith.constant 1.000000e+00 : f32
    %470 = vector.broadcast %cst_130 : f32 to vector<8x128xf32>
    %471 = arith.addf %470, %469 : vector<8x128xf32>
    %472 = arith.divf %470, %471 : vector<8x128xf32>
    %473 = vector.extract_strided_slice %466 {offsets = [0, 128], sizes = [8, 128], strides = [1, 1]} : vector<8x512xf32> to vector<8x128xf32>
    %474 = arith.negf %473 : vector<8x128xf32>
    %475 = math.exp %474 : vector<8x128xf32>
    %cst_131 = arith.constant 1.000000e+00 : f32
    %476 = vector.broadcast %cst_131 : f32 to vector<8x128xf32>
    %477 = arith.addf %476, %475 : vector<8x128xf32>
    %478 = arith.divf %476, %477 : vector<8x128xf32>
    %479 = vector.extract_strided_slice %466 {offsets = [0, 256], sizes = [8, 128], strides = [1, 1]} : vector<8x512xf32> to vector<8x128xf32>
    %480 = math.tanh %479 : vector<8x128xf32>
    %481 = vector.extract_strided_slice %466 {offsets = [0, 384], sizes = [8, 128], strides = [1, 1]} : vector<8x512xf32> to vector<8x128xf32>
    %482 = arith.negf %481 : vector<8x128xf32>
    %483 = math.exp %482 : vector<8x128xf32>
    %cst_132 = arith.constant 1.000000e+00 : f32
    %484 = vector.broadcast %cst_132 : f32 to vector<8x128xf32>
    %485 = arith.addf %484, %483 : vector<8x128xf32>
    %486 = arith.divf %484, %485 : vector<8x128xf32>
    %487 = arith.mulf %478, %457 : vector<8x128xf32>
    %488 = arith.mulf %472, %480 : vector<8x128xf32>
    %489 = arith.addf %487, %488 : vector<8x128xf32>
    %490 = math.tanh %489 : vector<8x128xf32>
    %491 = arith.mulf %486, %490 : vector<8x128xf32>
    %c15_i32 = arith.constant 15 : i32
    %c8_i32_133 = arith.constant 8 : i32
    %492 = arith.muli %c15_i32, %c8_i32_133 : i32
    %493 = tpu.assume_multiple %492, 8 : i32
    %494 = arith.index_cast %493 : i32 to index
    %c0_134 = arith.constant 0 : index
    %495 = vector.load %arg9[%494, %c0_134] : memref<128x512xf32, #tpu.memory_space<vmem>>, vector<8x512xf32>
    %c0_135 = arith.constant 0 : index
    %c0_136 = arith.constant 0 : index
    %496 = vector.load %arg4[%c0_135, %c0_136] : memref<128x512xf32, #tpu.memory_space<vmem>>, vector<128x512xf32>
    %cst_137 = arith.constant dense<0.000000e+00> : vector<8x512xf32>
    %497 = tpu.matmul %491, %496, %cst_137 {dimension_numbers = #tpu.dot_dimension_numbers<[1], [0], [0], [1], [0, 0, 1, 1], [], []>} : vector<8x128xf32>, vector<128x512xf32>, vector<8x512xf32> -> vector<8x512xf32>
    %498 = arith.addf %495, %497 : vector<8x512xf32>
    %499 = vector.extract_strided_slice %498 {offsets = [0, 0], sizes = [8, 128], strides = [1, 1]} : vector<8x512xf32> to vector<8x128xf32>
    %500 = arith.negf %499 : vector<8x128xf32>
    %501 = math.exp %500 : vector<8x128xf32>
    %cst_138 = arith.constant 1.000000e+00 : f32
    %502 = vector.broadcast %cst_138 : f32 to vector<8x128xf32>
    %503 = arith.addf %502, %501 : vector<8x128xf32>
    %504 = arith.divf %502, %503 : vector<8x128xf32>
    %505 = vector.extract_strided_slice %498 {offsets = [0, 128], sizes = [8, 128], strides = [1, 1]} : vector<8x512xf32> to vector<8x128xf32>
    %506 = arith.negf %505 : vector<8x128xf32>
    %507 = math.exp %506 : vector<8x128xf32>
    %cst_139 = arith.constant 1.000000e+00 : f32
    %508 = vector.broadcast %cst_139 : f32 to vector<8x128xf32>
    %509 = arith.addf %508, %507 : vector<8x128xf32>
    %510 = arith.divf %508, %509 : vector<8x128xf32>
    %511 = vector.extract_strided_slice %498 {offsets = [0, 256], sizes = [8, 128], strides = [1, 1]} : vector<8x512xf32> to vector<8x128xf32>
    %512 = math.tanh %511 : vector<8x128xf32>
    %513 = vector.extract_strided_slice %498 {offsets = [0, 384], sizes = [8, 128], strides = [1, 1]} : vector<8x512xf32> to vector<8x128xf32>
    %514 = arith.negf %513 : vector<8x128xf32>
    %515 = math.exp %514 : vector<8x128xf32>
    %cst_140 = arith.constant 1.000000e+00 : f32
    %516 = vector.broadcast %cst_140 : f32 to vector<8x128xf32>
    %517 = arith.addf %516, %515 : vector<8x128xf32>
    %518 = arith.divf %516, %517 : vector<8x128xf32>
    %519 = arith.mulf %510, %489 : vector<8x128xf32>
    %520 = arith.mulf %504, %512 : vector<8x128xf32>
    %521 = arith.addf %519, %520 : vector<8x128xf32>
    %522 = math.tanh %521 : vector<8x128xf32>
    %523 = arith.mulf %518, %522 : vector<8x128xf32>
    %c16_i32 = arith.constant 16 : i32
    %c0_141 = arith.constant 0 : index
    %c0_142 = arith.constant 0 : index
    %524 = vector.load %arg10[%c0_141, %c0_142] : memref<8x128xf32, #tpu.memory_space<vmem>>, vector<8x128xf32>
    tpu.vector_store %arg10[%c0_141, %c0_142], %523 {strides = array<i32>} : memref<8x128xf32, #tpu.memory_space<vmem>>, vector<8x128xf32>,
    %c0_143 = arith.constant 0 : index
    %c0_144 = arith.constant 0 : index
    %525 = vector.load %arg11[%c0_143, %c0_144] : memref<8x128xf32, #tpu.memory_space<vmem>>, vector<8x128xf32>
    tpu.vector_store %arg11[%c0_143, %c0_144], %521 {strides = array<i32>} : memref<8x128xf32, #tpu.memory_space<vmem>>, vector<8x128xf32>,
    %c1_i32_145 = arith.constant 1 : i32
    %526 = arith.cmpi eq, %arg1, %c1_i32_145 : i32
    %527 = arith.extui %526 : i1 to i32
    %c0_i32_146 = arith.constant 0 : i32
    %528 = arith.cmpi ne, %527, %c0_i32_146 : i32
    scf.if %528 {
      %c0_147 = arith.constant 0 : index
      %c0_148 = arith.constant 0 : index
      %529 = vector.load %arg6[%c0_147, %c0_148] : memref<128x128xf32, #tpu.memory_space<vmem>>, vector<128x128xf32>
      %cst_149 = arith.constant dense<0.000000e+00> : vector<8x128xf32>
      %530 = tpu.matmul %523, %529, %cst_149 {dimension_numbers = #tpu.dot_dimension_numbers<[1], [0], [0], [1], [0, 0, 1, 1], [], []>} : vector<8x128xf32>, vector<128x128xf32>, vector<8x128xf32> -> vector<8x128xf32>
      %c0_150 = arith.constant 0 : index
      %c0_151 = arith.constant 0 : index
      %531 = vector.load %arg7[%c0_150, %c0_151] : memref<1x128xf32, #tpu.memory_space<vmem>>, vector<1x128xf32>
      %532 = vector.broadcast %531 : vector<1x128xf32> to vector<8x128xf32>
      %533 = arith.addf %530, %532 : vector<8x128xf32>
      %c0_152 = arith.constant 0 : index
      %c0_153 = arith.constant 0 : index
      %534 = vector.load %arg8[%c0_152, %c0_153] : memref<8x128xf32, #tpu.memory_space<vmem>>, vector<8x128xf32>
      tpu.vector_store %arg8[%c0_152, %c0_153], %533 {strides = array<i32>} : memref<8x128xf32, #tpu.memory_space<vmem>>, vector<8x128xf32>,
    } else {
    }
    return
  }
  func.func @transform_0(%arg0: i32, %arg1: i32) -> (i32, i32) {
    %c2_i32 = arith.constant 2 : i32
    %0 = arith.muli %arg0, %c2_i32 : i32
    %1 = arith.addi %0, %arg1 : i32
    %c0_i32 = arith.constant 0 : i32
    %c0_i32_0 = arith.constant 0 : i32
    return %1, %c0_i32 : i32, i32
  }
  func.func @transform_1(%arg0: i32, %arg1: i32) -> (i32, i32) {
    %c0_i32 = arith.constant 0 : i32
    %c0_i32_0 = arith.constant 0 : i32
    %c0_i32_1 = arith.constant 0 : i32
    return %c0_i32, %c0_i32_0 : i32, i32
  }
  func.func @transform_2(%arg0: i32, %arg1: i32) -> (i32, i32) {
    %c0_i32 = arith.constant 0 : i32
    %c0_i32_0 = arith.constant 0 : i32
    %c0_i32_1 = arith.constant 0 : i32
    return %c0_i32, %c0_i32_0 : i32, i32
  }
  func.func @transform_3(%arg0: i32, %arg1: i32) -> (i32, i32) {
    %c0_i32 = arith.constant 0 : i32
    %c0_i32_0 = arith.constant 0 : i32
    %c0_i32_1 = arith.constant 0 : i32
    return %c0_i32, %c0_i32_0 : i32, i32
  }
  func.func @transform_4(%arg0: i32, %arg1: i32) -> (i32, i32) {
    %c0_i32 = arith.constant 0 : i32
    %c0_i32_0 = arith.constant 0 : i32
    %c0_i32_1 = arith.constant 0 : i32
    return %c0_i32, %c0_i32_0 : i32, i32
  }
  func.func @transform_5(%arg0: i32, %arg1: i32) -> (i32, i32) {
    %c0_i32 = arith.constant 0 : i32
    %c0_i32_0 = arith.constant 0 : i32
    %c0_i32_1 = arith.constant 0 : i32
    return %c0_i32, %c0_i32_0 : i32, i32
  }
  func.func @transform_6(%arg0: i32, %arg1: i32) -> (i32, i32) {
    %c0_i32 = arith.constant 0 : i32
    %c0_i32_0 = arith.constant 0 : i32
    return %arg0, %c0_i32 : i32, i32
  }
}

</mosaic_0001>

<bundles_post_ra>
// kernel: tpu_custom_call.1
= control target key start
LH: loop header
LB: loop body
LE: loop exit
PB: predicated region body
PF: predicated region fallthrough
CT: control target
= control target key end

     0   :  { %s7354_s0 = inlined_call_operand.vmem [shape: f32[512,32], index: 0, kind: input, shape index: {}]   ;;  %s7355_s1 = inlined_call_operand.vmem [shape: f32[32,512], index: 1, kind: input, shape index: {}]   ;;  %s7356_s2 = inlined_call_operand.vmem [shape: f32[128,512], index: 2, kind: input, shape index: {}]   ;;  %s7357_s3 = inlined_call_operand.hbm [shape: f32[1,512], index: 3, kind: input, shape index: {}]   ;;  %s7358_s4 = inlined_call_operand.hbm [shape: f32[128,128], index: 4, kind: input, shape index: {}]   ;;  %s7359_s5 = inlined_call_operand.vmem [shape: f32[1,128], index: 5, kind: input, shape index: {}]   ;;  %s7360_s6 = inlined_call_operand.hbm [shape: f32[16,128], index: 6, kind: output, shape index: {}]  }
   0x1   :  { %7498 = sst [smem:[#allocation34_spill]] %s7357_s3 }
   0x2   :  { %7499 = sst [smem:[#allocation35_spill]] %s7358_s4 }
   0x3   :  { %11 = vsyncpa [#allocation6], 0 }
   0x4   :  { %12 = vsyncpa [#allocation9], 0 }
   0x5   :  { %13 = vsyncpa [#allocation7], 0 }
   0x6   :  { %15 = vsyncpa [#allocation7 + $0x1], 0  ;;  %s4803_s21 = smov 0   ;;  %s4805_s22 = smov 0  }
   0x7   :  { %s4807_s23 = smov 0   ;;  %s4809_s24 = smov 0  }
   0x8   :  { %s4811_s25 = smov 0   ;;  %s4813_s26 = smov 0  }
   0x9   :  { %s4815_s27 = smov 0   ;;  %s4817_s28 = smov 0  }
   0xa LB: > { %s3920_s29 = sadd.s32 4294967295, %s4757_s28   ;;  %s3921_s30 = sadd.s32 4294967294, %s4757_s28   ;;  %s4757_s28 = sphi %s4817_s28, %s21_s28   ;;  %s4753_s27 = sphi %s4815_s27, %s7779_s27   ;;  %s4749_s26 = sphi %s4813_s26, %s7778_s26   ;;  %s4745_s25 = sphi %s4811_s25, %s7777_s25   ;;  %s4741_s24 = sphi %s4809_s24, %s7776_s24   ;;  %s4737_s23 = sphi %s4807_s23, %s7775_s23   ;;  %s4733_s22 = sphi %s4805_s22, %s7774_s22   ;;  %s4729_s21 = sphi %s4803_s21, %s7773_s21  }
   0xb   : > { %s30_s7 = sadd.s32 1, %s4749_s26  ;;  %s33_s8 = sadd.s32 1, %s4753_s27 }
   0xc   : > { %p31_p0 = scmp.ge.s32.totalorder %s30_s7, 2  ;;  %s175_s9 = sadd.s32 1, %s4737_s23 }
   0xd   : > { %p185_p1 = scmp.ne.s32.totalorder %s4737_s23, %s4733_s22  ;;  %p186_p2 = scmp.eq.s32.totalorder %s3920_s29, 3 }
   0xe   : > { %s7781_s7 = smov (%p31_p0, %s30_s7), 0  ;;  %s7783_s8 = smov (!%p31_p0, %s33_s8), %s4753_s27 }
   0xf   : > { %p4853_p3 = por %p186_p2, %p185_p1  ;;  %p191_p4 = scmp.ne.s32.totalorder %s4733_s22, %s4729_s21 }
  0x10   : > { %p35_p5 = scmp.ge.s32.totalorder %s7783_s8, 2  ;;  %p192_p6 = scmp.eq.s32.totalorder %s3921_s30, 3 }
  0x11   : > { %s7500_s10 = scalar_select %p4853_p3, 1, 0 }
  0x12   : > { %p3924_p7 = scmp.ge.s32.totalorder %s4757_s28, 1  ;;  %p199_p8 = scmp.lt.s32.totalorder %s4757_s28, 5 }
  0x13   : > { %s7785_s8 = smov (%p35_p5, %s7783_s8), 0  ;;  %p4863_p9 = por %p192_p6, %p191_p4 }
  0x14   : > { %p4867_p10 = pnand %p3924_p7, %p199_p8  ;;  %s172_s13 = ssub.s32 %s4753_s27, %s7785_s8 }
  0x15   : > { %s7501_s11 = scalar_select %p4863_p9, 1, 0 }
  0x16   : > { %p173_p11 = scmp.eq.s32.totalorder %s172_s13, 0  ;;  %p4084_p12 = pneg %p4867_p10 }
  0x17   : > { %p4875_p13 = scmp.eq.s32.totalorder %s3920_s29, 0  ;;  %s4759_s16 = smov [#allocation5]  }
  0x18   : > { %s4880_s15 = scalar_select %p173_p11, %s4737_s23, %s175_s9  }
  0x19   : > { %s7503_s14 = scalar_select %p4875_p13, 1, 0 }
  0x1a   : > { %s218_s17 = sshll.u32 %s4759_s16, 4  ;;  %p4884_p0 = pnand %p4875_p13, %p4084_p12  ;;  %s219_s17 = int_to_ptr.vmem [resolvable:$true] %s218_s17 }
  0x1b   : > { %s4760_s19 = smov [#allocation8]   ;;  %s4616_s29 = scalar_lea.vmem %s219_s17, 64 }
  0x1c   : > { %s228_s20 = sshll.u32 %s4760_s19, 4  ;;  %p4607_p1 = pneg %p4884_p0  ;;  %s229_s20 = int_to_ptr.vmem [resolvable:$true] %s228_s20 }
  0x1d   : > { %p4617_p2 = scmp.ne.s32.totalorder %s219_s17, %s4616_s29  ;;  %p4624_p6 = scmp.lt.s32.totalorder %s219_s17, %s219_s17 }
  0x1e   : > { %p4625_p7 = scmp.lt.s32.totalorder %s4616_s29, %s4616_s29 }
  0x1f   : > { %p4619_p4 = pnand %p4617_p2, %p4607_p1 }
  0x20   : > { %p4626_p8 = por %p4625_p7, %p4624_p6 }
  0x21   : > { %p4620_p5 = pneg %p4619_p4 }
  0x23   : > { %p4627_p11 = pnand %p4626_p8, %p4620_p5 }
  0x25   : > { %4630 = shalt.err (!%p4627_p11)
}
  0x26   : > { %s7505_s3 = sld [smem:[#allocation34_spill]]  ;;  %s4642_s13 = scalar_lea.vmem %s229_s20, 2048 }
  0x27   : > { %p4643_p12 = scmp.ne.s32.totalorder %s229_s20, %s4642_s13  ;;  %p4650_p4 = scmp.lt.s32.totalorder %s229_s20, %s229_s20 }
  0x28   : > { %p4651_p3 = scmp.lt.s32.totalorder %s4642_s13, %s4642_s13 }
  0x29   : > { %p4645_p9 = pnand %p4643_p12, %p4607_p1 }
  0x2a   : > { %p4652_p13 = por %p4651_p3, %p4650_p4 }
  0x2b   : > { %p4646_p2 = pneg %p4645_p9 }
  0x2c   : > { %4087 = dma.hbm_to_vmem [thread:$0]  (!%p4884_p0), %s7505_s3, 64, %s219_s17, [#allocation6]  }
  0x2d   : > { %p4653_p6 = pnand %p4652_p13, %p4646_p2 }
  0x2f   : > { %4656 = shalt.err (!%p4653_p6)
}
  0x30   : > { %s4761_s16 = smov 128   ;;  %s4762_s19 = smov 8  }
  0x31   : > { %s7506_s4 = sld [smem:[#allocation35_spill]] }
  0x33   : > { %260 = sbr.rel (%p4867_p10) target bundleno = 4603 (0x11fb), region = 44 }
  0x37   : > { %4090 = dma.hbm_to_vmem [thread:$0]  (!%p4884_p0), %s7506_s4, 2048, %s229_s20, [#allocation9], %s4761_s16, %s4761_s16, %s4762_s19  }
  0x38   : > { %p7507_p5 = scmp.ne.s32.totalorder %s7503_s14, 0 }
  0x3a   : > { %4716 = dma.done.wait (%p7507_p5), [#allocation6], 64  }
  0x3b   : > { %4718 = vsyncadd (%p7507_p5), [#allocation6], 4294967232 }
  0x3c   : > { %4720 = dma.done.wait (%p7507_p5), [#allocation9], 2048  }
  0x3d   : > { %4722 = vsyncadd (%p7507_p5), [#allocation9], 4294965248  ;;  %s7364_s17 = sand.u32 1, %s4733_s22   ;;  %s3932_s18 = sshll.u32 %s4745_s25, 1  ;;  %v7365_v0 = vmov 0.0   ;;  %v335_v1 = vld [vmem:[%s7355_s1 + $0x68] sm:$0xff]  ;;  %v340_v33 = vlaneseq }
  0x3e   : > { %s4920_s12 = sshll.u32 %s7364_s17, 3  ;;  %473 = vmatprep.mubr.f32.mxu0 %v7365_v0  ;;  %634 = vmatprep.mubr.f32.mxu1 %v7365_v0  ;;  %s297_s20 = sadd.s32 %s4741_s24, %s3932_s18  ;;  %v337_v2 = vld [vmem:[%s7355_s1 + $0x78] sm:$0xff]  ;;  %v334_v3 = vld [vmem:[%s7355_s1 + $0x60] sm:$0xff]  ;;  %v336_v4 = vld [vmem:[%s7355_s1 + $0x70] sm:$0xff]  ;;  %vm360_vm0 = vcmask 261120  }
  0x3f   : > { %s3933_s9 = sshll.u32 %s297_s20, 4  ;;  %433 = vmatprep.subr.mxu0 %v335_v1  ;;  %594 = vmatprep.subr.mxu1 %v337_v2  ;;  %v331_v5 = vld [vmem:[%s7355_s1 + $0x48] sm:$0xff]  ;;  %v333_v6 = vld [vmem:[%s7355_s1 + $0x58] sm:$0xff]  ;;  %v330_v7 = vld [vmem:[%s7355_s1 + $0x40] sm:$0xff]  ;;  %v341_v34 = vshrl.u32 %v340_v33, 7  ;;  %s295_s16 = scalar_lea.vmem [#allocation10], %s4920_s12 }
  0x40   : > { %p299_p3 = scmp.lt.s32.totalorder %s3933_s9, 63  ;;  %434 = vmatpush1.msra.mxu0 %v334_v3  ;;  %595 = vmatpush1.msra.mxu1 %v336_v4  ;;  %v332_v8 = vld [vmem:[%s7355_s1 + $0x50] sm:$0xff]  ;;  %v327_v9 = vld [vmem:[%s7355_s1 + $0x28] sm:$0xff]  ;;  %v329_v10 = vld [vmem:[%s7355_s1 + $0x38] sm:$0xff]  ;;  %p3967_p9 = scmp.ne.s32.totalorder %s4741_s24, 0 }
  0x41   : > { %435 = vmatprep.subr.mxu0 %v331_v5  ;;  %596 = vmatprep.subr.mxu1 %v333_v6  ;;  %v326_v11 = vld [vmem:[%s7355_s1 + $0x20] sm:$0xff]  ;;  %v328_v12 = vld [vmem:[%s7355_s1 + $0x30] sm:$0xff]  ;;  %v323_v13 = vld [vmem:[%s7355_s1 + $0x8] sm:$0xff]  ;;  %v342_v35 = vsub.s32 0, %v341_v34  ;;  %v350_v36 = vsub.s32 2, %v341_v34  ;;  %v346_v38 = vsub.s32 1, %v341_v34 }
  0x42   : > { %s7787_s9 = smov (!%p299_p3, %s3933_s9), 63  ;;  %436 = vmatpush1.msra.mxu0 %v330_v7  ;;  %597 = vmatpush1.msra.mxu1 %v332_v8  ;;  %v325_v14 = vld [vmem:[%s7355_s1 + $0x18] sm:$0xff]  ;;  %v322_v15 = vld [vmem:[%s7355_s1] sm:$0xff]  ;;  %v324_v16 = vld [vmem:[%s7355_s1 + $0x10] sm:$0xff]  ;;  %v354_v39 = vsub.s32 3, %v341_v34 }
  0x43   : > { %s3934_s17 = sshll.u32 %s7787_s9, 3  ;;  %437 = vmatprep.subr.mxu0 %v327_v9  ;;  %598 = vmatprep.subr.mxu1 %v329_v10  ;;  %v338_v37 = vld [vmem:[#allocation5] sm:$0xf] }
  0x44   : > { %s4964_s29 = scalar_lea.vmem %s7354_s0, %s3934_s17  ;;  %438 = vmatpush1.msra.mxu0 %v326_v11  ;;  %599 = vmatpush1.msra.mxu1 %v328_v12  ;;  %v5056_v40 = vrot.slane %v338_v37, %v342_v35  ;;  %v5058_v41 = vrot.slane %v338_v37, %v350_v36  ;;  %v5060_v42 = vrot.slane %v338_v37, %v346_v38 }
  0x45   : > { %v306_v17 = vld [vmem:[%s4964_s29] sm:$0xff]  ;;  %439 = vmatprep.subr.mxu0 %v323_v13  ;;  %600 = vmatprep.subr.mxu1 %v325_v14  ;;  %v307_v18 = vld [vmem:[%s4964_s29 + $0x8] sm:$0xff]  ;;  %v308_v19 = vld [vmem:[%s4964_s29 + $0x10] sm:$0xff]  ;;  %v5062_v43 = vrot.slane %v338_v37, %v354_v39 }
  0x46   : > { %440 = vmatpush1.msra.mxu0 %v322_v15  ;;  %601 = vmatpush1.msra.mxu1 %v324_v16  ;;  %v309_v20 = vld [vmem:[%s4964_s29 + $0x18] sm:$0xff]  ;;  %v310_v21 = vld [vmem:[%s4964_s29 + $0x20] sm:$0xff]  ;;  %v311_v22 = vld [vmem:[%s4964_s29 + $0x28] sm:$0xff] }
  0x47   : > { %3935 = vmatmul.mubr.msk.f32.vlgmr.msra.gmra.mxu0 %vm360_vm0, %v306_v17  ;;  %3951 = vmatmul.mubr.msk.f32.vlgmr.msra.gmra.mxu1 %vm360_vm0, %v306_v17  ;;  %v312_v23 = vld [vmem:[%s4964_s29 + $0x30] sm:$0xff]  ;;  %v313_v24 = vld [vmem:[%s4964_s29 + $0x38] sm:$0xff]  ;;  %v314_v25 = vld [vmem:[%s4964_s29 + $0x40] sm:$0xff] }
  0x48   : > { %479 = vmatprep.mubr.f32.mxu0 %v7365_v0  ;;  %640 = vmatprep.mubr.f32.mxu1 %v7365_v0  ;;  %v315_v26 = vld [vmem:[%s4964_s29 + $0x48] sm:$0xff]  ;;  %v316_v27 = vld [vmem:[%s4964_s29 + $0x50] sm:$0xff]  ;;  %v317_v28 = vld [vmem:[%s4964_s29 + $0x58] sm:$0xff] }
  0x49   : > { %v318_v29 = vld [vmem:[%s4964_s29 + $0x60] sm:$0xff]  ;;  %v319_v30 = vld [vmem:[%s4964_s29 + $0x68] sm:$0xff]  ;;  %v320_v31 = vld [vmem:[%s4964_s29 + $0x70] sm:$0xff] }
  0x4a   : > { %v321_v32 = vld [vmem:[%s4964_s29 + $0x78] sm:$0xff] }
  0x4b   : > { %3936 = vmatmul.mubr.msk.f32.gmra.mxu0 %vm360_vm0, %v307_v18  ;;  %3952 = vmatmul.mubr.msk.f32.gmra.mxu1 %vm360_vm0, %v307_v18 }
  0x4c   : > { %485 = vmatprep.mubr.f32.mxu0 %v7365_v0  ;;  %646 = vmatprep.mubr.f32.mxu1 %v7365_v0 }
  0x4f   : > { %3937 = vmatmul.mubr.msk.f32.gmra.mxu0 %vm360_vm0, %v308_v19  ;;  %3953 = vmatmul.mubr.msk.f32.gmra.mxu1 %vm360_vm0, %v308_v19 }
  0x50   : > { %491 = vmatprep.mubr.f32.mxu0 %v7365_v0  ;;  %652 = vmatprep.mubr.f32.mxu1 %v7365_v0 }
  0x53   : > { %3938 = vmatmul.mubr.msk.f32.gmra.mxu0 %vm360_vm0, %v309_v20  ;;  %3954 = vmatmul.mubr.msk.f32.gmra.mxu1 %vm360_vm0, %v309_v20 }
  0x54   : > { %497 = vmatprep.mubr.f32.mxu0 %v7365_v0  ;;  %658 = vmatprep.mubr.f32.mxu1 %v7365_v0 }
  0x57   : > { %3939 = vmatmul.mubr.msk.f32.gmra.mxu0 %vm360_vm0, %v310_v21  ;;  %3955 = vmatmul.mubr.msk.f32.gmra.mxu1 %vm360_vm0, %v310_v21 }
  0x58   : > { %503 = vmatprep.mubr.f32.mxu0 %v7365_v0  ;;  %664 = vmatprep.mubr.f32.mxu1 %v7365_v0 }
  0x5b   : > { %3940 = vmatmul.mubr.msk.f32.gmra.mxu0 %vm360_vm0, %v311_v22  ;;  %3956 = vmatmul.mubr.msk.f32.gmra.mxu1 %vm360_vm0, %v311_v22 }
  0x5c   : > { %509 = vmatprep.mubr.f32.mxu0 %v7365_v0  ;;  %670 = vmatprep.mubr.f32.mxu1 %v7365_v0 }
  0x5f   : > { %3941 = vmatmul.mubr.msk.f32.gmra.mxu0 %vm360_vm0, %v312_v23  ;;  %3957 = vmatmul.mubr.msk.f32.gmra.mxu1 %vm360_vm0, %v312_v23 }
  0x60   : > { %515 = vmatprep.mubr.f32.mxu0 %v7365_v0  ;;  %676 = vmatprep.mubr.f32.mxu1 %v7365_v0 }
  0x63   : > { %3942 = vmatmul.mubr.msk.f32.gmra.mxu0 %vm360_vm0, %v313_v24  ;;  %3958 = vmatmul.mubr.msk.f32.gmra.mxu1 %vm360_vm0, %v313_v24 }
  0x64   : > { %521 = vmatprep.mubr.f32.mxu0 %v7365_v0  ;;  %682 = vmatprep.mubr.f32.mxu1 %v7365_v0 }
  0x67   : > { %3943 = vmatmul.mubr.msk.f32.gmra.mxu0 %vm360_vm0, %v314_v25  ;;  %3959 = vmatmul.mubr.msk.f32.gmra.mxu1 %vm360_vm0, %v314_v25 }
  0x68   : > { %527 = vmatprep.mubr.f32.mxu0 %v7365_v0  ;;  %688 = vmatprep.mubr.f32.mxu1 %v7365_v0 }
  0x6b   : > { %3944 = vmatmul.mubr.msk.f32.gmra.mxu0 %vm360_vm0, %v315_v26  ;;  %3960 = vmatmul.mubr.msk.f32.gmra.mxu1 %vm360_vm0, %v315_v26 }
  0x6c   : > { %533 = vmatprep.mubr.f32.mxu0 %v7365_v0  ;;  %694 = vmatprep.mubr.f32.mxu1 %v7365_v0 }
  0x6f   : > { %3945 = vmatmul.mubr.msk.f32.gmra.mxu0 %vm360_vm0, %v316_v27  ;;  %3961 = vmatmul.mubr.msk.f32.gmra.mxu1 %vm360_vm0, %v316_v27 }
  0x70   : > { %539 = vmatprep.mubr.f32.mxu0 %v7365_v0  ;;  %700 = vmatprep.mubr.f32.mxu1 %v7365_v0 }
  0x73   : > { %3946 = vmatmul.mubr.msk.f32.gmra.mxu0 %vm360_vm0, %v317_v28  ;;  %3962 = vmatmul.mubr.msk.f32.gmra.mxu1 %vm360_vm0, %v317_v28 }
  0x74   : > { %545 = vmatprep.mubr.f32.mxu0 %v7365_v0  ;;  %706 = vmatprep.mubr.f32.mxu1 %v7365_v0 }
  0x77   : > { %3947 = vmatmul.mubr.msk.f32.gmra.mxu0 %vm360_vm0, %v318_v29  ;;  %3963 = vmatmul.mubr.msk.f32.gmra.mxu1 %vm360_vm0, %v318_v29 }
  0x78   : > { %551 = vmatprep.mubr.f32.mxu0 %v7365_v0  ;;  %712 = vmatprep.mubr.f32.mxu1 %v7365_v0 }
  0x7b   : > { %3948 = vmatmul.mubr.msk.f32.gmra.mxu0 %vm360_vm0, %v319_v30  ;;  %3964 = vmatmul.mubr.msk.f32.gmra.mxu1 %vm360_vm0, %v319_v30 }
  0x7c   : > { %557 = vmatprep.mubr.f32.mxu0 %v7365_v0  ;;  %718 = vmatprep.mubr.f32.mxu1 %v7365_v0 }
  0x7f   : > { %3949 = vmatmul.mubr.msk.f32.gmra.mxu0 %vm360_vm0, %v320_v31  ;;  %3965 = vmatmul.mubr.msk.f32.gmra.mxu1 %vm360_vm0, %v320_v31 }
  0x80   : > { %563 = vmatprep.mubr.f32.mxu0 %v7365_v0  ;;  %724 = vmatprep.mubr.f32.mxu1 %v7365_v0 }
  0x83   : > { %3950 = vmatmul.mubr.msk.f32.gmra.mxu0 %vm360_vm0, %v321_v32  ;;  %3966 = vmatmul.mubr.msk.f32.gmra.mxu1 %vm360_vm0, %v321_v32 }
 0x107   : > { %v475_v44 = vpop.f32.mrf.mxu0  ;;  %v636_v45 = vpop.f32.mrf.mxu1 }
 0x108   : > { %v476_v46 = vadd.f32 %v475_v44, %v5056_v40  ;;  %v637_v47 = vadd.f32 %v636_v45, %v5058_v41 }
 0x109   : > { %v477_v48 = vpop.f32.mrf.mxu0  ;;  %v638_v49 = vpop.f32.mrf.mxu1 }
 0x10a   : > { %731 = vst [vmem:[#allocation2 + $0xb0] sm:$0xff] %v476_v46  ;;  %733 = vst [vmem:[#allocation2 + $0xd8] sm:$0xff] %v637_v47  ;;  %v478_v50 = vadd.f32 %v477_v48, %v5060_v42  ;;  %v639_v51 = vadd.f32 %v638_v49, %v5062_v43 }
 0x10b   : > { %v481_v52 = vpop.f32.mrf.mxu0  ;;  %v642_v53 = vpop.f32.mrf.mxu1 }
 0x10c   : > { %732 = vst [vmem:[#allocation2 + $0x1b0] sm:$0xff] %v478_v50  ;;  %734 = vst [vmem:[#allocation2 + $0x18] sm:$0xff] %v639_v51  ;;  %v482_v54 = vadd.f32 %v481_v52, %v5056_v40  ;;  %v643_v55 = vadd.f32 %v642_v53, %v5058_v41 }
 0x10d   : > { %v483_v56 = vpop.f32.mrf.mxu0  ;;  %v644_v57 = vpop.f32.mrf.mxu1 }
 0x10e   : > { %735 = vst [vmem:[#allocation2 + $0x50] sm:$0xff] %v482_v54  ;;  %737 = vst [vmem:[#allocation2 + $0x130] sm:$0xff] %v643_v55  ;;  %v484_v58 = vadd.f32 %v483_v56, %v5060_v42  ;;  %v645_v59 = vadd.f32 %v644_v57, %v5062_v43 }
 0x10f   : > { %v487_v60 = vpop.f32.mrf.mxu0  ;;  %v648_v61 = vpop.f32.mrf.mxu1 }
 0x110   : > { %736 = vst [vmem:[#allocation2 + $0x168] sm:$0xff] %v484_v58  ;;  %738 = vst [vmem:[#allocation2 + $0x48] sm:$0xff] %v645_v59  ;;  %v488_v62 = vadd.f32 %v487_v60, %v5056_v40  ;;  %v649_v63 = vadd.f32 %v648_v61, %v5058_v41 }
 0x111   : > { %v489_v1 = vpop.f32.mrf.mxu0  ;;  %v650_v2 = vpop.f32.mrf.mxu1 }
 0x112   : > { %739 = vst [vmem:[#allocation2 + $0x180] sm:$0xff] %v488_v62  ;;  %741 = vst [vmem:[#allocation2 + $0x118] sm:$0xff] %v649_v63  ;;  %v490_v3 = vadd.f32 %v489_v1, %v5060_v42  ;;  %v651_v4 = vadd.f32 %v650_v2, %v5062_v43 }
 0x113   : > { %v493_v5 = vpop.f32.mrf.mxu0  ;;  %v654_v6 = vpop.f32.mrf.mxu1 }
 0x114   : > { %740 = vst [vmem:[#allocation2 + $0x110] sm:$0xff] %v490_v3  ;;  %742 = vst [vmem:[#allocation2 + $0x98] sm:$0xff] %v651_v4  ;;  %v494_v7 = vadd.f32 %v493_v5, %v5056_v40  ;;  %v655_v8 = vadd.f32 %v654_v6, %v5058_v41 }
 0x115   : > { %v495_v9 = vpop.f32.mrf.mxu0  ;;  %v656_v10 = vpop.f32.mrf.mxu1 }
 0x116   : > { %743 = vst [vmem:[#allocation2 + $0x120] sm:$0xff] %v494_v7  ;;  %745 = vst [vmem:[#allocation2 + $0x108] sm:$0xff] %v655_v8  ;;  %v496_v11 = vadd.f32 %v495_v9, %v5060_v42  ;;  %v657_v12 = vadd.f32 %v656_v10, %v5062_v43 }
 0x117   : > { %v499_v13 = vpop.f32.mrf.mxu0  ;;  %v660_v14 = vpop.f32.mrf.mxu1 }
 0x118   : > { %744 = vst [vmem:[#allocation2 + $0x150] sm:$0xff] %v496_v11  ;;  %746 = vst [vmem:[#allocation2 + $0x60] sm:$0xff] %v657_v12  ;;  %v500_v15 = vadd.f32 %v499_v13, %v5056_v40  ;;  %v661_v16 = vadd.f32 %v660_v14, %v5058_v41 }
 0x119   : > { %v501_v17 = vpop.f32.mrf.mxu0  ;;  %v662_v18 = vpop.f32.mrf.mxu1 }
 0x11a   : > { %747 = vst [vmem:[#allocation2 + $0xe0] sm:$0xff] %v500_v15  ;;  %749 = vst [vmem:[#allocation2 + $0x138] sm:$0xff] %v661_v16  ;;  %v502_v19 = vadd.f32 %v501_v17, %v5060_v42  ;;  %v663_v20 = vadd.f32 %v662_v18, %v5062_v43 }
 0x11b   : > { %v505_v21 = vpop.f32.mrf.mxu0  ;;  %v666_v22 = vpop.f32.mrf.mxu1 }
 0x11c   : > { %748 = vst [vmem:[#allocation2 + $0x188] sm:$0xff] %v502_v19  ;;  %750 = vst [vmem:[#allocation2 + $0x140] sm:$0xff] %v663_v20  ;;  %v506_v23 = vadd.f32 %v505_v21, %v5056_v40  ;;  %v667_v24 = vadd.f32 %v666_v22, %v5058_v41 }
 0x11d   : > { %v507_v25 = vpop.f32.mrf.mxu0  ;;  %v668_v26 = vpop.f32.mrf.mxu1 }
 0x11e   : > { %751 = vst [vmem:[#allocation2 + $0x80] sm:$0xff] %v506_v23  ;;  %753 = vst [vmem:[#allocation2 + $0x1b8] sm:$0xff] %v667_v24  ;;  %v508_v27 = vadd.f32 %v507_v25, %v5060_v42  ;;  %v669_v28 = vadd.f32 %v668_v26, %v5062_v43 }
 0x11f   : > { %v511_v29 = vpop.f32.mrf.mxu0  ;;  %v672_v30 = vpop.f32.mrf.mxu1 }
 0x120   : > { %752 = vst [vmem:[#allocation2 + $0x1a8] sm:$0xff] %v508_v27  ;;  %754 = vst [vmem:[#allocation2 + $0x28] sm:$0xff] %v669_v28  ;;  %v512_v31 = vadd.f32 %v511_v29, %v5056_v40  ;;  %v673_v32 = vadd.f32 %v672_v30, %v5058_v41 }
 0x121   : > { %v513_v33 = vpop.f32.mrf.mxu0  ;;  %v674_v34 = vpop.f32.mrf.mxu1 }
 0x122   : > { %755 = vst [vmem:[#allocation2 + $0x1e8] sm:$0xff] %v512_v31  ;;  %757 = vst [vmem:[#allocation2 + $0x160] sm:$0xff] %v673_v32  ;;  %v514_v35 = vadd.f32 %v513_v33, %v5060_v42  ;;  %v675_v36 = vadd.f32 %v674_v34, %v5062_v43 }
 0x123   : > { %v517_v37 = vpop.f32.mrf.mxu0  ;;  %v678_v38 = vpop.f32.mrf.mxu1 }
 0x124   : > { %756 = vst [vmem:[#allocation2 + $0xf8] sm:$0xff] %v514_v35  ;;  %758 = vst [vmem:[#allocation2 + $0x30] sm:$0xff] %v675_v36  ;;  %v518_v39 = vadd.f32 %v517_v37, %v5056_v40  ;;  %v679_v44 = vadd.f32 %v678_v38, %v5058_v41 }
 0x125   : > { %v519_v45 = vpop.f32.mrf.mxu0  ;;  %v680_v46 = vpop.f32.mrf.mxu1 }
 0x126   : > { %759 = vst [vmem:[#allocation2 + $0x1e0] sm:$0xff] %v518_v39  ;;  %761 = vst [vmem:[#allocation2 + $0xf0] sm:$0xff] %v679_v44  ;;  %v520_v47 = vadd.f32 %v519_v45, %v5060_v42  ;;  %v681_v48 = vadd.f32 %v680_v46, %v5062_v43 }
 0x127   : > { %v523_v49 = vpop.f32.mrf.mxu0  ;;  %v684_v50 = vpop.f32.mrf.mxu1 }
 0x128   : > { %760 = vst [vmem:[#allocation2] sm:$0xff] %v520_v47  ;;  %762 = vst [vmem:[#allocation2 + $0x8] sm:$0xff] %v681_v48  ;;  %v524_v51 = vadd.f32 %v523_v49, %v5056_v40  ;;  %v685_v52 = vadd.f32 %v684_v50, %v5058_v41 }
 0x129   : > { %v525_v53 = vpop.f32.mrf.mxu0  ;;  %v686_v54 = vpop.f32.mrf.mxu1 }
 0x12a   : > { %763 = vst [vmem:[#allocation2 + $0x148] sm:$0xff] %v524_v51  ;;  %765 = vst [vmem:[#allocation2 + $0x100] sm:$0xff] %v685_v52  ;;  %v526_v55 = vadd.f32 %v525_v53, %v5060_v42  ;;  %v687_v56 = vadd.f32 %v686_v54, %v5062_v43 }
 0x12b   : > { %v529_v57 = vpop.f32.mrf.mxu0  ;;  %v690_v58 = vpop.f32.mrf.mxu1 }
 0x12c   : > { %764 = vst [vmem:[#allocation2 + $0x1d0] sm:$0xff] %v526_v55  ;;  %766 = vst [vmem:[#allocation2 + $0xc8] sm:$0xff] %v687_v56  ;;  %v530_v59 = vadd.f32 %v529_v57, %v5056_v40  ;;  %v691_v60 = vadd.f32 %v690_v58, %v5058_v41 }
 0x12d   : > { %v531_v61 = vpop.f32.mrf.mxu0  ;;  %v692_v62 = vpop.f32.mrf.mxu1 }
 0x12e   : > { %767 = vst [vmem:[#allocation2 + $0x40] sm:$0xff] %v530_v59  ;;  %769 = vst [vmem:[#allocation2 + $0x20] sm:$0xff] %v691_v60  ;;  %v532_v63 = vadd.f32 %v531_v61, %v5060_v42  ;;  %v693_v1 = vadd.f32 %v692_v62, %v5062_v43 }
 0x12f   : > { %v535_v2 = vpop.f32.mrf.mxu0  ;;  %v696_v3 = vpop.f32.mrf.mxu1 }
 0x130   : > { %768 = vst [vmem:[#allocation2 + $0x1f8] sm:$0xff] %v532_v63  ;;  %770 = vst [vmem:[#allocation2 + $0x128] sm:$0xff] %v693_v1  ;;  %v536_v4 = vadd.f32 %v535_v2, %v5056_v40  ;;  %v697_v5 = vadd.f32 %v696_v3, %v5058_v41 }
 0x131   : > { %v537_v6 = vpop.f32.mrf.mxu0  ;;  %v698_v7 = vpop.f32.mrf.mxu1 }
 0x132   : > { %771 = vst [vmem:[#allocation2 + $0x1a0] sm:$0xff] %v536_v4  ;;  %773 = vst [vmem:[#allocation2 + $0xe8] sm:$0xff] %v697_v5  ;;  %v538_v8 = vadd.f32 %v537_v6, %v5060_v42  ;;  %v699_v9 = vadd.f32 %v698_v7, %v5062_v43 }
 0x133   : > { %v541_v10 = vpop.f32.mrf.mxu0  ;;  %v702_v11 = vpop.f32.mrf.mxu1 }
 0x134   : > { %772 = vst [vmem:[#allocation2 + $0x1f0] sm:$0xff] %v538_v8  ;;  %774 = vst [vmem:[#allocation2 + $0x78] sm:$0xff] %v699_v9  ;;  %v542_v12 = vadd.f32 %v541_v10, %v5056_v40  ;;  %v703_v13 = vadd.f32 %v702_v11, %v5058_v41 }
 0x135   : > { %v543_v14 = vpop.f32.mrf.mxu0  ;;  %v704_v15 = vpop.f32.mrf.mxu1 }
 0x136   : > { %775 = vst [vmem:[#allocation2 + $0x70] sm:$0xff] %v542_v12  ;;  %777 = vst [vmem:[#allocation2 + $0x1d8] sm:$0xff] %v703_v13  ;;  %v544_v16 = vadd.f32 %v543_v14, %v5060_v42  ;;  %v705_v17 = vadd.f32 %v704_v15, %v5062_v43 }
 0x137   : > { %v547_v18 = vpop.f32.mrf.mxu0  ;;  %v708_v19 = vpop.f32.mrf.mxu1 }
 0x138   : > { %776 = vst [vmem:[#allocation2 + $0x90] sm:$0xff] %v544_v16  ;;  %778 = vst [vmem:[#allocation2 + $0xd0] sm:$0xff] %v705_v17  ;;  %v548_v20 = vadd.f32 %v547_v18, %v5056_v40  ;;  %v709_v21 = vadd.f32 %v708_v19, %v5058_v41 }
 0x139   : > { %v549_v22 = vpop.f32.mrf.mxu0  ;;  %v710_v23 = vpop.f32.mrf.mxu1 }
 0x13a   : > { %779 = vst [vmem:[#allocation2 + $0xb8] sm:$0xff] %v548_v20  ;;  %781 = vst [vmem:[#allocation2 + $0xa8] sm:$0xff] %v709_v21  ;;  %v550_v24 = vadd.f32 %v549_v22, %v5060_v42  ;;  %v711_v25 = vadd.f32 %v710_v23, %v5062_v43 }
 0x13b   : > { %v553_v26 = vpop.f32.mrf.mxu0  ;;  %v714_v27 = vpop.f32.mrf.mxu1 }
 0x13c   : > { %780 = vst [vmem:[#allocation2 + $0x88] sm:$0xff] %v550_v24  ;;  %782 = vst [vmem:[#allocation2 + $0x1c8] sm:$0xff] %v711_v25  ;;  %v554_v28 = vadd.f32 %v553_v26, %v5056_v40  ;;  %v715_v29 = vadd.f32 %v714_v27, %v5058_v41 }
 0x13d   : > { %v555_v30 = vpop.f32.mrf.mxu0  ;;  %v716_v31 = vpop.f32.mrf.mxu1 }
 0x13e   : > { %783 = vst [vmem:[#allocation2 + $0x170] sm:$0xff] %v554_v28  ;;  %785 = vst [vmem:[#allocation2 + $0x68] sm:$0xff] %v715_v29  ;;  %v556_v32 = vadd.f32 %v555_v30, %v5060_v42  ;;  %v717_v33 = vadd.f32 %v716_v31, %v5062_v43 }
 0x13f   : > { %v559_v34 = vpop.f32.mrf.mxu0  ;;  %v720_v35 = vpop.f32.mrf.mxu1 }
 0x140   : > { %784 = vst [vmem:[#allocation2 + $0x178] sm:$0xff] %v556_v32  ;;  %786 = vst [vmem:[#allocation2 + $0x190] sm:$0xff] %v717_v33  ;;  %v560_v36 = vadd.f32 %v559_v34, %v5056_v40  ;;  %v721_v37 = vadd.f32 %v720_v35, %v5058_v41 }
 0x141   : > { %v561_v38 = vpop.f32.mrf.mxu0  ;;  %v722_v39 = vpop.f32.mrf.mxu1 }
 0x142   : > { %787 = vst [vmem:[#allocation2 + $0x198] sm:$0xff] %v560_v36  ;;  %789 = vst [vmem:[#allocation2 + $0xc0] sm:$0xff] %v721_v37  ;;  %v562_v44 = vadd.f32 %v561_v38, %v5060_v42  ;;  %v723_v45 = vadd.f32 %v722_v39, %v5062_v43 }
 0x143   : > { %v565_v46 = vpop.f32.mrf.mxu0  ;;  %v726_v47 = vpop.f32.mrf.mxu1 }
 0x144   : > { %788 = vst [vmem:[#allocation2 + $0x38] sm:$0xff] %v562_v44  ;;  %790 = vst [vmem:[#allocation2 + $0x1c0] sm:$0xff] %v723_v45  ;;  %v566_v48 = vadd.f32 %v565_v46, %v5056_v40  ;;  %v727_v49 = vadd.f32 %v726_v47, %v5058_v41  ;;  %798 = sbr.rel (%p3967_p9) target bundleno = 331 (0x14b), region = 56 }
 0x145   : > { %v567_v50 = vpop.f32.mrf.mxu0  ;;  %v728_v51 = vpop.f32.mrf.mxu1 }
 0x146   : > { %791 = vst [vmem:[#allocation2 + $0x158] sm:$0xff] %v566_v48  ;;  %793 = vst [vmem:[#allocation2 + $0x58] sm:$0xff] %v727_v49  ;;  %v568_v52 = vadd.f32 %v567_v50, %v5060_v42  ;;  %v729_v53 = vadd.f32 %v728_v51, %v5062_v43 }
 0x148   : > { %792 = vst [vmem:[#allocation2 + $0x10] sm:$0xff] %v568_v52  ;;  %794 = vst [vmem:[#allocation2 + $0xa0] sm:$0xff] %v729_v53 }
 0x149   : > { %v4764_v54 = vmov 0.0  }
 0x14a   : > { %799 = vst [vmem:[#allocation3] sm:$0xff] %v4764_v54  ;;  %800 = vst [vmem:[#allocation4] sm:$0xff] %v4764_v54 }
 0x14b PF: > { %v5133_v40 = vld [vmem:[%s7356_s2 + $0x1e8] sm:$0xff]  ;;  %v5138_v41 = vld [vmem:[%s7356_s2 + $0x1e0] sm:$0xff]  ;;  %938 = vmatprep.mubr.f32.mxu0 %v7365_v0  ;;  %1009 = vmatprep.mubr.f32.mxu1 %v7365_v0  ;;  %v5180_v59 = vld [vmem:[%s7356_s2 + $0x1f8] sm:$0xff]  ;;  %p4016_p10 = scmp.ne.s32.totalorder %s4741_s24, 1 }
 0x14c   : > { %7508 = vst [vmem:[#allocation14_spill] sm:$0xff] %v5133_v40  ;;  %v5143_v42 = vld [vmem:[%s7356_s2 + $0x1c8] sm:$0xff]  ;;  %874 = vmatprep.subr.mxu0 %v5133_v40  ;;  %v5151_v43 = vld [vmem:[%s7356_s2 + $0x1c0] sm:$0xff]  ;;  %7509 = vst [vmem:[#allocation15_spill] sm:$0xff] %v5180_v59  ;;  %945 = vmatprep.subr.mxu1 %v5180_v59 }
 0x14d   : > { %875 = vmatpush1.msra.mxu0 %v5138_v41  ;;  %v5157_v55 = vld [vmem:[%s7356_s2 + $0x1a8] sm:$0xff]  ;;  %v5163_v56 = vld [vmem:[%s7356_s2 + $0x1a0] sm:$0xff]  ;;  %v5192_v61 = vld [vmem:[%s7356_s2 + $0x1f0] sm:$0xff] }
 0x14e   : > { %876 = vmatprep.subr.mxu0 %v5143_v42  ;;  %v5169_v57 = vld [vmem:[%s7356_s2 + $0x188] sm:$0xff]  ;;  %v5175_v58 = vld [vmem:[%s7356_s2 + $0x180] sm:$0xff]  ;;  %946 = vmatpush1.msra.mxu1 %v5192_v61  ;;  %v5204_v63 = vld [vmem:[%s7356_s2 + $0x1d8] sm:$0xff] }
 0x14f   : > { %877 = vmatpush1.msra.mxu0 %v5151_v43  ;;  %v5186_v60 = vld [vmem:[%s7356_s2 + $0x168] sm:$0xff]  ;;  %v5198_v62 = vld [vmem:[%s7356_s2 + $0x160] sm:$0xff]  ;;  %v5209_v1 = vld [vmem:[%s7356_s2 + $0x1d0] sm:$0xff]  ;;  %947 = vmatprep.subr.mxu1 %v5204_v63 }
 0x150   : > { %878 = vmatprep.subr.mxu0 %v5157_v55  ;;  %v5215_v2 = vld [vmem:[%s7356_s2 + $0x148] sm:$0xff]  ;;  %v5221_v3 = vld [vmem:[%s7356_s2 + $0x1b8] sm:$0xff]  ;;  %v5227_v4 = vld [vmem:[%s7356_s2 + $0x140] sm:$0xff]  ;;  %948 = vmatpush1.msra.mxu1 %v5209_v1 }
 0x151   : > { %879 = vmatpush1.msra.mxu0 %v5163_v56  ;;  %v5233_v5 = vld [vmem:[%s7356_s2 + $0x1b0] sm:$0xff]  ;;  %v5238_v6 = vld [vmem:[%s7356_s2 + $0x198] sm:$0xff]  ;;  %v5244_v7 = vld [vmem:[%s7356_s2 + $0x128] sm:$0xff]  ;;  %949 = vmatprep.subr.mxu1 %v5221_v3 }
 0x152   : > { %880 = vmatprep.subr.mxu0 %v5169_v57  ;;  %v5250_v8 = vld [vmem:[%s7356_s2 + $0x190] sm:$0xff]  ;;  %v5256_v9 = vld [vmem:[%s7356_s2 + $0x120] sm:$0xff]  ;;  %950 = vmatpush1.msra.mxu1 %v5233_v5  ;;  %v5262_v10 = vld [vmem:[%s7356_s2 + $0x178] sm:$0xff] }
 0x153   : > { %881 = vmatpush1.msra.mxu0 %v5175_v58  ;;  %v5268_v11 = vld [vmem:[%s7356_s2 + $0x108] sm:$0xff]  ;;  %951 = vmatprep.subr.mxu1 %v5238_v6  ;;  %v5274_v12 = vld [vmem:[%s7356_s2 + $0x170] sm:$0xff]  ;;  %v5280_v13 = vld [vmem:[%s7356_s2 + $0x100] sm:$0xff] }
 0x154   : > { %882 = vmatprep.subr.mxu0 %v5186_v60  ;;  %952 = vmatpush1.msra.mxu1 %v5250_v8  ;;  %v5286_v14 = vld [vmem:[%s7356_s2 + $0x158] sm:$0xff]  ;;  %v5292_v15 = vld [vmem:[%s7356_s2 + $0xe8] sm:$0xff]  ;;  %v5298_v16 = vld [vmem:[%s7356_s2 + $0x150] sm:$0xff] }
 0x155   : > { %883 = vmatpush1.msra.mxu0 %v5198_v62  ;;  %953 = vmatprep.subr.mxu1 %v5262_v10  ;;  %v5304_v17 = vld [vmem:[%s7356_s2 + $0xe0] sm:$0xff]  ;;  %v5310_v18 = vld [vmem:[%s7356_s2 + $0x138] sm:$0xff]  ;;  %v5316_v19 = vld [vmem:[%s7356_s2 + $0xc8] sm:$0xff] }
 0x156   : > { %884 = vmatprep.subr.mxu0 %v5215_v2  ;;  %954 = vmatpush1.msra.mxu1 %v5274_v12  ;;  %v5322_v20 = vld [vmem:[%s7356_s2 + $0x130] sm:$0xff]  ;;  %v5328_v21 = vld [vmem:[%s7356_s2 + $0xc0] sm:$0xff]  ;;  %v5334_v22 = vld [vmem:[%s7356_s2 + $0x118] sm:$0xff] }
 0x157   : > { %885 = vmatpush1.msra.mxu0 %v5227_v4  ;;  %955 = vmatprep.subr.mxu1 %v5286_v14  ;;  %v5340_v23 = vld [vmem:[%s7356_s2 + $0xa8] sm:$0xff]  ;;  %v5346_v24 = vld [vmem:[%s7356_s2 + $0x110] sm:$0xff]  ;;  %v5352_v25 = vld [vmem:[%s7356_s2 + $0xa0] sm:$0xff] }
 0x158   : > { %886 = vmatprep.subr.mxu0 %v5244_v7  ;;  %956 = vmatpush1.msra.mxu1 %v5298_v16  ;;  %v5358_v26 = vld [vmem:[%s7356_s2 + $0xf8] sm:$0xff]  ;;  %v5364_v27 = vld [vmem:[%s7356_s2 + $0x88] sm:$0xff]  ;;  %v5370_v28 = vld [vmem:[%s7356_s2 + $0xf0] sm:$0xff] }
 0x159   : > { %887 = vmatpush1.msra.mxu0 %v5256_v9  ;;  %957 = vmatprep.subr.mxu1 %v5310_v18  ;;  %v5376_v29 = vld [vmem:[%s7356_s2 + $0x80] sm:$0xff]  ;;  %v5382_v30 = vld [vmem:[%s7356_s2 + $0xd8] sm:$0xff]  ;;  %v5388_v31 = vld [vmem:[%s7356_s2 + $0x68] sm:$0xff] }
 0x15a   : > { %888 = vmatprep.subr.mxu0 %v5268_v11  ;;  %958 = vmatpush1.msra.mxu1 %v5322_v20  ;;  %7510 = vst [vmem:[#allocation16_spill] sm:$0xff] %v5376_v29  ;;  %7511 = vst [vmem:[#allocation17_spill] sm:$0xff] %v5388_v31  ;;  %v5394_v32 = vld [vmem:[%s7356_s2 + $0xd0] sm:$0xff]  ;;  %v5400_v33 = vld [vmem:[%s7356_s2 + $0x60] sm:$0xff] }
 0x15b   : > { %889 = vmatpush1.msra.mxu0 %v5280_v13  ;;  %959 = vmatprep.subr.mxu1 %v5334_v22  ;;  %7512 = vst [vmem:[#allocation18_spill] sm:$0xff] %v5400_v33  ;;  %v5406_v34 = vld [vmem:[%s7356_s2 + $0xb8] sm:$0xff]  ;;  %v5412_v35 = vld [vmem:[%s7356_s2 + $0x48] sm:$0xff]  ;;  %v5418_v36 = vld [vmem:[%s7356_s2 + $0xb0] sm:$0xff] }
 0x15c   : > { %890 = vmatprep.subr.mxu0 %v5292_v15  ;;  %960 = vmatpush1.msra.mxu1 %v5346_v24  ;;  %7513 = vst [vmem:[#allocation19_spill] sm:$0xff] %v5412_v35  ;;  %v5424_v37 = vld [vmem:[%s7356_s2 + $0x40] sm:$0xff]  ;;  %v5430_v38 = vld [vmem:[%s7356_s2 + $0x98] sm:$0xff]  ;;  %v5436_v39 = vld [vmem:[%s7356_s2 + $0x28] sm:$0xff] }
 0x15d   : > { %891 = vmatpush1.msra.mxu0 %v5304_v17  ;;  %961 = vmatprep.subr.mxu1 %v5358_v26  ;;  %7514 = vst [vmem:[#allocation20_spill] sm:$0xff] %v5424_v37  ;;  %7515 = vst [vmem:[#allocation21_spill] sm:$0xff] %v5436_v39  ;;  %v5442_v44 = vld [vmem:[%s7356_s2 + $0x90] sm:$0xff]  ;;  %v5448_v45 = vld [vmem:[%s7356_s2 + $0x20] sm:$0xff] }
 0x15e   : > { %892 = vmatprep.subr.mxu0 %v5316_v19  ;;  %962 = vmatpush1.msra.mxu1 %v5370_v28  ;;  %7516 = vst [vmem:[#allocation22_spill] sm:$0xff] %v5442_v44  ;;  %7517 = vst [vmem:[#allocation23_spill] sm:$0xff] %v5448_v45  ;;  %v5454_v46 = vld [vmem:[%s7356_s2 + $0x78] sm:$0xff]  ;;  %v5460_v47 = vld [vmem:[%s7356_s2 + $0x8] sm:$0xff] }
 0x15f   : > { %893 = vmatpush1.msra.mxu0 %v5328_v21  ;;  %963 = vmatprep.subr.mxu1 %v5382_v30  ;;  %7518 = vst [vmem:[#allocation24_spill] sm:$0xff] %v5454_v46  ;;  %7519 = vst [vmem:[#allocation25_spill] sm:$0xff] %v5460_v47  ;;  %v5466_v48 = vld [vmem:[%s7356_s2 + $0x70] sm:$0xff]  ;;  %v5472_v49 = vld [vmem:[%s7356_s2] sm:$0xff] }
 0x160   : > { %894 = vmatprep.subr.mxu0 %v5340_v23  ;;  %964 = vmatpush1.msra.mxu1 %v5394_v32  ;;  %7520 = vst [vmem:[#allocation26_spill] sm:$0xff] %v5466_v48  ;;  %7521 = vst [vmem:[#allocation27_spill] sm:$0xff] %v5472_v49  ;;  %v5478_v50 = vld [vmem:[%s7356_s2 + $0x58] sm:$0xff]  ;;  %v801_v51 = vld [vmem:[#allocation3] sm:$0xff] }
 0x161   : > { %895 = vmatpush1.msra.mxu0 %v5352_v25  ;;  %965 = vmatprep.subr.mxu1 %v5406_v34  ;;  %7522 = vst [vmem:[#allocation28_spill] sm:$0xff] %v5478_v50  ;;  %v5485_v52 = vld [vmem:[%s7356_s2 + $0x50] sm:$0xff]  ;;  %v5492_v53 = vld [vmem:[%s7356_s2 + $0x38] sm:$0xff] }
 0x162   : > { %896 = vmatprep.subr.mxu0 %v5364_v27  ;;  %966 = vmatpush1.msra.mxu1 %v5418_v36  ;;  %7523 = vst [vmem:[#allocation29_spill] sm:$0xff] %v5485_v52  ;;  %7524 = vst [vmem:[#allocation30_spill] sm:$0xff] %v5492_v53  ;;  %v5499_v54 = vld [vmem:[%s7356_s2 + $0x30] sm:$0xff]  ;;  %v5505_v0 = vld [vmem:[%s7356_s2 + $0x18] sm:$0xff] }
 0x163   : > { %897 = vmatpush1.msra.mxu0 %v5376_v29  ;;  %967 = vmatprep.subr.mxu1 %v5430_v38  ;;  %7525 = vst [vmem:[#allocation31_spill] sm:$0xff] %v5499_v54  ;;  %7526 = vst [vmem:[#allocation32_spill] sm:$0xff] %v5505_v0 }
 0x164   : > { %898 = vmatprep.subr.mxu0 %v5388_v31  ;;  %968 = vmatpush1.msra.mxu1 %v5442_v44 }
 0x165   : > { %899 = vmatpush1.msra.mxu0 %v5400_v33  ;;  %969 = vmatprep.subr.mxu1 %v5454_v46 }
 0x166   : > { %900 = vmatprep.subr.mxu0 %v5412_v35  ;;  %970 = vmatpush1.msra.mxu1 %v5466_v48 }
 0x167   : > { %901 = vmatpush1.msra.mxu0 %v5424_v37  ;;  %971 = vmatprep.subr.mxu1 %v5478_v50 }
 0x168   : > { %902 = vmatprep.subr.mxu0 %v5436_v39  ;;  %972 = vmatpush1.msra.mxu1 %v5485_v52 }
 0x169   : > { %903 = vmatpush1.msra.mxu0 %v5448_v45  ;;  %973 = vmatprep.subr.mxu1 %v5492_v53 }
 0x16a   : > { %904 = vmatprep.subr.mxu0 %v5460_v47  ;;  %974 = vmatpush1.msra.mxu1 %v5499_v54 }
 0x16b   : > { %905 = vmatpush1.msra.mxu0 %v5472_v49  ;;  %v5511_v49 = vld [vmem:[%s7356_s2 + $0x10] sm:$0xff]  ;;  %975 = vmatprep.subr.mxu1 %v5505_v0 }
 0x16c   : > { %939 = vmatmul.mubr.f32.vlgmr.msra.gmra.mxu0 %v801_v51  ;;  %7527 = vst [vmem:[#allocation33_spill] sm:$0xff] %v5511_v49  ;;  %1051 = vmatprep.subr.mxu0 %v5133_v40 }
 0x16d   : > { %1052 = vmatpush1.msra.mxu0 %v5138_v41  ;;  %976 = vmatpush1.msra.mxu1 %v5511_v49 }
 0x16e   : > { %1053 = vmatprep.subr.mxu0 %v5143_v42  ;;  %1010 = vmatmul.mubr.f32.vlgmr.msra.gmra.mxu1 %v801_v51  ;;  %v7528_v51 = vld [vmem:[#allocation27_spill] sm:$0xff] }
 0x16f   : > { %1054 = vmatpush1.msra.mxu0 %v5151_v43  ;;  %1122 = vmatprep.subr.mxu1 %v5180_v59 }
 0x170   : > { %1123 = vmatpush1.msra.mxu1 %v5192_v61  ;;  %1055 = vmatprep.subr.mxu0 %v5157_v55 }
 0x171   : > { %1124 = vmatprep.subr.mxu1 %v5204_v63  ;;  %1056 = vmatpush1.msra.mxu0 %v5163_v56 }
 0x172   : > { %1125 = vmatpush1.msra.mxu1 %v5209_v1  ;;  %1057 = vmatprep.subr.mxu0 %v5169_v57 }
 0x173   : > { %1126 = vmatprep.subr.mxu1 %v5221_v3  ;;  %1058 = vmatpush1.msra.mxu0 %v5175_v58 }
 0x174   : > { %1127 = vmatpush1.msra.mxu1 %v5233_v5  ;;  %1059 = vmatprep.subr.mxu0 %v5186_v60 }
 0x175   : > { %1128 = vmatprep.subr.mxu1 %v5238_v6  ;;  %1060 = vmatpush1.msra.mxu0 %v5198_v62 }
 0x176   : > { %1129 = vmatpush1.msra.mxu1 %v5250_v8  ;;  %1061 = vmatprep.subr.mxu0 %v5215_v2 }
 0x177   : > { %1130 = vmatprep.subr.mxu1 %v5262_v10  ;;  %1062 = vmatpush1.msra.mxu0 %v5227_v4 }
 0x178   : > { %1131 = vmatpush1.msra.mxu1 %v5274_v12  ;;  %1063 = vmatprep.subr.mxu0 %v5244_v7 }
 0x179   : > { %1132 = vmatprep.subr.mxu1 %v5286_v14  ;;  %1064 = vmatpush1.msra.mxu0 %v5256_v9 }
 0x17a   : > { %1133 = vmatpush1.msra.mxu1 %v5298_v16  ;;  %1065 = vmatprep.subr.mxu0 %v5268_v11 }
 0x17b   : > { %1134 = vmatprep.subr.mxu1 %v5310_v18  ;;  %1066 = vmatpush1.msra.mxu0 %v5280_v13 }
 0x17c   : > { %1135 = vmatpush1.msra.mxu1 %v5322_v20  ;;  %1067 = vmatprep.subr.mxu0 %v5292_v15 }
 0x17d   : > { %1136 = vmatprep.subr.mxu1 %v5334_v22  ;;  %1068 = vmatpush1.msra.mxu0 %v5304_v17 }
 0x17e   : > { %1137 = vmatpush1.msra.mxu1 %v5346_v24  ;;  %1069 = vmatprep.subr.mxu0 %v5316_v19 }
 0x17f   : > { %1138 = vmatprep.subr.mxu1 %v5358_v26  ;;  %1070 = vmatpush1.msra.mxu0 %v5328_v21 }
 0x180   : > { %1139 = vmatpush1.msra.mxu1 %v5370_v28  ;;  %1071 = vmatprep.subr.mxu0 %v5340_v23 }
 0x181   : > { %1140 = vmatprep.subr.mxu1 %v5382_v30  ;;  %1072 = vmatpush1.msra.mxu0 %v5352_v25 }
 0x182   : > { %1141 = vmatpush1.msra.mxu1 %v5394_v32  ;;  %1073 = vmatprep.subr.mxu0 %v5364_v27 }
 0x183   : > { %1142 = vmatprep.subr.mxu1 %v5406_v34  ;;  %1074 = vmatpush1.msra.mxu0 %v5376_v29 }
 0x184   : > { %1143 = vmatpush1.msra.mxu1 %v5418_v36  ;;  %1075 = vmatprep.subr.mxu0 %v5388_v31 }
 0x185   : > { %1144 = vmatprep.subr.mxu1 %v5430_v38  ;;  %1076 = vmatpush1.msra.mxu0 %v5400_v33 }
 0x186   : > { %1145 = vmatpush1.msra.mxu1 %v5442_v44  ;;  %1077 = vmatprep.subr.mxu0 %v5412_v35  ;;  %v7529_v35 = vmov 0.0  }
 0x187   : > { %1146 = vmatprep.subr.mxu1 %v5454_v46  ;;  %1078 = vmatpush1.msra.mxu0 %v5424_v37 }
 0x188   : > { %1147 = vmatpush1.msra.mxu1 %v5466_v48  ;;  %1079 = vmatprep.subr.mxu0 %v5436_v39  ;;  %v807_v39 = vld [vmem:[#allocation2 + $0x1b0] sm:$0xff] }
 0x189   : > { %1148 = vmatprep.subr.mxu1 %v5478_v50  ;;  %1080 = vmatpush1.msra.mxu0 %v5448_v45  ;;  %v806_v45 = vld [vmem:[#allocation2 + $0xb0] sm:$0xff] }
 0x18a   : > { %1149 = vmatpush1.msra.mxu1 %v5485_v52  ;;  %1081 = vmatprep.subr.mxu0 %v5460_v47 }
 0x18b   : > { %1150 = vmatprep.subr.mxu1 %v5492_v53  ;;  %1082 = vmatpush1.msra.mxu0 %v7528_v51 }
 0x18c   : > { %1151 = vmatpush1.msra.mxu1 %v5499_v54  ;;  %1115 = vmatprep.mubr.f32.mxu0 %v7529_v35 }
 0x18d   : > { %1152 = vmatprep.subr.mxu1 %v5505_v0  ;;  %1186 = vmatprep.mubr.f32.mxu1 %v7529_v35  ;;  %v809_v0 = vld [vmem:[#allocation2 + $0x18] sm:$0xff] }
 0x18e   : > { %1153 = vmatpush1.msra.mxu1 %v5511_v49  ;;  %1228 = vmatprep.subr.mxu0 %v5133_v40  ;;  %v808_v35 = vld [vmem:[#allocation2 + $0xd8] sm:$0xff] }
 0x18f   : > { %1299 = vmatprep.subr.mxu1 %v5180_v59 }
 0x22c   : > { %v940_v47 = vpop.f32.mrf.mxu0 }
 0x22d   : > { %v1016_v53 = vadd.f32 %v940_v47, %v806_v45 }
 0x22e   : > { %v942_v52 = vpop.f32.mrf.mxu0  ;;  %v1011_v50 = vpop.f32.mrf.mxu1 }
 0x22f   : > { %v3968_v51 = vmul.f32 -1.442695, %v1016_v53  ;;  %v1017_v37 = vadd.f32 %v942_v52, %v807_v39  ;;  %v1018_v49 = vadd.f32 %v1011_v50, %v808_v35  ;;  %v7532_v35 = vld [vmem:[#allocation17_spill] sm:$0xff]  ;;  %v7537_v50 = vld [vmem:[#allocation28_spill] sm:$0xff] }
 0x230   : > { %v1013_v48 = vpop.f32.mrf.mxu1 }
 0x231   : > { %4172 = vpow2.f32 %v3968_v51  ;;  %v3969_v54 = vmul.f32 -1.442695, %v1017_v37  ;;  %v1019_v33 = vadd.f32 %v1013_v48, %v809_v0  ;;  %v802_v37 = vld [vmem:[#allocation4] sm:$0xff] }
 0x232   : > { %v7535_v48 = vld [vmem:[#allocation26_spill] sm:$0xff] }
 0x233   : > { %4174 = vpow2.f32 %v3969_v54  ;;  %v3970_v46 = vmul.f32 -1.442695, %v1019_v33 }
 0x234   : > { %4176 = vtanh.f32 %v1018_v49  ;;  %v7536_v49 = vld [vmem:[#allocation19_spill] sm:$0xff] }
 0x235   : > { %4178 = vpow2.f32 %v3970_v46  ;;  %v7534_v46 = vld [vmem:[#allocation18_spill] sm:$0xff] }
 0x23e   : > { %v4173_v40 = vpop.eup %4172 }
 0x23f   : > { %v1023_v31 = vadd.f32 1.0, %v4173_v40 }
 0x240   : > { %v4175_v59 = vpop.eup %4174 }
 0x241   : > { %4180 = vrcp.f32 %v1023_v31  ;;  %v1029_v45 = vadd.f32 1.0, %v4175_v59  ;;  %v4177_v47 = vpop.eup %4176  ;;  %v7530_v59 = vld [vmem:[#allocation16_spill] sm:$0xff]  ;;  %v7531_v31 = vld [vmem:[#allocation22_spill] sm:$0xff] }
 0x242   : > { %v4179_v39 = vpop.eup %4178 }
 0x243   : > { %4182 = vrcp.f32 %v1029_v45  ;;  %v1036_v54 = vadd.f32 1.0, %v4179_v39  ;;  %v7538_v45 = vld [vmem:[#allocation20_spill] sm:$0xff]  ;;  %v7540_v39 = vld [vmem:[#allocation21_spill] sm:$0xff] }
 0x245   : > { %4184 = vrcp.f32 %v1036_v54  ;;  %v7544_v54 = vld [vmem:[#allocation25_spill] sm:$0xff] }
 0x24e   : > { %v4181_v52 = vpop.eup %4180 }
 0x24f   : > { %v1040_v44 = vmul.f32 %v4181_v52, %v4177_v47  ;;  %v7539_v47 = vld [vmem:[#allocation29_spill] sm:$0xff]  ;;  %v7541_v52 = vld [vmem:[#allocation30_spill] sm:$0xff] }
 0x250   : > { %v4183_v53 = vpop.eup %4182 }
 0x251   : > { %v1039_v51 = vmul.f32 %v4183_v53, %v802_v37  ;;  %v7542_v37 = vld [vmem:[#allocation23_spill] sm:$0xff] }
 0x252   : > { %v4185_v0 = vpop.eup %4184  ;;  %v7543_v53 = vld [vmem:[#allocation31_spill] sm:$0xff] }
 0x253   : > { %v5584_v29 = vadd.f32 %v1040_v44, %v1039_v51  ;;  %v7533_v44 = vld [vmem:[#allocation24_spill] sm:$0xff] }
 0x254   : > { %v7545_v51 = vld [vmem:[#allocation32_spill] sm:$0xff] }
 0x255   : > { %4186 = vtanh.f32 %v5584_v29 }
 0x262   : > { %v4187_v40 = vpop.eup %4186 }
 0x263   : > { %v1043_v33 = vmul.f32 %v4187_v40, %v4185_v0  ;;  %v7546_v0 = vld [vmem:[#allocation27_spill] sm:$0xff]  ;;  %v7547_v40 = vmov 0.0  }
 0x265   : > { %1116 = vmatmul.mubr.f32.vlgmr.msra.gmra.mxu0 %v1043_v33  ;;  %1187 = vmatmul.mubr.f32.vlgmr.msra.gmra.mxu1 %v1043_v33  ;;  %v7548_v33 = vld [vmem:[#allocation33_spill] sm:$0xff] }
 0x266   : > { %1229 = vmatpush1.msra.mxu0 %v5138_v41  ;;  %1300 = vmatpush1.msra.mxu1 %v5192_v61 }
 0x267   : > { %1230 = vmatprep.subr.mxu0 %v5143_v42  ;;  %1301 = vmatprep.subr.mxu1 %v5204_v63 }
 0x268   : > { %1231 = vmatpush1.msra.mxu0 %v5151_v43  ;;  %1302 = vmatpush1.msra.mxu1 %v5209_v1 }
 0x269   : > { %1232 = vmatprep.subr.mxu0 %v5157_v55  ;;  %1303 = vmatprep.subr.mxu1 %v5221_v3 }
 0x26a   : > { %1233 = vmatpush1.msra.mxu0 %v5163_v56  ;;  %1304 = vmatpush1.msra.mxu1 %v5233_v5 }
 0x26b   : > { %1234 = vmatprep.subr.mxu0 %v5169_v57  ;;  %1305 = vmatprep.subr.mxu1 %v5238_v6 }
 0x26c   : > { %1235 = vmatpush1.msra.mxu0 %v5175_v58  ;;  %1306 = vmatpush1.msra.mxu1 %v5250_v8 }
 0x26d   : > { %1236 = vmatprep.subr.mxu0 %v5186_v60  ;;  %1307 = vmatprep.subr.mxu1 %v5262_v10 }
 0x26e   : > { %1237 = vmatpush1.msra.mxu0 %v5198_v62  ;;  %1308 = vmatpush1.msra.mxu1 %v5274_v12 }
 0x26f   : > { %1238 = vmatprep.subr.mxu0 %v5215_v2  ;;  %1309 = vmatprep.subr.mxu1 %v5286_v14 }
 0x270   : > { %1239 = vmatpush1.msra.mxu0 %v5227_v4  ;;  %1310 = vmatpush1.msra.mxu1 %v5298_v16 }
 0x271   : > { %1240 = vmatprep.subr.mxu0 %v5244_v7  ;;  %1311 = vmatprep.subr.mxu1 %v5310_v18 }
 0x272   : > { %1241 = vmatpush1.msra.mxu0 %v5256_v9  ;;  %1312 = vmatpush1.msra.mxu1 %v5322_v20 }
 0x273   : > { %1242 = vmatprep.subr.mxu0 %v5268_v11  ;;  %1313 = vmatprep.subr.mxu1 %v5334_v22 }
 0x274   : > { %1243 = vmatpush1.msra.mxu0 %v5280_v13  ;;  %1314 = vmatpush1.msra.mxu1 %v5346_v24 }
 0x275   : > { %1244 = vmatprep.subr.mxu0 %v5292_v15  ;;  %1315 = vmatprep.subr.mxu1 %v5358_v26 }
 0x276   : > { %1245 = vmatpush1.msra.mxu0 %v5304_v17  ;;  %1316 = vmatpush1.msra.mxu1 %v5370_v28 }
 0x277   : > { %1246 = vmatprep.subr.mxu0 %v5316_v19  ;;  %1317 = vmatprep.subr.mxu1 %v5382_v30 }
 0x278   : > { %1247 = vmatpush1.msra.mxu0 %v5328_v21  ;;  %1318 = vmatpush1.msra.mxu1 %v5394_v32 }
 0x279   : > { %1248 = vmatprep.subr.mxu0 %v5340_v23  ;;  %1319 = vmatprep.subr.mxu1 %v5406_v34 }
 0x27a   : > { %1249 = vmatpush1.msra.mxu0 %v5352_v25  ;;  %1320 = vmatpush1.msra.mxu1 %v5418_v36 }
 0x27b   : > { %1250 = vmatprep.subr.mxu0 %v5364_v27  ;;  %1321 = vmatprep.subr.mxu1 %v5430_v38 }
 0x27c   : > { %1251 = vmatpush1.msra.mxu0 %v7530_v59  ;;  %1322 = vmatpush1.msra.mxu1 %v7531_v31 }
 0x27d   : > { %1252 = vmatprep.subr.mxu0 %v7532_v35  ;;  %1323 = vmatprep.subr.mxu1 %v7533_v44  ;;  %v1049_v44 = vld [vmem:[#allocation2 + $0x130] sm:$0xff] }
 0x27e   : > { %1253 = vmatpush1.msra.mxu0 %v7534_v46  ;;  %1324 = vmatpush1.msra.mxu1 %v7535_v48  ;;  %v1050_v48 = vld [vmem:[#allocation2 + $0x48] sm:$0xff] }
 0x27f   : > { %1254 = vmatprep.subr.mxu0 %v7536_v49  ;;  %1325 = vmatprep.subr.mxu1 %v7537_v50 }
 0x280   : > { %1255 = vmatpush1.msra.mxu0 %v7538_v45  ;;  %1326 = vmatpush1.msra.mxu1 %v7539_v47  ;;  %v7549_v47 = vld [vmem:[#allocation14_spill] sm:$0xff] }
 0x281   : > { %1256 = vmatprep.subr.mxu0 %v7540_v39  ;;  %1327 = vmatprep.subr.mxu1 %v7541_v52  ;;  %v7550_v39 = vld [vmem:[#allocation15_spill] sm:$0xff] }
 0x282   : > { %1257 = vmatpush1.msra.mxu0 %v7542_v37  ;;  %1328 = vmatpush1.msra.mxu1 %v7543_v53  ;;  %v1047_v52 = vld [vmem:[#allocation2 + $0x50] sm:$0xff]  ;;  %v1048_v45 = vld [vmem:[#allocation2 + $0x168] sm:$0xff] }
 0x283   : > { %1258 = vmatprep.subr.mxu0 %v7544_v54  ;;  %1329 = vmatprep.subr.mxu1 %v7545_v51 }
 0x284   : > { %1259 = vmatpush1.msra.mxu0 %v7546_v0  ;;  %1292 = vmatprep.mubr.f32.mxu0 %v7547_v40 }
 0x285   : > { %1330 = vmatpush1.msra.mxu1 %v7548_v33  ;;  %1363 = vmatprep.mubr.f32.mxu1 %v7547_v40 }
 0x286   : > { %1405 = vmatprep.subr.mxu0 %v7549_v47  ;;  %1476 = vmatprep.subr.mxu1 %v7550_v39 }
 0x325   : > { %v1117_v37 = vpop.f32.mrf.mxu0  ;;  %v1188_v51 = vpop.f32.mrf.mxu1 }
 0x326   : > { %v1193_v53 = vadd.f32 %v1117_v37, %v1047_v52  ;;  %v1195_v47 = vadd.f32 %v1188_v51, %v1049_v44  ;;  %v7556_v51 = vld [vmem:[#allocation26_spill] sm:$0xff] }
 0x327   : > { %v1119_v50 = vpop.f32.mrf.mxu0  ;;  %v1190_v46 = vpop.f32.mrf.mxu1 }
 0x328   : > { %v3971_v54 = vmul.f32 -1.442695, %v1193_v53  ;;  %v1194_v49 = vadd.f32 %v1119_v50, %v1048_v45  ;;  %v1196_v33 = vadd.f32 %v1190_v46, %v1050_v48 }
 0x32a   : > { %4188 = vpow2.f32 %v3971_v54  ;;  %v3972_v0 = vmul.f32 -1.442695, %v1194_v49  ;;  %v3973_v40 = vmul.f32 -1.442695, %v1196_v33  ;;  %v7559_v33 = vld [vmem:[#allocation20_spill] sm:$0xff] }
 0x32c   : > { %4190 = vpow2.f32 %v3972_v0  ;;  %v7557_v0 = vld [vmem:[#allocation19_spill] sm:$0xff] }
 0x32d   : > { %4192 = vpow2.f32 %v3973_v40  ;;  %v7558_v40 = vld [vmem:[#allocation28_spill] sm:$0xff] }
 0x337   : > { %v4189_v35 = vpop.eup %4188 }
 0x338   : > { %v1200_v31 = vadd.f32 1.0, %v4189_v35 }
 0x339   : > { %v4191_v39 = vpop.eup %4190 }
 0x33a   : > { %4194 = vrcp.f32 %v1200_v31  ;;  %v1206_v59 = vadd.f32 1.0, %v4191_v39  ;;  %v4193_v52 = vpop.eup %4192  ;;  %v7553_v31 = vld [vmem:[#allocation17_spill] sm:$0xff]  ;;  %v7555_v39 = vld [vmem:[#allocation18_spill] sm:$0xff] }
 0x33b   : > { %4196 = vtanh.f32 %v1195_v47  ;;  %v1213_v49 = vadd.f32 1.0, %v4193_v52  ;;  %v7554_v47 = vld [vmem:[#allocation24_spill] sm:$0xff]  ;;  %v7560_v52 = vld [vmem:[#allocation29_spill] sm:$0xff] }
 0x33c   : > { %4198 = vrcp.f32 %v1206_v59  ;;  %v7552_v59 = vld [vmem:[#allocation22_spill] sm:$0xff] }
 0x33d   : > { %4200 = vrcp.f32 %v1213_v49  ;;  %v7564_v49 = vld [vmem:[#allocation31_spill] sm:$0xff] }
 0x347   : > { %v4195_v50 = vpop.eup %4194 }
 0x348   : > { %v4197_v45 = vpop.eup %4196 }
 0x349   : > { %v4199_v37 = vpop.eup %4198  ;;  %v1217_v53 = vmul.f32 %v4197_v45, %v4195_v50  ;;  %v7561_v50 = vld [vmem:[#allocation21_spill] sm:$0xff]  ;;  %v7562_v45 = vld [vmem:[#allocation30_spill] sm:$0xff] }
 0x34a   : > { %v1216_v54 = vmul.f32 %v4199_v37, %v5584_v29  ;;  %v4201_v35 = vpop.eup %4200  ;;  %v7551_v29 = vld [vmem:[#allocation16_spill] sm:$0xff]  ;;  %v7563_v37 = vld [vmem:[#allocation23_spill] sm:$0xff] }
 0x34c   : > { %v5654_v46 = vadd.f32 %v1217_v53, %v1216_v54  ;;  %v7565_v53 = vld [vmem:[#allocation25_spill] sm:$0xff]  ;;  %v7566_v54 = vld [vmem:[#allocation32_spill] sm:$0xff] }
 0x34e   : > { %4202 = vtanh.f32 %v5654_v46 }
 0x35b   : > { %v4203_v44 = vpop.eup %4202 }
 0x35c   : > { %v1220_v48 = vmul.f32 %v4203_v44, %v4201_v35  ;;  %v7567_v35 = vld [vmem:[#allocation27_spill] sm:$0xff]  ;;  %v7568_v44 = vmov 0.0  }
 0x35e   : > { %1293 = vmatmul.mubr.f32.vlgmr.msra.gmra.mxu0 %v1220_v48  ;;  %1364 = vmatmul.mubr.f32.vlgmr.msra.gmra.mxu1 %v1220_v48  ;;  %v7569_v48 = vld [vmem:[#allocation33_spill] sm:$0xff] }
 0x35f   : > { %1406 = vmatpush1.msra.mxu0 %v5138_v41  ;;  %1477 = vmatpush1.msra.mxu1 %v5192_v61 }
 0x360   : > { %1407 = vmatprep.subr.mxu0 %v5143_v42  ;;  %1478 = vmatprep.subr.mxu1 %v5204_v63 }
 0x361   : > { %1408 = vmatpush1.msra.mxu0 %v5151_v43  ;;  %1479 = vmatpush1.msra.mxu1 %v5209_v1 }
 0x362   : > { %1409 = vmatprep.subr.mxu0 %v5157_v55  ;;  %1480 = vmatprep.subr.mxu1 %v5221_v3 }
 0x363   : > { %1410 = vmatpush1.msra.mxu0 %v5163_v56  ;;  %1481 = vmatpush1.msra.mxu1 %v5233_v5 }
 0x364   : > { %1411 = vmatprep.subr.mxu0 %v5169_v57  ;;  %1482 = vmatprep.subr.mxu1 %v5238_v6 }
 0x365   : > { %1412 = vmatpush1.msra.mxu0 %v5175_v58  ;;  %1483 = vmatpush1.msra.mxu1 %v5250_v8 }
 0x366   : > { %1413 = vmatprep.subr.mxu0 %v5186_v60  ;;  %1484 = vmatprep.subr.mxu1 %v5262_v10 }
 0x367   : > { %1414 = vmatpush1.msra.mxu0 %v5198_v62  ;;  %1485 = vmatpush1.msra.mxu1 %v5274_v12 }
 0x368   : > { %1415 = vmatprep.subr.mxu0 %v5215_v2  ;;  %1486 = vmatprep.subr.mxu1 %v5286_v14 }
 0x369   : > { %1416 = vmatpush1.msra.mxu0 %v5227_v4  ;;  %1487 = vmatpush1.msra.mxu1 %v5298_v16 }
 0x36a   : > { %1417 = vmatprep.subr.mxu0 %v5244_v7  ;;  %1488 = vmatprep.subr.mxu1 %v5310_v18 }
 0x36b   : > { %1418 = vmatpush1.msra.mxu0 %v5256_v9  ;;  %1489 = vmatpush1.msra.mxu1 %v5322_v20 }
 0x36c   : > { %1419 = vmatprep.subr.mxu0 %v5268_v11  ;;  %1490 = vmatprep.subr.mxu1 %v5334_v22 }
 0x36d   : > { %1420 = vmatpush1.msra.mxu0 %v5280_v13  ;;  %1491 = vmatpush1.msra.mxu1 %v5346_v24 }
 0x36e   : > { %1421 = vmatprep.subr.mxu0 %v5292_v15  ;;  %1492 = vmatprep.subr.mxu1 %v5358_v26 }
 0x36f   : > { %1422 = vmatpush1.msra.mxu0 %v5304_v17  ;;  %1493 = vmatpush1.msra.mxu1 %v5370_v28 }
 0x370   : > { %1423 = vmatprep.subr.mxu0 %v5316_v19  ;;  %1494 = vmatprep.subr.mxu1 %v5382_v30 }
 0x371   : > { %1424 = vmatpush1.msra.mxu0 %v5328_v21  ;;  %1495 = vmatpush1.msra.mxu1 %v5394_v32 }
 0x372   : > { %1425 = vmatprep.subr.mxu0 %v5340_v23  ;;  %1496 = vmatprep.subr.mxu1 %v5406_v34 }
 0x373   : > { %1426 = vmatpush1.msra.mxu0 %v5352_v25  ;;  %1497 = vmatpush1.msra.mxu1 %v5418_v36 }
 0x374   : > { %1427 = vmatprep.subr.mxu0 %v5364_v27  ;;  %1498 = vmatprep.subr.mxu1 %v5430_v38 }
 0x375   : > { %1428 = vmatpush1.msra.mxu0 %v7551_v29  ;;  %1499 = vmatpush1.msra.mxu1 %v7552_v59 }
 0x376   : > { %1429 = vmatprep.subr.mxu0 %v7553_v31  ;;  %1500 = vmatprep.subr.mxu1 %v7554_v47  ;;  %v1226_v47 = vld [vmem:[#allocation2 + $0x118] sm:$0xff] }
 0x377   : > { %1430 = vmatpush1.msra.mxu0 %v7555_v39  ;;  %1501 = vmatpush1.msra.mxu1 %v7556_v51  ;;  %v1227_v51 = vld [vmem:[#allocation2 + $0x98] sm:$0xff] }
 0x378   : > { %1431 = vmatprep.subr.mxu0 %v7557_v0  ;;  %1502 = vmatprep.subr.mxu1 %v7558_v40 }
 0x379   : > { %1432 = vmatpush1.msra.mxu0 %v7559_v33  ;;  %1503 = vmatpush1.msra.mxu1 %v7560_v52  ;;  %v7570_v52 = vld [vmem:[#allocation14_spill] sm:$0xff]  ;;  %v1225_v33 = vld [vmem:[#allocation2 + $0x110] sm:$0xff] }
 0x37a   : > { %1433 = vmatprep.subr.mxu0 %v7561_v50  ;;  %1504 = vmatprep.subr.mxu1 %v7562_v45  ;;  %v7571_v50 = vld [vmem:[#allocation15_spill] sm:$0xff]  ;;  %v1224_v45 = vld [vmem:[#allocation2 + $0x180] sm:$0xff] }
 0x37b   : > { %1434 = vmatpush1.msra.mxu0 %v7563_v37  ;;  %1505 = vmatpush1.msra.mxu1 %v7564_v49 }
 0x37c   : > { %1435 = vmatprep.subr.mxu0 %v7565_v53  ;;  %1506 = vmatprep.subr.mxu1 %v7566_v54 }
 0x37d   : > { %1436 = vmatpush1.msra.mxu0 %v7567_v35  ;;  %1469 = vmatprep.mubr.f32.mxu0 %v7568_v44 }
 0x37e   : > { %1507 = vmatpush1.msra.mxu1 %v7569_v48  ;;  %1540 = vmatprep.mubr.f32.mxu1 %v7568_v44 }
 0x37f   : > { %1582 = vmatprep.subr.mxu0 %v7570_v52  ;;  %1653 = vmatprep.subr.mxu1 %v7571_v50 }
 0x41e   : > { %v1294_v37 = vpop.f32.mrf.mxu0  ;;  %v1365_v54 = vpop.f32.mrf.mxu1 }
 0x41f   : > { %v1370_v49 = vadd.f32 %v1294_v37, %v1224_v45  ;;  %v1372_v52 = vadd.f32 %v1365_v54, %v1226_v47 }
 0x420   : > { %v1296_v40 = vpop.f32.mrf.mxu0  ;;  %v1367_v39 = vpop.f32.mrf.mxu1 }
 0x421   : > { %v3974_v53 = vmul.f32 -1.442695, %v1370_v49  ;;  %v1371_v0 = vadd.f32 %v1296_v40, %v1225_v33  ;;  %v1373_v48 = vadd.f32 %v1367_v39, %v1227_v51 }
 0x423   : > { %4204 = vpow2.f32 %v3974_v53  ;;  %v3975_v35 = vmul.f32 -1.442695, %v1371_v0  ;;  %v3976_v44 = vmul.f32 -1.442695, %v1373_v48 }
 0x425   : > { %4206 = vpow2.f32 %v3975_v35 }
 0x426   : > { %4208 = vpow2.f32 %v3976_v44 }
 0x430   : > { %v4205_v31 = vpop.eup %4204 }
 0x431   : > { %v1377_v59 = vadd.f32 1.0, %v4205_v31 }
 0x432   : > { %v4207_v50 = vpop.eup %4206 }
 0x433   : > { %4210 = vrcp.f32 %v1377_v59  ;;  %v1383_v29 = vadd.f32 1.0, %v4207_v50  ;;  %v4209_v45 = vpop.eup %4208 }
 0x434   : > { %4212 = vtanh.f32 %v1372_v52  ;;  %v1390_v0 = vadd.f32 1.0, %v4209_v45 }
 0x435   : > { %4214 = vrcp.f32 %v1383_v29 }
 0x436   : > { %4216 = vrcp.f32 %v1390_v0  ;;  %v5823_v0 = vld [vmem:[%s7356_s2 + $0x1d8] sm:$0xff] }
 0x440   : > { %v4211_v40 = vpop.eup %4210 }
 0x441   : > { %v4213_v33 = vpop.eup %4212 }
 0x442   : > { %v4215_v37 = vpop.eup %4214  ;;  %v1394_v49 = vmul.f32 %v4213_v33, %v4211_v40  ;;  %v5805_v40 = vld [vmem:[%s7356_s2 + $0x1e0] sm:$0xff]  ;;  %v5811_v33 = vld [vmem:[%s7356_s2 + $0x1f0] sm:$0xff] }
 0x443   : > { %v1393_v53 = vmul.f32 %v4215_v37, %v5654_v46  ;;  %v4217_v31 = vpop.eup %4216  ;;  %v5817_v37 = vld [vmem:[%s7356_s2 + $0x1c8] sm:$0xff] }
 0x445   : > { %v5724_v39 = vadd.f32 %v1394_v49, %v1393_v53  ;;  %v5829_v49 = vld [vmem:[%s7356_s2 + $0x1c0] sm:$0xff]  ;;  %v5835_v53 = vld [vmem:[%s7356_s2 + $0x1d0] sm:$0xff] }
 0x447   : > { %4218 = vtanh.f32 %v5724_v39 }
 0x454   : > { %v4219_v47 = vpop.eup %4218 }
 0x455   : > { %v1397_v51 = vmul.f32 %v4219_v47, %v4217_v31  ;;  %v5847_v31 = vld [vmem:[%s7356_s2 + $0x1b8] sm:$0xff]  ;;  %v5853_v47 = vld [vmem:[%s7356_s2 + $0x1a0] sm:$0xff] }
 0x457   : > { %1470 = vmatmul.mubr.f32.vlgmr.msra.gmra.mxu0 %v1397_v51  ;;  %1541 = vmatmul.mubr.f32.vlgmr.msra.gmra.mxu1 %v1397_v51  ;;  %v5859_v51 = vld [vmem:[%s7356_s2 + $0x1b0] sm:$0xff] }
 0x458   : > { %1583 = vmatpush1.msra.mxu0 %v5138_v41  ;;  %1654 = vmatpush1.msra.mxu1 %v5192_v61  ;;  %v7572_v41 = vld [vmem:[#allocation16_spill] sm:$0xff] }
 0x459   : > { %1584 = vmatprep.subr.mxu0 %v5143_v42  ;;  %1655 = vmatprep.subr.mxu1 %v5204_v63  ;;  %v7573_v42 = vld [vmem:[#allocation22_spill] sm:$0xff]  ;;  %v7580_v61 = vld [vmem:[#allocation20_spill] sm:$0xff]  ;;  %v7582_v63 = vld [vmem:[#allocation21_spill] sm:$0xff] }
 0x45a   : > { %1585 = vmatpush1.msra.mxu0 %v5151_v43  ;;  %1656 = vmatpush1.msra.mxu1 %v5209_v1  ;;  %v7574_v43 = vld [vmem:[#allocation17_spill] sm:$0xff]  ;;  %v7583_v1 = vld [vmem:[#allocation30_spill] sm:$0xff] }
 0x45b   : > { %1586 = vmatprep.subr.mxu0 %v5157_v55  ;;  %1657 = vmatprep.subr.mxu1 %v5221_v3  ;;  %v7575_v55 = vld [vmem:[#allocation24_spill] sm:$0xff]  ;;  %v7585_v3 = vld [vmem:[#allocation31_spill] sm:$0xff] }
 0x45c   : > { %1587 = vmatpush1.msra.mxu0 %v5163_v56  ;;  %1658 = vmatpush1.msra.mxu1 %v5233_v5  ;;  %v7576_v56 = vld [vmem:[#allocation18_spill] sm:$0xff]  ;;  %v7587_v5 = vld [vmem:[#allocation32_spill] sm:$0xff] }
 0x45d   : > { %1588 = vmatprep.subr.mxu0 %v5169_v57  ;;  %1659 = vmatprep.subr.mxu1 %v5238_v6  ;;  %v7577_v57 = vld [vmem:[#allocation26_spill] sm:$0xff]  ;;  %v7588_v6 = vld [vmem:[#allocation27_spill] sm:$0xff] }
 0x45e   : > { %1589 = vmatpush1.msra.mxu0 %v5175_v58  ;;  %1660 = vmatpush1.msra.mxu1 %v5250_v8  ;;  %v7578_v58 = vld [vmem:[#allocation19_spill] sm:$0xff]  ;;  %v7590_v8 = vld [vmem:[#allocation33_spill] sm:$0xff] }
 0x45f   : > { %1590 = vmatprep.subr.mxu0 %v5186_v60  ;;  %1661 = vmatprep.subr.mxu1 %v5262_v10  ;;  %v7579_v60 = vld [vmem:[#allocation28_spill] sm:$0xff]  ;;  %v7592_v10 = vld [vmem:[#allocation15_spill] sm:$0xff] }
 0x460   : > { %1591 = vmatpush1.msra.mxu0 %v5198_v62  ;;  %1662 = vmatpush1.msra.mxu1 %v5274_v12  ;;  %v7581_v62 = vld [vmem:[#allocation29_spill] sm:$0xff] }
 0x461   : > { %1592 = vmatprep.subr.mxu0 %v5215_v2  ;;  %1663 = vmatprep.subr.mxu1 %v5286_v14  ;;  %v7584_v2 = vld [vmem:[#allocation23_spill] sm:$0xff] }
 0x462   : > { %1593 = vmatpush1.msra.mxu0 %v5227_v4  ;;  %1664 = vmatpush1.msra.mxu1 %v5298_v16  ;;  %v7586_v4 = vld [vmem:[#allocation25_spill] sm:$0xff] }
 0x463   : > { %1594 = vmatprep.subr.mxu0 %v5244_v7  ;;  %1665 = vmatprep.subr.mxu1 %v5310_v18  ;;  %v7589_v7 = vmov 0.0  }
 0x464   : > { %1595 = vmatpush1.msra.mxu0 %v5256_v9  ;;  %1666 = vmatpush1.msra.mxu1 %v5322_v20  ;;  %v5794_v9 = vld [vmem:[%s7356_s2 + $0x1e8] sm:$0xff]  ;;  %v1404_v20 = vld [vmem:[#allocation2 + $0x60] sm:$0xff] }
 0x465   : > { %1596 = vmatprep.subr.mxu0 %v5268_v11  ;;  %1667 = vmatprep.subr.mxu1 %v5334_v22  ;;  %7591 = vst [vmem:[#allocation14_spill] sm:$0xff] %v5794_v9  ;;  %v1401_v11 = vld [vmem:[#allocation2 + $0x120] sm:$0xff] }
 0x466   : > { %1597 = vmatpush1.msra.mxu0 %v5280_v13  ;;  %1668 = vmatpush1.msra.mxu1 %v5346_v24  ;;  %v1402_v13 = vld [vmem:[#allocation2 + $0x150] sm:$0xff] }
 0x467   : > { %1598 = vmatprep.subr.mxu0 %v5292_v15  ;;  %1669 = vmatprep.subr.mxu1 %v5358_v26 }
 0x468   : > { %1599 = vmatpush1.msra.mxu0 %v5304_v17  ;;  %1670 = vmatpush1.msra.mxu1 %v5370_v28 }
 0x469   : > { %1600 = vmatprep.subr.mxu0 %v5316_v19  ;;  %1671 = vmatprep.subr.mxu1 %v5382_v30 }
 0x46a   : > { %1601 = vmatpush1.msra.mxu0 %v5328_v21  ;;  %1672 = vmatpush1.msra.mxu1 %v5394_v32 }
 0x46b   : > { %1602 = vmatprep.subr.mxu0 %v5340_v23  ;;  %1673 = vmatprep.subr.mxu1 %v5406_v34  ;;  %v1403_v23 = vld [vmem:[#allocation2 + $0x108] sm:$0xff] }
 0x46c   : > { %1603 = vmatpush1.msra.mxu0 %v5352_v25  ;;  %1674 = vmatpush1.msra.mxu1 %v5418_v36 }
 0x46d   : > { %1604 = vmatprep.subr.mxu0 %v5364_v27  ;;  %1675 = vmatprep.subr.mxu1 %v5430_v38 }
 0x46e   : > { %1605 = vmatpush1.msra.mxu0 %v7572_v41  ;;  %1676 = vmatpush1.msra.mxu1 %v7573_v42  ;;  %v5865_v41 = vld [vmem:[%s7356_s2 + $0x188] sm:$0xff] }
 0x46f   : > { %1606 = vmatprep.subr.mxu0 %v7574_v43  ;;  %1677 = vmatprep.subr.mxu1 %v7575_v55  ;;  %v5871_v43 = vld [vmem:[%s7356_s2 + $0x198] sm:$0xff] }
 0x470   : > { %1607 = vmatpush1.msra.mxu0 %v7576_v56  ;;  %1678 = vmatpush1.msra.mxu1 %v7577_v57  ;;  %v5877_v56 = vld [vmem:[%s7356_s2 + $0x180] sm:$0xff] }
 0x471   : > { %1608 = vmatprep.subr.mxu0 %v7578_v58  ;;  %1679 = vmatprep.subr.mxu1 %v7579_v60  ;;  %v5883_v58 = vld [vmem:[%s7356_s2 + $0x190] sm:$0xff] }
 0x472   : > { %1609 = vmatpush1.msra.mxu0 %v7580_v61  ;;  %1680 = vmatpush1.msra.mxu1 %v7581_v62  ;;  %v5889_v61 = vld [vmem:[%s7356_s2 + $0x168] sm:$0xff] }
 0x473   : > { %1610 = vmatprep.subr.mxu0 %v7582_v63  ;;  %1681 = vmatprep.subr.mxu1 %v7583_v1  ;;  %v5895_v63 = vld [vmem:[%s7356_s2 + $0x178] sm:$0xff] }
 0x474   : > { %1611 = vmatpush1.msra.mxu0 %v7584_v2  ;;  %1682 = vmatpush1.msra.mxu1 %v7585_v3  ;;  %v5901_v2 = vld [vmem:[%s7356_s2 + $0x160] sm:$0xff] }
 0x475   : > { %1612 = vmatprep.subr.mxu0 %v7586_v4  ;;  %1683 = vmatprep.subr.mxu1 %v7587_v5 }
 0x476   : > { %1613 = vmatpush1.msra.mxu0 %v7588_v6  ;;  %1646 = vmatprep.mubr.f32.mxu0 %v7589_v7 }
 0x477   : > { %1684 = vmatpush1.msra.mxu1 %v7590_v8  ;;  %1717 = vmatprep.mubr.f32.mxu1 %v7589_v7 }
 0x478   : > { %1759 = vmatprep.subr.mxu0 %v5794_v9  ;;  %1830 = vmatprep.subr.mxu1 %v7592_v10  ;;  %v5907_v10 = vld [vmem:[%s7356_s2 + $0x170] sm:$0xff] }
 0x517   : > { %v1471_v12 = vpop.f32.mrf.mxu0  ;;  %v1542_v18 = vpop.f32.mrf.mxu1 }
 0x518   : > { %v1547_v14 = vadd.f32 %v1471_v12, %v1401_v11  ;;  %v1549_v26 = vadd.f32 %v1542_v18, %v1403_v23  ;;  %v5913_v11 = vld [vmem:[%s7356_s2 + $0x148] sm:$0xff]  ;;  %v5919_v12 = vld [vmem:[%s7356_s2 + $0x158] sm:$0xff]  ;;  %v5955_v18 = vld [vmem:[%s7356_s2 + $0x130] sm:$0xff] }
 0x519   : > { %v1473_v15 = vpop.f32.mrf.mxu0  ;;  %v1544_v21 = vpop.f32.mrf.mxu1  ;;  %v5985_v23 = vld [vmem:[%s7356_s2 + $0xe8] sm:$0xff] }
 0x51a   : > { %v3977_v16 = vmul.f32 -1.442695, %v1547_v14  ;;  %v1548_v17 = vadd.f32 %v1473_v15, %v1402_v13  ;;  %v1550_v22 = vadd.f32 %v1544_v21, %v1404_v20  ;;  %v5925_v13 = vld [vmem:[%s7356_s2 + $0x140] sm:$0xff]  ;;  %v5931_v14 = vld [vmem:[%s7356_s2 + $0x150] sm:$0xff]  ;;  %v5937_v15 = vld [vmem:[%s7356_s2 + $0x128] sm:$0xff] }
 0x51b   : > { %v5967_v20 = vld [vmem:[%s7356_s2 + $0x118] sm:$0xff]  ;;  %v5973_v21 = vld [vmem:[%s7356_s2 + $0x100] sm:$0xff] }
 0x51c   : > { %4220 = vpow2.f32 %v3977_v16  ;;  %v3978_v19 = vmul.f32 -1.442695, %v1548_v17  ;;  %v3979_v24 = vmul.f32 -1.442695, %v1550_v22  ;;  %v5943_v16 = vld [vmem:[%s7356_s2 + $0x138] sm:$0xff]  ;;  %v5949_v17 = vld [vmem:[%s7356_s2 + $0x120] sm:$0xff] }
 0x51d   : > { %v5979_v22 = vld [vmem:[%s7356_s2 + $0x110] sm:$0xff] }
 0x51e   : > { %4222 = vpow2.f32 %v3978_v19  ;;  %v5961_v19 = vld [vmem:[%s7356_s2 + $0x108] sm:$0xff] }
 0x51f   : > { %4224 = vpow2.f32 %v3979_v24  ;;  %v5991_v24 = vld [vmem:[%s7356_s2 + $0xf8] sm:$0xff] }
 0x529   : > { %v4221_v25 = vpop.eup %4220 }
 0x52a   : > { %v1554_v27 = vadd.f32 1.0, %v4221_v25  ;;  %v5997_v25 = vld [vmem:[%s7356_s2 + $0xe0] sm:$0xff] }
 0x52b   : > { %v4223_v28 = vpop.eup %4222 }
 0x52c   : > { %4226 = vrcp.f32 %v1554_v27  ;;  %v1560_v30 = vadd.f32 1.0, %v4223_v28  ;;  %v4225_v32 = vpop.eup %4224  ;;  %v6009_v27 = vld [vmem:[%s7356_s2 + $0xc8] sm:$0xff]  ;;  %v6015_v28 = vld [vmem:[%s7356_s2 + $0xd8] sm:$0xff] }
 0x52d   : > { %4228 = vtanh.f32 %v1549_v26  ;;  %v1567_v50 = vadd.f32 1.0, %v4225_v32  ;;  %v6003_v26 = vld [vmem:[%s7356_s2 + $0xf0] sm:$0xff] }
 0x52e   : > { %4230 = vrcp.f32 %v1560_v30  ;;  %v6021_v30 = vld [vmem:[%s7356_s2 + $0xc0] sm:$0xff]  ;;  %v6027_v32 = vld [vmem:[%s7356_s2 + $0xd0] sm:$0xff] }
 0x52f   : > { %4232 = vrcp.f32 %v1567_v50 }
 0x539   : > { %v4227_v46 = vpop.eup %4226 }
 0x53a   : > { %v4229_v29 = vpop.eup %4228 }
 0x53b   : > { %v4231_v59 = vpop.eup %4230  ;;  %v1571_v54 = vmul.f32 %v4229_v29, %v4227_v46  ;;  %v6033_v46 = vld [vmem:[%s7356_s2 + $0xa8] sm:$0xff]  ;;  %v6040_v29 = vld [vmem:[%s7356_s2 + $0xa0] sm:$0xff] }
 0x53c   : > { %v1570_v35 = vmul.f32 %v4231_v59, %v5724_v39  ;;  %v4233_v48 = vpop.eup %4232  ;;  %v5841_v39 = vld [vmem:[%s7356_s2 + $0x1a8] sm:$0xff] }
 0x53d   : > { %v6047_v59 = vld [vmem:[%s7356_s2 + $0x88] sm:$0xff] }
 0x53e   : > { %v5799_v44 = vadd.f32 %v1571_v54, %v1570_v35 }
 0x540   : > { %4234 = vtanh.f32 %v5799_v44 }
 0x54d   : > { %v4235_v52 = vpop.eup %4234 }
 0x54e   : > { %v1574_v45 = vmul.f32 %v4235_v52, %v4233_v48  ;;  %v1581_v48 = vld [vmem:[#allocation2 + $0x140] sm:$0xff] }
 0x550   : > { %1647 = vmatmul.mubr.f32.vlgmr.msra.gmra.mxu0 %v1574_v45  ;;  %1718 = vmatmul.mubr.f32.vlgmr.msra.gmra.mxu1 %v1574_v45 }
 0x551   : > { %1760 = vmatpush1.msra.mxu0 %v5805_v40  ;;  %1831 = vmatpush1.msra.mxu1 %v5811_v33 }
 0x552   : > { %1761 = vmatprep.subr.mxu0 %v5817_v37  ;;  %1832 = vmatprep.subr.mxu1 %v5823_v0 }
 0x553   : > { %1762 = vmatpush1.msra.mxu0 %v5829_v49  ;;  %1833 = vmatpush1.msra.mxu1 %v5835_v53 }
 0x554   : > { %1763 = vmatprep.subr.mxu0 %v5841_v39  ;;  %1834 = vmatprep.subr.mxu1 %v5847_v31 }
 0x555   : > { %1764 = vmatpush1.msra.mxu0 %v5853_v47  ;;  %1835 = vmatpush1.msra.mxu1 %v5859_v51 }
 0x556   : > { %1765 = vmatprep.subr.mxu0 %v5865_v41  ;;  %1836 = vmatprep.subr.mxu1 %v5871_v43 }
 0x557   : > { %1766 = vmatpush1.msra.mxu0 %v5877_v56  ;;  %1837 = vmatpush1.msra.mxu1 %v5883_v58 }
 0x558   : > { %1767 = vmatprep.subr.mxu0 %v5889_v61  ;;  %1838 = vmatprep.subr.mxu1 %v5895_v63 }
 0x559   : > { %1768 = vmatpush1.msra.mxu0 %v5901_v2  ;;  %1839 = vmatpush1.msra.mxu1 %v5907_v10 }
 0x55a   : > { %1769 = vmatprep.subr.mxu0 %v5913_v11  ;;  %1840 = vmatprep.subr.mxu1 %v5919_v12 }
 0x55b   : > { %1770 = vmatpush1.msra.mxu0 %v5925_v13  ;;  %1841 = vmatpush1.msra.mxu1 %v5931_v14 }
 0x55c   : > { %1771 = vmatprep.subr.mxu0 %v5937_v15  ;;  %1842 = vmatprep.subr.mxu1 %v5943_v16 }
 0x55d   : > { %1772 = vmatpush1.msra.mxu0 %v5949_v17  ;;  %1843 = vmatpush1.msra.mxu1 %v5955_v18 }
 0x55e   : > { %1773 = vmatprep.subr.mxu0 %v5961_v19  ;;  %1844 = vmatprep.subr.mxu1 %v5967_v20 }
 0x55f   : > { %1774 = vmatpush1.msra.mxu0 %v5973_v21  ;;  %1845 = vmatpush1.msra.mxu1 %v5979_v22 }
 0x560   : > { %1775 = vmatprep.subr.mxu0 %v5985_v23  ;;  %1846 = vmatprep.subr.mxu1 %v5991_v24 }
 0x561   : > { %1776 = vmatpush1.msra.mxu0 %v5997_v25  ;;  %1847 = vmatpush1.msra.mxu1 %v6003_v26 }
 0x562   : > { %1777 = vmatprep.subr.mxu0 %v6009_v27  ;;  %1848 = vmatprep.subr.mxu1 %v6015_v28 }
 0x563   : > { %1778 = vmatpush1.msra.mxu0 %v6021_v30  ;;  %1849 = vmatpush1.msra.mxu1 %v6027_v32 }
 0x564   : > { %1779 = vmatprep.subr.mxu0 %v6033_v46  ;;  %1850 = vmatprep.subr.mxu1 %v5406_v34  ;;  %v6054_v34 = vld [vmem:[%s7356_s2 + $0x80] sm:$0xff] }
 0x565   : > { %1780 = vmatpush1.msra.mxu0 %v6040_v29  ;;  %1851 = vmatpush1.msra.mxu1 %v5418_v36  ;;  %7593 = vst [vmem:[#allocation16_spill] sm:$0xff] %v6054_v34  ;;  %v6061_v36 = vld [vmem:[%s7356_s2 + $0x68] sm:$0xff] }
 0x566   : > { %1781 = vmatprep.subr.mxu0 %v6047_v59  ;;  %1852 = vmatprep.subr.mxu1 %v5430_v38  ;;  %7594 = vst [vmem:[#allocation22_spill] sm:$0xff] %v6061_v36  ;;  %v6068_v38 = vld [vmem:[%s7356_s2 + $0x60] sm:$0xff] }
 0x567   : > { %1782 = vmatpush1.msra.mxu0 %v6054_v34  ;;  %1853 = vmatpush1.msra.mxu1 %v7573_v42  ;;  %7595 = vst [vmem:[#allocation17_spill] sm:$0xff] %v6068_v38  ;;  %v6075_v42 = vld [vmem:[%s7356_s2 + $0x48] sm:$0xff] }
 0x568   : > { %1783 = vmatprep.subr.mxu0 %v6061_v36  ;;  %1854 = vmatprep.subr.mxu1 %v7575_v55  ;;  %7596 = vst [vmem:[#allocation24_spill] sm:$0xff] %v6075_v42  ;;  %v6082_v55 = vld [vmem:[%s7356_s2 + $0x40] sm:$0xff] }
 0x569   : > { %1784 = vmatpush1.msra.mxu0 %v6068_v38  ;;  %1855 = vmatpush1.msra.mxu1 %v7577_v57  ;;  %7597 = vst [vmem:[#allocation18_spill] sm:$0xff] %v6082_v55  ;;  %v6089_v57 = vld [vmem:[%s7356_s2 + $0x28] sm:$0xff] }
 0x56a   : > { %1785 = vmatprep.subr.mxu0 %v6075_v42  ;;  %1856 = vmatprep.subr.mxu1 %v7579_v60  ;;  %7598 = vst [vmem:[#allocation26_spill] sm:$0xff] %v6089_v57  ;;  %v6096_v60 = vld [vmem:[%s7356_s2 + $0x20] sm:$0xff] }
 0x56b   : > { %1786 = vmatpush1.msra.mxu0 %v6082_v55  ;;  %1857 = vmatpush1.msra.mxu1 %v7581_v62  ;;  %7599 = vst [vmem:[#allocation19_spill] sm:$0xff] %v6096_v60  ;;  %v6110_v62 = vld [vmem:[%s7356_s2 + $0x1f8] sm:$0xff] }
 0x56c   : > { %1787 = vmatprep.subr.mxu0 %v6089_v57  ;;  %1858 = vmatprep.subr.mxu1 %v7583_v1  ;;  %7600 = vst [vmem:[#allocation28_spill] sm:$0xff] %v6110_v62  ;;  %v1578_v1 = vld [vmem:[#allocation2 + $0xe0] sm:$0xff] }
 0x56d   : > { %1788 = vmatpush1.msra.mxu0 %v6096_v60  ;;  %1859 = vmatpush1.msra.mxu1 %v7585_v3 }
 0x56e   : > { %1789 = vmatprep.subr.mxu0 %v7586_v4  ;;  %1860 = vmatprep.subr.mxu1 %v7587_v5  ;;  %v1579_v4 = vld [vmem:[#allocation2 + $0x188] sm:$0xff] }
 0x56f   : > { %1790 = vmatpush1.msra.mxu0 %v7588_v6  ;;  %1823 = vmatprep.mubr.f32.mxu0 %v7589_v7 }
 0x570   : > { %1861 = vmatpush1.msra.mxu1 %v7590_v8  ;;  %1894 = vmatprep.mubr.f32.mxu1 %v7589_v7 }
 0x571   : > { %1936 = vmatprep.subr.mxu0 %v5794_v9  ;;  %2007 = vmatprep.subr.mxu1 %v6110_v62  ;;  %v1580_v9 = vld [vmem:[#allocation2 + $0x138] sm:$0xff] }
 0x610   : > { %v1648_v3 = vpop.f32.mrf.mxu0  ;;  %v1719_v8 = vpop.f32.mrf.mxu1 }
 0x611   : > { %v1724_v5 = vadd.f32 %v1648_v3, %v1578_v1  ;;  %v1726_v57 = vadd.f32 %v1719_v8, %v1580_v9  ;;  %v6194_v8 = vld [vmem:[%s7356_s2 + $0x70] sm:$0xff] }
 0x612   : > { %v1650_v6 = vpop.f32.mrf.mxu0  ;;  %v1721_v52 = vpop.f32.mrf.mxu1  ;;  %7603 = vst [vmem:[#allocation21_spill] sm:$0xff] %v6194_v8 }
 0x613   : > { %v3980_v50 = vmul.f32 -1.442695, %v1724_v5  ;;  %v1725_v54 = vadd.f32 %v1650_v6, %v1579_v4  ;;  %v1727_v45 = vadd.f32 %v1721_v52, %v1581_v48  ;;  %v7604_v48 = vld [vmem:[#allocation24_spill] sm:$0xff] }
 0x614   : > { %v6201_v52 = vld [vmem:[%s7356_s2 + $0x58] sm:$0xff] }
 0x615   : > { %4236 = vpow2.f32 %v3980_v50  ;;  %v3981_v35 = vmul.f32 -1.442695, %v1725_v54  ;;  %v3982_v7 = vmul.f32 -1.442695, %v1727_v45  ;;  %7605 = vst [vmem:[#allocation30_spill] sm:$0xff] %v6201_v52  ;;  %v7606_v45 = vld [vmem:[#allocation18_spill] sm:$0xff] }
 0x617   : > { %4238 = vpow2.f32 %v3981_v35 }
 0x618   : > { %4240 = vpow2.f32 %v3982_v7 }
 0x622   : > { %v4237_v60 = vpop.eup %4236 }
 0x623   : > { %v1731_v55 = vadd.f32 1.0, %v4237_v60 }
 0x624   : > { %v4239_v62 = vpop.eup %4238 }
 0x625   : > { %4242 = vrcp.f32 %v1731_v55  ;;  %v1737_v42 = vadd.f32 1.0, %v4239_v62  ;;  %v4241_v1 = vpop.eup %4240  ;;  %v6173_v55 = vld [vmem:[%s7356_s2 + $0x98] sm:$0xff] }
 0x626   : > { %4244 = vtanh.f32 %v1726_v57  ;;  %v1744_v6 = vadd.f32 1.0, %v4241_v1  ;;  %v6180_v57 = vld [vmem:[%s7356_s2 + $0x90] sm:$0xff]  ;;  %v6187_v62 = vld [vmem:[%s7356_s2 + $0x78] sm:$0xff] }
 0x627   : > { %4246 = vrcp.f32 %v1737_v42  ;;  %v6166_v42 = vld [vmem:[%s7356_s2 + $0xb0] sm:$0xff]  ;;  %7601 = vst [vmem:[#allocation20_spill] sm:$0xff] %v6180_v57  ;;  %7602 = vst [vmem:[#allocation29_spill] sm:$0xff] %v6187_v62 }
 0x628   : > { %4248 = vrcp.f32 %v1744_v6  ;;  %v6208_v1 = vld [vmem:[%s7356_s2 + $0x50] sm:$0xff] }
 0x629   : > { %7607 = vst [vmem:[#allocation23_spill] sm:$0xff] %v6208_v1  ;;  %v6222_v6 = vld [vmem:[%s7356_s2 + $0x30] sm:$0xff] }
 0x62a   : > { %7611 = vst [vmem:[#allocation25_spill] sm:$0xff] %v6222_v6 }
 0x632   : > { %v4243_v3 = vpop.eup %4242 }
 0x633   : > { %v4245_v4 = vpop.eup %4244 }
 0x634   : > { %v4247_v5 = vpop.eup %4246  ;;  %v1748_v50 = vmul.f32 %v4245_v4, %v4243_v3  ;;  %v7608_v3 = vld [vmem:[#allocation26_spill] sm:$0xff]  ;;  %v6215_v4 = vld [vmem:[%s7356_s2 + $0x38] sm:$0xff] }
 0x635   : > { %v1747_v54 = vmul.f32 %v4247_v5, %v5799_v44  ;;  %v4249_v9 = vpop.eup %4248  ;;  %v6159_v44 = vld [vmem:[%s7356_s2 + $0xb8] sm:$0xff]  ;;  %7609 = vst [vmem:[#allocation31_spill] sm:$0xff] %v6215_v4  ;;  %v7610_v5 = vld [vmem:[#allocation19_spill] sm:$0xff] }
 0x637   : > { %v6114_v35 = vadd.f32 %v1748_v50, %v1747_v54  ;;  %v6228_v50 = vld [vmem:[%s7356_s2 + $0x8] sm:$0xff]  ;;  %v6234_v54 = vld [vmem:[%s7356_s2 + $0x18] sm:$0xff] }
 0x638   : > { %7612 = vst [vmem:[#allocation32_spill] sm:$0xff] %v6228_v50  ;;  %7613 = vst [vmem:[#allocation27_spill] sm:$0xff] %v6234_v54 }
 0x639   : > { %4250 = vtanh.f32 %v6114_v35 }
 0x646   : > { %v4251_v60 = vpop.eup %4250 }
 0x647   : > { %v1751_v7 = vmul.f32 %v4251_v60, %v4249_v9  ;;  %v6240_v9 = vld [vmem:[%s7356_s2] sm:$0xff]  ;;  %v7615_v60 = vmov 0.0  }
 0x648   : > { %7614 = vst [vmem:[#allocation33_spill] sm:$0xff] %v6240_v9 }
 0x649   : > { %1824 = vmatmul.mubr.f32.vlgmr.msra.gmra.mxu0 %v1751_v7  ;;  %1895 = vmatmul.mubr.f32.vlgmr.msra.gmra.mxu1 %v1751_v7  ;;  %v6247_v7 = vld [vmem:[%s7356_s2 + $0x10] sm:$0xff] }
 0x64a   : > { %1937 = vmatpush1.msra.mxu0 %v5805_v40  ;;  %2008 = vmatpush1.msra.mxu1 %v5811_v33  ;;  %7616 = vst [vmem:[#allocation15_spill] sm:$0xff] %v6247_v7 }
 0x64b   : > { %1938 = vmatprep.subr.mxu0 %v5817_v37  ;;  %2009 = vmatprep.subr.mxu1 %v5823_v0 }
 0x64c   : > { %1939 = vmatpush1.msra.mxu0 %v5829_v49  ;;  %2010 = vmatpush1.msra.mxu1 %v5835_v53 }
 0x64d   : > { %1940 = vmatprep.subr.mxu0 %v5841_v39  ;;  %2011 = vmatprep.subr.mxu1 %v5847_v31 }
 0x64e   : > { %1941 = vmatpush1.msra.mxu0 %v5853_v47  ;;  %2012 = vmatpush1.msra.mxu1 %v5859_v51 }
 0x64f   : > { %1942 = vmatprep.subr.mxu0 %v5865_v41  ;;  %2013 = vmatprep.subr.mxu1 %v5871_v43 }
 0x650   : > { %1943 = vmatpush1.msra.mxu0 %v5877_v56  ;;  %2014 = vmatpush1.msra.mxu1 %v5883_v58 }
 0x651   : > { %1944 = vmatprep.subr.mxu0 %v5889_v61  ;;  %2015 = vmatprep.subr.mxu1 %v5895_v63 }
 0x652   : > { %1945 = vmatpush1.msra.mxu0 %v5901_v2  ;;  %2016 = vmatpush1.msra.mxu1 %v5907_v10 }
 0x653   : > { %1946 = vmatprep.subr.mxu0 %v5913_v11  ;;  %2017 = vmatprep.subr.mxu1 %v5919_v12 }
 0x654   : > { %1947 = vmatpush1.msra.mxu0 %v5925_v13  ;;  %2018 = vmatpush1.msra.mxu1 %v5931_v14 }
 0x655   : > { %1948 = vmatprep.subr.mxu0 %v5937_v15  ;;  %2019 = vmatprep.subr.mxu1 %v5943_v16 }
 0x656   : > { %1949 = vmatpush1.msra.mxu0 %v5949_v17  ;;  %2020 = vmatpush1.msra.mxu1 %v5955_v18 }
 0x657   : > { %1950 = vmatprep.subr.mxu0 %v5961_v19  ;;  %2021 = vmatprep.subr.mxu1 %v5967_v20 }
 0x658   : > { %1951 = vmatpush1.msra.mxu0 %v5973_v21  ;;  %2022 = vmatpush1.msra.mxu1 %v5979_v22 }
 0x659   : > { %1952 = vmatprep.subr.mxu0 %v5985_v23  ;;  %2023 = vmatprep.subr.mxu1 %v5991_v24 }
 0x65a   : > { %1953 = vmatpush1.msra.mxu0 %v5997_v25  ;;  %2024 = vmatpush1.msra.mxu1 %v6003_v26 }
 0x65b   : > { %1954 = vmatprep.subr.mxu0 %v6009_v27  ;;  %2025 = vmatprep.subr.mxu1 %v6015_v28 }
 0x65c   : > { %1955 = vmatpush1.msra.mxu0 %v6021_v30  ;;  %2026 = vmatpush1.msra.mxu1 %v6027_v32 }
 0x65d   : > { %1956 = vmatprep.subr.mxu0 %v6033_v46  ;;  %2027 = vmatprep.subr.mxu1 %v6159_v44 }
 0x65e   : > { %1957 = vmatpush1.msra.mxu0 %v6040_v29  ;;  %2028 = vmatpush1.msra.mxu1 %v6166_v42 }
 0x65f   : > { %1958 = vmatprep.subr.mxu0 %v6047_v59  ;;  %2029 = vmatprep.subr.mxu1 %v6173_v55 }
 0x660   : > { %1959 = vmatpush1.msra.mxu0 %v6054_v34  ;;  %2030 = vmatpush1.msra.mxu1 %v6180_v57 }
 0x661   : > { %1960 = vmatprep.subr.mxu0 %v6061_v36  ;;  %2031 = vmatprep.subr.mxu1 %v6187_v62  ;;  %v1757_v62 = vld [vmem:[#allocation2 + $0x1b8] sm:$0xff] }
 0x662   : > { %1961 = vmatpush1.msra.mxu0 %v6068_v38  ;;  %2032 = vmatpush1.msra.mxu1 %v6194_v8  ;;  %v1758_v8 = vld [vmem:[#allocation2 + $0x28] sm:$0xff] }
 0x663   : > { %1962 = vmatprep.subr.mxu0 %v7604_v48  ;;  %2033 = vmatprep.subr.mxu1 %v6201_v52 }
 0x664   : > { %1963 = vmatpush1.msra.mxu0 %v7606_v45  ;;  %2034 = vmatpush1.msra.mxu1 %v6208_v1 }
 0x665   : > { %1964 = vmatprep.subr.mxu0 %v7608_v3  ;;  %2035 = vmatprep.subr.mxu1 %v6215_v4  ;;  %v1756_v4 = vld [vmem:[#allocation2 + $0x1a8] sm:$0xff] }
 0x666   : > { %1965 = vmatpush1.msra.mxu0 %v7610_v5  ;;  %2036 = vmatpush1.msra.mxu1 %v6222_v6  ;;  %v1755_v6 = vld [vmem:[#allocation2 + $0x80] sm:$0xff] }
 0x667   : > { %1966 = vmatprep.subr.mxu0 %v6228_v50  ;;  %2037 = vmatprep.subr.mxu1 %v6234_v54  ;;  %v7617_v50 = vld [vmem:[#allocation14_spill] sm:$0xff]  ;;  %v7618_v54 = vld [vmem:[#allocation28_spill] sm:$0xff] }
 0x668   : > { %1967 = vmatpush1.msra.mxu0 %v6240_v9  ;;  %2000 = vmatprep.mubr.f32.mxu0 %v7615_v60 }
 0x669   : > { %2038 = vmatpush1.msra.mxu1 %v6247_v7  ;;  %2071 = vmatprep.mubr.f32.mxu1 %v7615_v60 }
 0x66a   : > { %2113 = vmatprep.subr.mxu0 %v7617_v50  ;;  %2184 = vmatprep.subr.mxu1 %v7618_v54 }
 0x709   : > { %v1825_v5 = vpop.f32.mrf.mxu0  ;;  %v1896_v52 = vpop.f32.mrf.mxu1 }
 0x70a   : > { %v1901_v3 = vadd.f32 %v1825_v5, %v1755_v6  ;;  %v1903_v50 = vadd.f32 %v1896_v52, %v1757_v62  ;;  %v7622_v52 = vld [vmem:[#allocation29_spill] sm:$0xff] }
 0x70b   : > { %v1827_v9 = vpop.f32.mrf.mxu0  ;;  %v1898_v38 = vpop.f32.mrf.mxu1 }
 0x70c   : > { %v3983_v1 = vmul.f32 -1.442695, %v1901_v3  ;;  %v1902_v45 = vadd.f32 %v1827_v9, %v1756_v4  ;;  %v1904_v7 = vadd.f32 %v1898_v38, %v1758_v8  ;;  %v7625_v9 = vld [vmem:[#allocation24_spill] sm:$0xff] }
 0x70e   : > { %4252 = vpow2.f32 %v3983_v1  ;;  %v3984_v48 = vmul.f32 -1.442695, %v1902_v45  ;;  %v3985_v60 = vmul.f32 -1.442695, %v1904_v7  ;;  %v7627_v7 = vld [vmem:[#allocation18_spill] sm:$0xff] }
 0x710   : > { %4254 = vpow2.f32 %v3984_v48 }
 0x711   : > { %4256 = vpow2.f32 %v3985_v60  ;;  %v7626_v60 = vld [vmem:[#allocation30_spill] sm:$0xff] }
 0x71b   : > { %v4253_v36 = vpop.eup %4252 }
 0x71c   : > { %v1908_v57 = vadd.f32 1.0, %v4253_v36 }
 0x71d   : > { %v4255_v54 = vpop.eup %4254 }
 0x71e   : > { %4258 = vrcp.f32 %v1908_v57  ;;  %v1914_v34 = vadd.f32 1.0, %v4255_v54  ;;  %v4257_v3 = vpop.eup %4256  ;;  %v7621_v57 = vld [vmem:[#allocation22_spill] sm:$0xff]  ;;  %v7624_v54 = vld [vmem:[#allocation21_spill] sm:$0xff] }
 0x71f   : > { %4260 = vtanh.f32 %v1903_v50  ;;  %v1921_v45 = vadd.f32 1.0, %v4257_v3  ;;  %v7623_v50 = vld [vmem:[#allocation17_spill] sm:$0xff]  ;;  %v7628_v3 = vld [vmem:[#allocation23_spill] sm:$0xff] }
 0x720   : > { %4262 = vrcp.f32 %v1914_v34  ;;  %v7619_v34 = vld [vmem:[#allocation16_spill] sm:$0xff] }
 0x721   : > { %4264 = vrcp.f32 %v1921_v45  ;;  %v7632_v45 = vld [vmem:[#allocation25_spill] sm:$0xff] }
 0x72b   : > { %v4259_v4 = vpop.eup %4258 }
 0x72c   : > { %v4261_v1 = vpop.eup %4260 }
 0x72d   : > { %v4263_v5 = vpop.eup %4262  ;;  %v1925_v48 = vmul.f32 %v4261_v1, %v4259_v4  ;;  %v7629_v4 = vld [vmem:[#allocation26_spill] sm:$0xff]  ;;  %v7630_v1 = vld [vmem:[#allocation31_spill] sm:$0xff] }
 0x72e   : > { %v1924_v6 = vmul.f32 %v4263_v5, %v6114_v35  ;;  %v4265_v36 = vpop.eup %4264  ;;  %v7620_v35 = vld [vmem:[#allocation20_spill] sm:$0xff]  ;;  %v7631_v5 = vld [vmem:[#allocation19_spill] sm:$0xff] }
 0x730   : > { %v6254_v38 = vadd.f32 %v1925_v48, %v1924_v6  ;;  %v7633_v48 = vld [vmem:[#allocation32_spill] sm:$0xff]  ;;  %v7634_v6 = vld [vmem:[#allocation27_spill] sm:$0xff] }
 0x732   : > { %4266 = vtanh.f32 %v6254_v38 }
 0x73f   : > { %v4267_v62 = vpop.eup %4266 }
 0x740   : > { %v1928_v8 = vmul.f32 %v4267_v62, %v4265_v36  ;;  %v7635_v36 = vld [vmem:[#allocation33_spill] sm:$0xff]  ;;  %v7636_v62 = vmov 0.0  }
 0x742   : > { %2001 = vmatmul.mubr.f32.vlgmr.msra.gmra.mxu0 %v1928_v8  ;;  %2072 = vmatmul.mubr.f32.vlgmr.msra.gmra.mxu1 %v1928_v8  ;;  %v7637_v8 = vld [vmem:[#allocation15_spill] sm:$0xff] }
 0x743   : > { %2114 = vmatpush1.msra.mxu0 %v5805_v40  ;;  %2185 = vmatpush1.msra.mxu1 %v5811_v33 }
 0x744   : > { %2115 = vmatprep.subr.mxu0 %v5817_v37  ;;  %2186 = vmatprep.subr.mxu1 %v5823_v0 }
 0x745   : > { %2116 = vmatpush1.msra.mxu0 %v5829_v49  ;;  %2187 = vmatpush1.msra.mxu1 %v5835_v53 }
 0x746   : > { %2117 = vmatprep.subr.mxu0 %v5841_v39  ;;  %2188 = vmatprep.subr.mxu1 %v5847_v31 }
 0x747   : > { %2118 = vmatpush1.msra.mxu0 %v5853_v47  ;;  %2189 = vmatpush1.msra.mxu1 %v5859_v51 }
 0x748   : > { %2119 = vmatprep.subr.mxu0 %v5865_v41  ;;  %2190 = vmatprep.subr.mxu1 %v5871_v43 }
 0x749   : > { %2120 = vmatpush1.msra.mxu0 %v5877_v56  ;;  %2191 = vmatpush1.msra.mxu1 %v5883_v58 }
 0x74a   : > { %2121 = vmatprep.subr.mxu0 %v5889_v61  ;;  %2192 = vmatprep.subr.mxu1 %v5895_v63 }
 0x74b   : > { %2122 = vmatpush1.msra.mxu0 %v5901_v2  ;;  %2193 = vmatpush1.msra.mxu1 %v5907_v10 }
 0x74c   : > { %2123 = vmatprep.subr.mxu0 %v5913_v11  ;;  %2194 = vmatprep.subr.mxu1 %v5919_v12 }
 0x74d   : > { %2124 = vmatpush1.msra.mxu0 %v5925_v13  ;;  %2195 = vmatpush1.msra.mxu1 %v5931_v14 }
 0x74e   : > { %2125 = vmatprep.subr.mxu0 %v5937_v15  ;;  %2196 = vmatprep.subr.mxu1 %v5943_v16 }
 0x74f   : > { %2126 = vmatpush1.msra.mxu0 %v5949_v17  ;;  %2197 = vmatpush1.msra.mxu1 %v5955_v18 }
 0x750   : > { %2127 = vmatprep.subr.mxu0 %v5961_v19  ;;  %2198 = vmatprep.subr.mxu1 %v5967_v20 }
 0x751   : > { %2128 = vmatpush1.msra.mxu0 %v5973_v21  ;;  %2199 = vmatpush1.msra.mxu1 %v5979_v22 }
 0x752   : > { %2129 = vmatprep.subr.mxu0 %v5985_v23  ;;  %2200 = vmatprep.subr.mxu1 %v5991_v24 }
 0x753   : > { %2130 = vmatpush1.msra.mxu0 %v5997_v25  ;;  %2201 = vmatpush1.msra.mxu1 %v6003_v26 }
 0x754   : > { %2131 = vmatprep.subr.mxu0 %v6009_v27  ;;  %2202 = vmatprep.subr.mxu1 %v6015_v28 }
 0x755   : > { %2132 = vmatpush1.msra.mxu0 %v6021_v30  ;;  %2203 = vmatpush1.msra.mxu1 %v6027_v32 }
 0x756   : > { %2133 = vmatprep.subr.mxu0 %v6033_v46  ;;  %2204 = vmatprep.subr.mxu1 %v6159_v44 }
 0x757   : > { %2134 = vmatpush1.msra.mxu0 %v6040_v29  ;;  %2205 = vmatpush1.msra.mxu1 %v6166_v42 }
 0x758   : > { %2135 = vmatprep.subr.mxu0 %v6047_v59  ;;  %2206 = vmatprep.subr.mxu1 %v6173_v55 }
 0x759   : > { %2136 = vmatpush1.msra.mxu0 %v7619_v34  ;;  %2207 = vmatpush1.msra.mxu1 %v7620_v35 }
 0x75a   : > { %2137 = vmatprep.subr.mxu0 %v7621_v57  ;;  %2208 = vmatprep.subr.mxu1 %v7622_v52  ;;  %v1934_v52 = vld [vmem:[#allocation2 + $0x160] sm:$0xff] }
 0x75b   : > { %2138 = vmatpush1.msra.mxu0 %v7623_v50  ;;  %2209 = vmatpush1.msra.mxu1 %v7624_v54  ;;  %v1935_v54 = vld [vmem:[#allocation2 + $0x30] sm:$0xff] }
 0x75c   : > { %2139 = vmatprep.subr.mxu0 %v7625_v9  ;;  %2210 = vmatprep.subr.mxu1 %v7626_v60 }
 0x75d   : > { %2140 = vmatpush1.msra.mxu0 %v7627_v7  ;;  %2211 = vmatpush1.msra.mxu1 %v7628_v3  ;;  %v7638_v3 = vld [vmem:[#allocation14_spill] sm:$0xff]  ;;  %v1933_v7 = vld [vmem:[#allocation2 + $0xf8] sm:$0xff] }
 0x75e   : > { %2141 = vmatprep.subr.mxu0 %v7629_v4  ;;  %2212 = vmatprep.subr.mxu1 %v7630_v1  ;;  %v7639_v4 = vld [vmem:[#allocation28_spill] sm:$0xff]  ;;  %v1932_v1 = vld [vmem:[#allocation2 + $0x1e8] sm:$0xff] }
 0x75f   : > { %2142 = vmatpush1.msra.mxu0 %v7631_v5  ;;  %2213 = vmatpush1.msra.mxu1 %v7632_v45 }
 0x760   : > { %2143 = vmatprep.subr.mxu0 %v7633_v48  ;;  %2214 = vmatprep.subr.mxu1 %v7634_v6 }
 0x761   : > { %2144 = vmatpush1.msra.mxu0 %v7635_v36  ;;  %2177 = vmatprep.mubr.f32.mxu0 %v7636_v62 }
 0x762   : > { %2215 = vmatpush1.msra.mxu1 %v7637_v8  ;;  %2248 = vmatprep.mubr.f32.mxu1 %v7636_v62 }
 0x763   : > { %2290 = vmatprep.subr.mxu0 %v7638_v3  ;;  %2361 = vmatprep.subr.mxu1 %v7639_v4 }
 0x802   : > { %v2002_v5 = vpop.f32.mrf.mxu0  ;;  %v2073_v6 = vpop.f32.mrf.mxu1 }
 0x803   : > { %v2078_v45 = vadd.f32 %v2002_v5, %v1932_v1  ;;  %v2080_v3 = vadd.f32 %v2073_v6, %v1934_v52  ;;  %v7645_v6 = vld [vmem:[#allocation21_spill] sm:$0xff] }
 0x804   : > { %v2004_v60 = vpop.f32.mrf.mxu0  ;;  %v2075_v50 = vpop.f32.mrf.mxu1 }
 0x805   : > { %v3986_v48 = vmul.f32 -1.442695, %v2078_v45  ;;  %v2079_v9 = vadd.f32 %v2004_v60, %v1933_v7  ;;  %v2081_v8 = vadd.f32 %v2075_v50, %v1935_v54 }
 0x807   : > { %4268 = vpow2.f32 %v3986_v48  ;;  %v3987_v36 = vmul.f32 -1.442695, %v2079_v9  ;;  %v3988_v62 = vmul.f32 -1.442695, %v2081_v8  ;;  %v7648_v8 = vld [vmem:[#allocation18_spill] sm:$0xff] }
 0x809   : > { %4270 = vpow2.f32 %v3987_v36  ;;  %v7646_v36 = vld [vmem:[#allocation24_spill] sm:$0xff] }
 0x80a   : > { %4272 = vpow2.f32 %v3988_v62  ;;  %v7647_v62 = vld [vmem:[#allocation30_spill] sm:$0xff] }
 0x814   : > { %v4269_v57 = vpop.eup %4268 }
 0x815   : > { %v2085_v35 = vadd.f32 1.0, %v4269_v57 }
 0x816   : > { %v4271_v4 = vpop.eup %4270 }
 0x817   : > { %4274 = vrcp.f32 %v2085_v35  ;;  %v2091_v34 = vadd.f32 1.0, %v4271_v4  ;;  %v4273_v1 = vpop.eup %4272  ;;  %v7642_v35 = vld [vmem:[#allocation22_spill] sm:$0xff]  ;;  %v7644_v4 = vld [vmem:[#allocation17_spill] sm:$0xff] }
 0x818   : > { %4276 = vtanh.f32 %v2080_v3  ;;  %v2098_v9 = vadd.f32 1.0, %v4273_v1  ;;  %v7643_v3 = vld [vmem:[#allocation29_spill] sm:$0xff]  ;;  %v7649_v1 = vld [vmem:[#allocation23_spill] sm:$0xff] }
 0x819   : > { %4278 = vrcp.f32 %v2091_v34  ;;  %v7641_v34 = vld [vmem:[#allocation20_spill] sm:$0xff] }
 0x81a   : > { %4280 = vrcp.f32 %v2098_v9  ;;  %v7653_v9 = vld [vmem:[#allocation25_spill] sm:$0xff] }
 0x824   : > { %v4275_v60 = vpop.eup %4274 }
 0x825   : > { %v4277_v7 = vpop.eup %4276 }
 0x826   : > { %v4279_v5 = vpop.eup %4278  ;;  %v2102_v45 = vmul.f32 %v4277_v7, %v4275_v60  ;;  %v7650_v60 = vld [vmem:[#allocation26_spill] sm:$0xff]  ;;  %v7651_v7 = vld [vmem:[#allocation31_spill] sm:$0xff] }
 0x827   : > { %v2101_v48 = vmul.f32 %v4279_v5, %v6254_v38  ;;  %v4281_v57 = vpop.eup %4280  ;;  %v7640_v38 = vld [vmem:[#allocation16_spill] sm:$0xff]  ;;  %v7652_v5 = vld [vmem:[#allocation19_spill] sm:$0xff] }
 0x829   : > { %v6324_v50 = vadd.f32 %v2102_v45, %v2101_v48  ;;  %v7654_v45 = vld [vmem:[#allocation32_spill] sm:$0xff]  ;;  %v7655_v48 = vld [vmem:[#allocation27_spill] sm:$0xff] }
 0x82b   : > { %4282 = vtanh.f32 %v6324_v50 }
 0x838   : > { %v4283_v52 = vpop.eup %4282 }
 0x839   : > { %v2105_v54 = vmul.f32 %v4283_v52, %v4281_v57  ;;  %v7656_v57 = vld [vmem:[#allocation33_spill] sm:$0xff]  ;;  %v7657_v52 = vmov 0.0  }
 0x83b   : > { %2178 = vmatmul.mubr.f32.vlgmr.msra.gmra.mxu0 %v2105_v54  ;;  %2249 = vmatmul.mubr.f32.vlgmr.msra.gmra.mxu1 %v2105_v54  ;;  %v7658_v54 = vld [vmem:[#allocation15_spill] sm:$0xff] }
 0x83c   : > { %2291 = vmatpush1.msra.mxu0 %v5805_v40  ;;  %2362 = vmatpush1.msra.mxu1 %v5811_v33 }
 0x83d   : > { %2292 = vmatprep.subr.mxu0 %v5817_v37  ;;  %2363 = vmatprep.subr.mxu1 %v5823_v0 }
 0x83e   : > { %2293 = vmatpush1.msra.mxu0 %v5829_v49  ;;  %2364 = vmatpush1.msra.mxu1 %v5835_v53 }
 0x83f   : > { %2294 = vmatprep.subr.mxu0 %v5841_v39  ;;  %2365 = vmatprep.subr.mxu1 %v5847_v31 }
 0x840   : > { %2295 = vmatpush1.msra.mxu0 %v5853_v47  ;;  %2366 = vmatpush1.msra.mxu1 %v5859_v51 }
 0x841   : > { %2296 = vmatprep.subr.mxu0 %v5865_v41  ;;  %2367 = vmatprep.subr.mxu1 %v5871_v43 }
 0x842   : > { %2297 = vmatpush1.msra.mxu0 %v5877_v56  ;;  %2368 = vmatpush1.msra.mxu1 %v5883_v58 }
 0x843   : > { %2298 = vmatprep.subr.mxu0 %v5889_v61  ;;  %2369 = vmatprep.subr.mxu1 %v5895_v63 }
 0x844   : > { %2299 = vmatpush1.msra.mxu0 %v5901_v2  ;;  %2370 = vmatpush1.msra.mxu1 %v5907_v10 }
 0x845   : > { %2300 = vmatprep.subr.mxu0 %v5913_v11  ;;  %2371 = vmatprep.subr.mxu1 %v5919_v12 }
 0x846   : > { %2301 = vmatpush1.msra.mxu0 %v5925_v13  ;;  %2372 = vmatpush1.msra.mxu1 %v5931_v14 }
 0x847   : > { %2302 = vmatprep.subr.mxu0 %v5937_v15  ;;  %2373 = vmatprep.subr.mxu1 %v5943_v16 }
 0x848   : > { %2303 = vmatpush1.msra.mxu0 %v5949_v17  ;;  %2374 = vmatpush1.msra.mxu1 %v5955_v18 }
 0x849   : > { %2304 = vmatprep.subr.mxu0 %v5961_v19  ;;  %2375 = vmatprep.subr.mxu1 %v5967_v20 }
 0x84a   : > { %2305 = vmatpush1.msra.mxu0 %v5973_v21  ;;  %2376 = vmatpush1.msra.mxu1 %v5979_v22 }
 0x84b   : > { %2306 = vmatprep.subr.mxu0 %v5985_v23  ;;  %2377 = vmatprep.subr.mxu1 %v5991_v24 }
 0x84c   : > { %2307 = vmatpush1.msra.mxu0 %v5997_v25  ;;  %2378 = vmatpush1.msra.mxu1 %v6003_v26 }
 0x84d   : > { %2308 = vmatprep.subr.mxu0 %v6009_v27  ;;  %2379 = vmatprep.subr.mxu1 %v6015_v28 }
 0x84e   : > { %2309 = vmatpush1.msra.mxu0 %v6021_v30  ;;  %2380 = vmatpush1.msra.mxu1 %v6027_v32 }
 0x84f   : > { %2310 = vmatprep.subr.mxu0 %v6033_v46  ;;  %2381 = vmatprep.subr.mxu1 %v6159_v44 }
 0x850   : > { %2311 = vmatpush1.msra.mxu0 %v6040_v29  ;;  %2382 = vmatpush1.msra.mxu1 %v6166_v42 }
 0x851   : > { %2312 = vmatprep.subr.mxu0 %v6047_v59  ;;  %2383 = vmatprep.subr.mxu1 %v6173_v55 }
 0x852   : > { %2313 = vmatpush1.msra.mxu0 %v7640_v38  ;;  %2384 = vmatpush1.msra.mxu1 %v7641_v34 }
 0x853   : > { %2314 = vmatprep.subr.mxu0 %v7642_v35  ;;  %2385 = vmatprep.subr.mxu1 %v7643_v3  ;;  %v2111_v3 = vld [vmem:[#allocation2 + $0xf0] sm:$0xff] }
 0x854   : > { %2315 = vmatpush1.msra.mxu0 %v7644_v4  ;;  %2386 = vmatpush1.msra.mxu1 %v7645_v6  ;;  %v2112_v6 = vld [vmem:[#allocation2 + $0x8] sm:$0xff] }
 0x855   : > { %2316 = vmatprep.subr.mxu0 %v7646_v36  ;;  %2387 = vmatprep.subr.mxu1 %v7647_v62 }
 0x856   : > { %2317 = vmatpush1.msra.mxu0 %v7648_v8  ;;  %2388 = vmatpush1.msra.mxu1 %v7649_v1  ;;  %v7659_v1 = vld [vmem:[#allocation14_spill] sm:$0xff] }
 0x857   : > { %2318 = vmatprep.subr.mxu0 %v7650_v60  ;;  %2389 = vmatprep.subr.mxu1 %v7651_v7  ;;  %v7660_v60 = vld [vmem:[#allocation28_spill] sm:$0xff]  ;;  %v2109_v7 = vld [vmem:[#allocation2 + $0x1e0] sm:$0xff] }
 0x858   : > { %2319 = vmatpush1.msra.mxu0 %v7652_v5  ;;  %2390 = vmatpush1.msra.mxu1 %v7653_v9  ;;  %v2110_v8 = vld [vmem:[#allocation2] sm:$0xff] }
 0x859   : > { %2320 = vmatprep.subr.mxu0 %v7654_v45  ;;  %2391 = vmatprep.subr.mxu1 %v7655_v48 }
 0x85a   : > { %2321 = vmatpush1.msra.mxu0 %v7656_v57  ;;  %2354 = vmatprep.mubr.f32.mxu0 %v7657_v52 }
 0x85b   : > { %2392 = vmatpush1.msra.mxu1 %v7658_v54  ;;  %2425 = vmatprep.mubr.f32.mxu1 %v7657_v52 }
 0x85c   : > { %2467 = vmatprep.subr.mxu0 %v7659_v1  ;;  %2538 = vmatprep.subr.mxu1 %v7660_v60 }
 0x8fb   : > { %v2179_v5 = vpop.f32.mrf.mxu0  ;;  %v2250_v48 = vpop.f32.mrf.mxu1 }
 0x8fc   : > { %v2255_v9 = vadd.f32 %v2179_v5, %v2109_v7  ;;  %v2257_v1 = vadd.f32 %v2250_v48, %v2111_v3 }
 0x8fd   : > { %v2181_v62 = vpop.f32.mrf.mxu0  ;;  %v2252_v4 = vpop.f32.mrf.mxu1 }
 0x8fe   : > { %v3989_v45 = vmul.f32 -1.442695, %v2255_v9  ;;  %v2256_v36 = vadd.f32 %v2181_v62, %v2110_v8  ;;  %v2258_v54 = vadd.f32 %v2252_v4, %v2112_v6 }
 0x900   : > { %4284 = vpow2.f32 %v3989_v45  ;;  %v3990_v57 = vmul.f32 -1.442695, %v2256_v36  ;;  %v3991_v52 = vmul.f32 -1.442695, %v2258_v54 }
 0x902   : > { %4286 = vpow2.f32 %v3990_v57 }
 0x903   : > { %4288 = vpow2.f32 %v3991_v52 }
 0x90d   : > { %v4285_v35 = vpop.eup %4284 }
 0x90e   : > { %v2262_v34 = vadd.f32 1.0, %v4285_v35 }
 0x90f   : > { %v4287_v60 = vpop.eup %4286 }
 0x910   : > { %4290 = vrcp.f32 %v2262_v34  ;;  %v2268_v38 = vadd.f32 1.0, %v4287_v60  ;;  %v4289_v7 = vpop.eup %4288 }
 0x911   : > { %4292 = vtanh.f32 %v2257_v1  ;;  %v2275_v36 = vadd.f32 1.0, %v4289_v7 }
 0x912   : > { %4294 = vrcp.f32 %v2268_v38 }
 0x913   : > { %4296 = vrcp.f32 %v2275_v36  ;;  %v6493_v36 = vld [vmem:[%s7356_s2 + $0x1d8] sm:$0xff] }
 0x91d   : > { %v4291_v62 = vpop.eup %4290 }
 0x91e   : > { %v4293_v8 = vpop.eup %4292 }
 0x91f   : > { %v4295_v5 = vpop.eup %4294  ;;  %v2279_v9 = vmul.f32 %v4293_v8, %v4291_v62  ;;  %v6475_v62 = vld [vmem:[%s7356_s2 + $0x1e0] sm:$0xff]  ;;  %v6481_v8 = vld [vmem:[%s7356_s2 + $0x1f0] sm:$0xff] }
 0x920   : > { %v2278_v45 = vmul.f32 %v4295_v5, %v6324_v50  ;;  %v4297_v35 = vpop.eup %4296  ;;  %v6487_v5 = vld [vmem:[%s7356_s2 + $0x1c8] sm:$0xff] }
 0x922   : > { %v6394_v4 = vadd.f32 %v2279_v9, %v2278_v45  ;;  %v6499_v9 = vld [vmem:[%s7356_s2 + $0x1c0] sm:$0xff]  ;;  %v6505_v45 = vld [vmem:[%s7356_s2 + $0x1d0] sm:$0xff] }
 0x924   : > { %4298 = vtanh.f32 %v6394_v4 }
 0x931   : > { %v4299_v3 = vpop.eup %4298 }
 0x932   : > { %v2282_v6 = vmul.f32 %v4299_v3, %v4297_v35  ;;  %v6517_v35 = vld [vmem:[%s7356_s2 + $0x1b8] sm:$0xff]  ;;  %v6523_v3 = vld [vmem:[%s7356_s2 + $0x1a0] sm:$0xff] }
 0x934   : > { %2355 = vmatmul.mubr.f32.vlgmr.msra.gmra.mxu0 %v2282_v6  ;;  %2426 = vmatmul.mubr.f32.vlgmr.msra.gmra.mxu1 %v2282_v6  ;;  %v6529_v6 = vld [vmem:[%s7356_s2 + $0x1b0] sm:$0xff] }
 0x935   : > { %2468 = vmatpush1.msra.mxu0 %v5805_v40  ;;  %2539 = vmatpush1.msra.mxu1 %v5811_v33  ;;  %v7661_v40 = vld [vmem:[#allocation16_spill] sm:$0xff] }
 0x936   : > { %2469 = vmatprep.subr.mxu0 %v5817_v37  ;;  %2540 = vmatprep.subr.mxu1 %v5823_v0  ;;  %v7662_v33 = vld [vmem:[#allocation20_spill] sm:$0xff]  ;;  %v7663_v37 = vld [vmem:[#allocation22_spill] sm:$0xff]  ;;  %v7664_v0 = vld [vmem:[#allocation29_spill] sm:$0xff] }
 0x937   : > { %2470 = vmatpush1.msra.mxu0 %v5829_v49  ;;  %2541 = vmatpush1.msra.mxu1 %v5835_v53  ;;  %v7665_v49 = vld [vmem:[#allocation17_spill] sm:$0xff] }
 0x938   : > { %2471 = vmatprep.subr.mxu0 %v5841_v39  ;;  %2542 = vmatprep.subr.mxu1 %v5847_v31  ;;  %v7666_v53 = vld [vmem:[#allocation21_spill] sm:$0xff]  ;;  %v7667_v39 = vld [vmem:[#allocation24_spill] sm:$0xff]  ;;  %v7668_v31 = vld [vmem:[#allocation30_spill] sm:$0xff] }
 0x939   : > { %2472 = vmatpush1.msra.mxu0 %v5853_v47  ;;  %2543 = vmatpush1.msra.mxu1 %v5859_v51  ;;  %v7669_v47 = vld [vmem:[#allocation18_spill] sm:$0xff]  ;;  %v7670_v51 = vld [vmem:[#allocation23_spill] sm:$0xff] }
 0x93a   : > { %2473 = vmatprep.subr.mxu0 %v5865_v41  ;;  %2544 = vmatprep.subr.mxu1 %v5871_v43  ;;  %v7671_v41 = vld [vmem:[#allocation26_spill] sm:$0xff]  ;;  %v7672_v43 = vld [vmem:[#allocation31_spill] sm:$0xff] }
 0x93b   : > { %2474 = vmatpush1.msra.mxu0 %v5877_v56  ;;  %2545 = vmatpush1.msra.mxu1 %v5883_v58  ;;  %v7673_v56 = vld [vmem:[#allocation19_spill] sm:$0xff]  ;;  %v7674_v58 = vld [vmem:[#allocation25_spill] sm:$0xff] }
 0x93c   : > { %2475 = vmatprep.subr.mxu0 %v5889_v61  ;;  %2546 = vmatprep.subr.mxu1 %v5895_v63  ;;  %v7675_v61 = vld [vmem:[#allocation32_spill] sm:$0xff]  ;;  %v7676_v63 = vld [vmem:[#allocation27_spill] sm:$0xff] }
 0x93d   : > { %2476 = vmatpush1.msra.mxu0 %v5901_v2  ;;  %2547 = vmatpush1.msra.mxu1 %v5907_v10  ;;  %v7677_v2 = vld [vmem:[#allocation33_spill] sm:$0xff]  ;;  %v7678_v10 = vmov 0.0  }
 0x93e   : > { %2477 = vmatprep.subr.mxu0 %v5913_v11  ;;  %2548 = vmatprep.subr.mxu1 %v5919_v12  ;;  %v7679_v11 = vld [vmem:[#allocation15_spill] sm:$0xff] }
 0x93f   : > { %2478 = vmatpush1.msra.mxu0 %v5925_v13  ;;  %2549 = vmatpush1.msra.mxu1 %v5931_v14  ;;  %v6464_v12 = vld [vmem:[%s7356_s2 + $0x1e8] sm:$0xff]  ;;  %v7681_v13 = vld [vmem:[#allocation28_spill] sm:$0xff] }
 0x940   : > { %2479 = vmatprep.subr.mxu0 %v5937_v15  ;;  %2550 = vmatprep.subr.mxu1 %v5943_v16  ;;  %7680 = vst [vmem:[#allocation14_spill] sm:$0xff] %v6464_v12  ;;  %v2286_v14 = vld [vmem:[#allocation2 + $0x148] sm:$0xff]  ;;  %v2287_v16 = vld [vmem:[#allocation2 + $0x1d0] sm:$0xff] }
 0x941   : > { %2480 = vmatpush1.msra.mxu0 %v5949_v17  ;;  %2551 = vmatpush1.msra.mxu1 %v5955_v18 }
 0x942   : > { %2481 = vmatprep.subr.mxu0 %v5961_v19  ;;  %2552 = vmatprep.subr.mxu1 %v5967_v20 }
 0x943   : > { %2482 = vmatpush1.msra.mxu0 %v5973_v21  ;;  %2553 = vmatpush1.msra.mxu1 %v5979_v22 }
 0x944   : > { %2483 = vmatprep.subr.mxu0 %v5985_v23  ;;  %2554 = vmatprep.subr.mxu1 %v5991_v24  ;;  %v2289_v23 = vld [vmem:[#allocation2 + $0xc8] sm:$0xff] }
 0x945   : > { %2484 = vmatpush1.msra.mxu0 %v5997_v25  ;;  %2555 = vmatpush1.msra.mxu1 %v6003_v26  ;;  %v2288_v26 = vld [vmem:[#allocation2 + $0x100] sm:$0xff] }
 0x946   : > { %2485 = vmatprep.subr.mxu0 %v6009_v27  ;;  %2556 = vmatprep.subr.mxu1 %v6015_v28 }
 0x947   : > { %2486 = vmatpush1.msra.mxu0 %v6021_v30  ;;  %2557 = vmatpush1.msra.mxu1 %v6027_v32 }
 0x948   : > { %2487 = vmatprep.subr.mxu0 %v6033_v46  ;;  %2558 = vmatprep.subr.mxu1 %v6159_v44 }
 0x949   : > { %2488 = vmatpush1.msra.mxu0 %v6040_v29  ;;  %2559 = vmatpush1.msra.mxu1 %v6166_v42 }
 0x94a   : > { %2489 = vmatprep.subr.mxu0 %v6047_v59  ;;  %2560 = vmatprep.subr.mxu1 %v6173_v55 }
 0x94b   : > { %2490 = vmatpush1.msra.mxu0 %v7661_v40  ;;  %2561 = vmatpush1.msra.mxu1 %v7662_v33  ;;  %v6535_v40 = vld [vmem:[%s7356_s2 + $0x188] sm:$0xff] }
 0x94c   : > { %2491 = vmatprep.subr.mxu0 %v7663_v37  ;;  %2562 = vmatprep.subr.mxu1 %v7664_v0  ;;  %v6541_v37 = vld [vmem:[%s7356_s2 + $0x198] sm:$0xff] }
 0x94d   : > { %2492 = vmatpush1.msra.mxu0 %v7665_v49  ;;  %2563 = vmatpush1.msra.mxu1 %v7666_v53  ;;  %v6547_v49 = vld [vmem:[%s7356_s2 + $0x180] sm:$0xff] }
 0x94e   : > { %2493 = vmatprep.subr.mxu0 %v7667_v39  ;;  %2564 = vmatprep.subr.mxu1 %v7668_v31  ;;  %v6553_v39 = vld [vmem:[%s7356_s2 + $0x190] sm:$0xff] }
 0x94f   : > { %2494 = vmatpush1.msra.mxu0 %v7669_v47  ;;  %2565 = vmatpush1.msra.mxu1 %v7670_v51  ;;  %v6559_v47 = vld [vmem:[%s7356_s2 + $0x168] sm:$0xff] }
 0x950   : > { %2495 = vmatprep.subr.mxu0 %v7671_v41  ;;  %2566 = vmatprep.subr.mxu1 %v7672_v43  ;;  %v6565_v41 = vld [vmem:[%s7356_s2 + $0x178] sm:$0xff] }
 0x951   : > { %2496 = vmatpush1.msra.mxu0 %v7673_v56  ;;  %2567 = vmatpush1.msra.mxu1 %v7674_v58  ;;  %v6571_v56 = vld [vmem:[%s7356_s2 + $0x160] sm:$0xff] }
 0x952   : > { %2497 = vmatprep.subr.mxu0 %v7675_v61  ;;  %2568 = vmatprep.subr.mxu1 %v7676_v63 }
 0x953   : > { %2498 = vmatpush1.msra.mxu0 %v7677_v2  ;;  %2531 = vmatprep.mubr.f32.mxu0 %v7678_v10 }
 0x954   : > { %2569 = vmatpush1.msra.mxu1 %v7679_v11  ;;  %2602 = vmatprep.mubr.f32.mxu1 %v7678_v10 }
 0x955   : > { %2644 = vmatprep.subr.mxu0 %v6464_v12  ;;  %2715 = vmatprep.subr.mxu1 %v7681_v13  ;;  %v6577_v13 = vld [vmem:[%s7356_s2 + $0x170] sm:$0xff] }
 0x9f4   : > { %v2356_v15 = vpop.f32.mrf.mxu0  ;;  %v2427_v21 = vpop.f32.mrf.mxu1 }
 0x9f5   : > { %v2432_v17 = vadd.f32 %v2356_v15, %v2286_v14  ;;  %v2434_v30 = vadd.f32 %v2427_v21, %v2288_v26  ;;  %v6583_v14 = vld [vmem:[%s7356_s2 + $0x148] sm:$0xff]  ;;  %v6589_v15 = vld [vmem:[%s7356_s2 + $0x158] sm:$0xff]  ;;  %v6625_v21 = vld [vmem:[%s7356_s2 + $0x130] sm:$0xff] }
 0x9f6   : > { %v2358_v18 = vpop.f32.mrf.mxu0  ;;  %v2429_v24 = vpop.f32.mrf.mxu1  ;;  %v6655_v26 = vld [vmem:[%s7356_s2 + $0xe8] sm:$0xff] }
 0x9f7   : > { %v3992_v19 = vmul.f32 -1.442695, %v2432_v17  ;;  %v2433_v20 = vadd.f32 %v2358_v18, %v2287_v16  ;;  %v2435_v25 = vadd.f32 %v2429_v24, %v2289_v23  ;;  %v6595_v16 = vld [vmem:[%s7356_s2 + $0x140] sm:$0xff]  ;;  %v6601_v17 = vld [vmem:[%s7356_s2 + $0x150] sm:$0xff]  ;;  %v6607_v18 = vld [vmem:[%s7356_s2 + $0x128] sm:$0xff] }
 0x9f8   : > { %v6637_v23 = vld [vmem:[%s7356_s2 + $0x118] sm:$0xff]  ;;  %v6643_v24 = vld [vmem:[%s7356_s2 + $0x100] sm:$0xff] }
 0x9f9   : > { %4300 = vpow2.f32 %v3992_v19  ;;  %v3993_v22 = vmul.f32 -1.442695, %v2433_v20  ;;  %v3994_v27 = vmul.f32 -1.442695, %v2435_v25  ;;  %v6613_v19 = vld [vmem:[%s7356_s2 + $0x138] sm:$0xff]  ;;  %v6619_v20 = vld [vmem:[%s7356_s2 + $0x120] sm:$0xff] }
 0x9fa   : > { %v6649_v25 = vld [vmem:[%s7356_s2 + $0x110] sm:$0xff] }
 0x9fb   : > { %4302 = vpow2.f32 %v3993_v22  ;;  %v6631_v22 = vld [vmem:[%s7356_s2 + $0x108] sm:$0xff] }
 0x9fc   : > { %4304 = vpow2.f32 %v3994_v27  ;;  %v6661_v27 = vld [vmem:[%s7356_s2 + $0xf8] sm:$0xff] }
 0xa06   : > { %v4301_v28 = vpop.eup %4300 }
 0xa07   : > { %v2439_v32 = vadd.f32 1.0, %v4301_v28  ;;  %v6667_v28 = vld [vmem:[%s7356_s2 + $0xe0] sm:$0xff] }
 0xa08   : > { %v4303_v46 = vpop.eup %4302 }
 0xa09   : > { %4306 = vrcp.f32 %v2439_v32  ;;  %v2445_v29 = vadd.f32 1.0, %v4303_v46  ;;  %v4305_v59 = vpop.eup %4304  ;;  %v6679_v32 = vld [vmem:[%s7356_s2 + $0xc8] sm:$0xff]  ;;  %v6685_v46 = vld [vmem:[%s7356_s2 + $0xd8] sm:$0xff] }
 0xa0a   : > { %4308 = vtanh.f32 %v2434_v30  ;;  %v2452_v60 = vadd.f32 1.0, %v4305_v59  ;;  %v6673_v30 = vld [vmem:[%s7356_s2 + $0xf0] sm:$0xff] }
 0xa0b   : > { %4310 = vrcp.f32 %v2445_v29  ;;  %v6691_v29 = vld [vmem:[%s7356_s2 + $0xc0] sm:$0xff]  ;;  %v6697_v59 = vld [vmem:[%s7356_s2 + $0xd0] sm:$0xff] }
 0xa0c   : > { %4312 = vrcp.f32 %v2452_v60 }
 0xa16   : > { %v4307_v50 = vpop.eup %4306 }
 0xa17   : > { %v4309_v38 = vpop.eup %4308 }
 0xa18   : > { %v4311_v34 = vpop.eup %4310  ;;  %v2456_v48 = vmul.f32 %v4309_v38, %v4307_v50  ;;  %v6703_v50 = vld [vmem:[%s7356_s2 + $0xa8] sm:$0xff]  ;;  %v6710_v38 = vld [vmem:[%s7356_s2 + $0xa0] sm:$0xff] }
 0xa19   : > { %v2455_v57 = vmul.f32 %v4311_v34, %v6394_v4  ;;  %v4313_v54 = vpop.eup %4312  ;;  %v6511_v4 = vld [vmem:[%s7356_s2 + $0x1a8] sm:$0xff] }
 0xa1a   : > { %v6717_v34 = vld [vmem:[%s7356_s2 + $0x88] sm:$0xff] }
 0xa1b   : > { %v6469_v52 = vadd.f32 %v2456_v48, %v2455_v57 }
 0xa1d   : > { %4314 = vtanh.f32 %v6469_v52 }
 0xa2a   : > { %v4315_v1 = vpop.eup %4314 }
 0xa2b   : > { %v2459_v7 = vmul.f32 %v4315_v1, %v4313_v54  ;;  %v2466_v54 = vld [vmem:[#allocation2 + $0x128] sm:$0xff] }
 0xa2d   : > { %2532 = vmatmul.mubr.f32.vlgmr.msra.gmra.mxu0 %v2459_v7  ;;  %2603 = vmatmul.mubr.f32.vlgmr.msra.gmra.mxu1 %v2459_v7 }
 0xa2e   : > { %2645 = vmatpush1.msra.mxu0 %v6475_v62  ;;  %2716 = vmatpush1.msra.mxu1 %v6481_v8 }
 0xa2f   : > { %2646 = vmatprep.subr.mxu0 %v6487_v5  ;;  %2717 = vmatprep.subr.mxu1 %v6493_v36 }
 0xa30   : > { %2647 = vmatpush1.msra.mxu0 %v6499_v9  ;;  %2718 = vmatpush1.msra.mxu1 %v6505_v45 }
 0xa31   : > { %2648 = vmatprep.subr.mxu0 %v6511_v4  ;;  %2719 = vmatprep.subr.mxu1 %v6517_v35 }
 0xa32   : > { %2649 = vmatpush1.msra.mxu0 %v6523_v3  ;;  %2720 = vmatpush1.msra.mxu1 %v6529_v6 }
 0xa33   : > { %2650 = vmatprep.subr.mxu0 %v6535_v40  ;;  %2721 = vmatprep.subr.mxu1 %v6541_v37 }
 0xa34   : > { %2651 = vmatpush1.msra.mxu0 %v6547_v49  ;;  %2722 = vmatpush1.msra.mxu1 %v6553_v39 }
 0xa35   : > { %2652 = vmatprep.subr.mxu0 %v6559_v47  ;;  %2723 = vmatprep.subr.mxu1 %v6565_v41 }
 0xa36   : > { %2653 = vmatpush1.msra.mxu0 %v6571_v56  ;;  %2724 = vmatpush1.msra.mxu1 %v6577_v13 }
 0xa37   : > { %2654 = vmatprep.subr.mxu0 %v6583_v14  ;;  %2725 = vmatprep.subr.mxu1 %v6589_v15 }
 0xa38   : > { %2655 = vmatpush1.msra.mxu0 %v6595_v16  ;;  %2726 = vmatpush1.msra.mxu1 %v6601_v17 }
 0xa39   : > { %2656 = vmatprep.subr.mxu0 %v6607_v18  ;;  %2727 = vmatprep.subr.mxu1 %v6613_v19 }
 0xa3a   : > { %2657 = vmatpush1.msra.mxu0 %v6619_v20  ;;  %2728 = vmatpush1.msra.mxu1 %v6625_v21 }
 0xa3b   : > { %2658 = vmatprep.subr.mxu0 %v6631_v22  ;;  %2729 = vmatprep.subr.mxu1 %v6637_v23 }
 0xa3c   : > { %2659 = vmatpush1.msra.mxu0 %v6643_v24  ;;  %2730 = vmatpush1.msra.mxu1 %v6649_v25 }
 0xa3d   : > { %2660 = vmatprep.subr.mxu0 %v6655_v26  ;;  %2731 = vmatprep.subr.mxu1 %v6661_v27 }
 0xa3e   : > { %2661 = vmatpush1.msra.mxu0 %v6667_v28  ;;  %2732 = vmatpush1.msra.mxu1 %v6673_v30 }
 0xa3f   : > { %2662 = vmatprep.subr.mxu0 %v6679_v32  ;;  %2733 = vmatprep.subr.mxu1 %v6685_v46 }
 0xa40   : > { %2663 = vmatpush1.msra.mxu0 %v6691_v29  ;;  %2734 = vmatpush1.msra.mxu1 %v6697_v59 }
 0xa41   : > { %2664 = vmatprep.subr.mxu0 %v6703_v50  ;;  %2735 = vmatprep.subr.mxu1 %v6159_v44  ;;  %v6724_v44 = vld [vmem:[%s7356_s2 + $0x80] sm:$0xff] }
 0xa42   : > { %2665 = vmatpush1.msra.mxu0 %v6710_v38  ;;  %2736 = vmatpush1.msra.mxu1 %v6166_v42  ;;  %7682 = vst [vmem:[#allocation16_spill] sm:$0xff] %v6724_v44  ;;  %v6731_v42 = vld [vmem:[%s7356_s2 + $0x68] sm:$0xff] }
 0xa43   : > { %2666 = vmatprep.subr.mxu0 %v6717_v34  ;;  %2737 = vmatprep.subr.mxu1 %v6173_v55  ;;  %7683 = vst [vmem:[#allocation20_spill] sm:$0xff] %v6731_v42  ;;  %v6738_v55 = vld [vmem:[%s7356_s2 + $0x60] sm:$0xff] }
 0xa44   : > { %2667 = vmatpush1.msra.mxu0 %v6724_v44  ;;  %2738 = vmatpush1.msra.mxu1 %v7662_v33  ;;  %7684 = vst [vmem:[#allocation22_spill] sm:$0xff] %v6738_v55  ;;  %v6745_v33 = vld [vmem:[%s7356_s2 + $0x48] sm:$0xff] }
 0xa45   : > { %2668 = vmatprep.subr.mxu0 %v6731_v42  ;;  %2739 = vmatprep.subr.mxu1 %v7664_v0  ;;  %7685 = vst [vmem:[#allocation29_spill] sm:$0xff] %v6745_v33  ;;  %v6752_v0 = vld [vmem:[%s7356_s2 + $0x40] sm:$0xff] }
 0xa46   : > { %2669 = vmatpush1.msra.mxu0 %v6738_v55  ;;  %2740 = vmatpush1.msra.mxu1 %v7666_v53  ;;  %7686 = vst [vmem:[#allocation17_spill] sm:$0xff] %v6752_v0  ;;  %v6759_v53 = vld [vmem:[%s7356_s2 + $0x28] sm:$0xff] }
 0xa47   : > { %2670 = vmatprep.subr.mxu0 %v6745_v33  ;;  %2741 = vmatprep.subr.mxu1 %v7668_v31  ;;  %7687 = vst [vmem:[#allocation21_spill] sm:$0xff] %v6759_v53  ;;  %v6766_v31 = vld [vmem:[%s7356_s2 + $0x20] sm:$0xff] }
 0xa48   : > { %2671 = vmatpush1.msra.mxu0 %v6752_v0  ;;  %2742 = vmatpush1.msra.mxu1 %v7670_v51  ;;  %7688 = vst [vmem:[#allocation24_spill] sm:$0xff] %v6766_v31  ;;  %v6780_v51 = vld [vmem:[%s7356_s2 + $0x1f8] sm:$0xff] }
 0xa49   : > { %2672 = vmatprep.subr.mxu0 %v6759_v53  ;;  %2743 = vmatprep.subr.mxu1 %v7672_v43  ;;  %7689 = vst [vmem:[#allocation30_spill] sm:$0xff] %v6780_v51  ;;  %v2463_v43 = vld [vmem:[#allocation2 + $0x40] sm:$0xff] }
 0xa4a   : > { %2673 = vmatpush1.msra.mxu0 %v6766_v31  ;;  %2744 = vmatpush1.msra.mxu1 %v7674_v58 }
 0xa4b   : > { %2674 = vmatprep.subr.mxu0 %v7675_v61  ;;  %2745 = vmatprep.subr.mxu1 %v7676_v63  ;;  %v2464_v61 = vld [vmem:[#allocation2 + $0x1f8] sm:$0xff] }
 0xa4c   : > { %2675 = vmatpush1.msra.mxu0 %v7677_v2  ;;  %2708 = vmatprep.mubr.f32.mxu0 %v7678_v10 }
 0xa4d   : > { %2746 = vmatpush1.msra.mxu1 %v7679_v11  ;;  %2779 = vmatprep.mubr.f32.mxu1 %v7678_v10 }
 0xa4e   : > { %2821 = vmatprep.subr.mxu0 %v6464_v12  ;;  %2892 = vmatprep.subr.mxu1 %v6780_v51  ;;  %v2465_v12 = vld [vmem:[#allocation2 + $0x20] sm:$0xff] }
 0xaed   : > { %v2533_v58 = vpop.f32.mrf.mxu0  ;;  %v2604_v11 = vpop.f32.mrf.mxu1 }
 0xaee   : > { %v2609_v63 = vadd.f32 %v2533_v58, %v2463_v43  ;;  %v2611_v53 = vadd.f32 %v2604_v11, %v2465_v12  ;;  %v6864_v11 = vld [vmem:[%s7356_s2 + $0x70] sm:$0xff] }
 0xaef   : > { %v2535_v2 = vpop.f32.mrf.mxu0  ;;  %v2606_v1 = vpop.f32.mrf.mxu1  ;;  %7692 = vst [vmem:[#allocation26_spill] sm:$0xff] %v6864_v11 }
 0xaf0   : > { %v3995_v60 = vmul.f32 -1.442695, %v2609_v63  ;;  %v2610_v48 = vadd.f32 %v2535_v2, %v2464_v61  ;;  %v2612_v7 = vadd.f32 %v2606_v1, %v2466_v54  ;;  %v7693_v54 = vld [vmem:[#allocation29_spill] sm:$0xff] }
 0xaf1   : > { %v6871_v1 = vld [vmem:[%s7356_s2 + $0x58] sm:$0xff] }
 0xaf2   : > { %4316 = vpow2.f32 %v3995_v60  ;;  %v3996_v57 = vmul.f32 -1.442695, %v2610_v48  ;;  %v3997_v10 = vmul.f32 -1.442695, %v2612_v7  ;;  %7694 = vst [vmem:[#allocation31_spill] sm:$0xff] %v6871_v1  ;;  %v7695_v7 = vld [vmem:[#allocation17_spill] sm:$0xff] }
 0xaf4   : > { %4318 = vpow2.f32 %v3996_v57 }
 0xaf5   : > { %4320 = vpow2.f32 %v3997_v10 }
 0xaff   : > { %v4317_v31 = vpop.eup %4316 }
 0xb00   : > { %v2616_v0 = vadd.f32 1.0, %v4317_v31 }
 0xb01   : > { %v4319_v51 = vpop.eup %4318 }
 0xb02   : > { %4322 = vrcp.f32 %v2616_v0  ;;  %v2622_v33 = vadd.f32 1.0, %v4319_v51  ;;  %v4321_v43 = vpop.eup %4320  ;;  %v6843_v0 = vld [vmem:[%s7356_s2 + $0x98] sm:$0xff] }
 0xb03   : > { %4324 = vtanh.f32 %v2611_v53  ;;  %v2629_v2 = vadd.f32 1.0, %v4321_v43  ;;  %v6850_v53 = vld [vmem:[%s7356_s2 + $0x90] sm:$0xff]  ;;  %v6857_v51 = vld [vmem:[%s7356_s2 + $0x78] sm:$0xff] }
 0xb04   : > { %4326 = vrcp.f32 %v2622_v33  ;;  %v6836_v33 = vld [vmem:[%s7356_s2 + $0xb0] sm:$0xff]  ;;  %7690 = vst [vmem:[#allocation18_spill] sm:$0xff] %v6850_v53  ;;  %7691 = vst [vmem:[#allocation23_spill] sm:$0xff] %v6857_v51 }
 0xb05   : > { %4328 = vrcp.f32 %v2629_v2  ;;  %v6878_v43 = vld [vmem:[%s7356_s2 + $0x50] sm:$0xff] }
 0xb06   : > { %7696 = vst [vmem:[#allocation19_spill] sm:$0xff] %v6878_v43  ;;  %v6892_v2 = vld [vmem:[%s7356_s2 + $0x30] sm:$0xff] }
 0xb07   : > { %7700 = vst [vmem:[#allocation32_spill] sm:$0xff] %v6892_v2 }
 0xb0f   : > { %v4323_v58 = vpop.eup %4322 }
 0xb10   : > { %v4325_v61 = vpop.eup %4324 }
 0xb11   : > { %v4327_v63 = vpop.eup %4326  ;;  %v2633_v60 = vmul.f32 %v4325_v61, %v4323_v58  ;;  %v7697_v58 = vld [vmem:[#allocation21_spill] sm:$0xff] }
 0xb12   : > { %v2632_v48 = vmul.f32 %v4327_v63, %v6469_v52  ;;  %v4329_v12 = vpop.eup %4328  ;;  %v6829_v52 = vld [vmem:[%s7356_s2 + $0xb8] sm:$0xff] }
 0xb13   : > { %v6885_v61 = vld [vmem:[%s7356_s2 + $0x38] sm:$0xff] }
 0xb14   : > { %v6784_v57 = vadd.f32 %v2633_v60, %v2632_v48  ;;  %7698 = vst [vmem:[#allocation25_spill] sm:$0xff] %v6885_v61  ;;  %v7699_v63 = vld [vmem:[#allocation24_spill] sm:$0xff]  ;;  %v6898_v60 = vld [vmem:[%s7356_s2 + $0x8] sm:$0xff] }
 0xb15   : > { %7701 = vst [vmem:[#allocation27_spill] sm:$0xff] %v6898_v60  ;;  %v6904_v48 = vld [vmem:[%s7356_s2 + $0x18] sm:$0xff] }
 0xb16   : > { %4330 = vtanh.f32 %v6784_v57  ;;  %7702 = vst [vmem:[#allocation33_spill] sm:$0xff] %v6904_v48 }
 0xb23   : > { %v4331_v31 = vpop.eup %4330 }
 0xb24   : > { %v2636_v10 = vmul.f32 %v4331_v31, %v4329_v12  ;;  %v6910_v12 = vld [vmem:[%s7356_s2] sm:$0xff]  ;;  %v7704_v31 = vmov 0.0  }
 0xb25   : > { %7703 = vst [vmem:[#allocation15_spill] sm:$0xff] %v6910_v12 }
 0xb26   : > { %2709 = vmatmul.mubr.f32.vlgmr.msra.gmra.mxu0 %v2636_v10  ;;  %2780 = vmatmul.mubr.f32.vlgmr.msra.gmra.mxu1 %v2636_v10  ;;  %v6917_v10 = vld [vmem:[%s7356_s2 + $0x10] sm:$0xff] }
 0xb27   : > { %2822 = vmatpush1.msra.mxu0 %v6475_v62  ;;  %2893 = vmatpush1.msra.mxu1 %v6481_v8  ;;  %7705 = vst [vmem:[#allocation28_spill] sm:$0xff] %v6917_v10 }
 0xb28   : > { %2823 = vmatprep.subr.mxu0 %v6487_v5  ;;  %2894 = vmatprep.subr.mxu1 %v6493_v36 }
 0xb29   : > { %2824 = vmatpush1.msra.mxu0 %v6499_v9  ;;  %2895 = vmatpush1.msra.mxu1 %v6505_v45 }
 0xb2a   : > { %2825 = vmatprep.subr.mxu0 %v6511_v4  ;;  %2896 = vmatprep.subr.mxu1 %v6517_v35 }
 0xb2b   : > { %2826 = vmatpush1.msra.mxu0 %v6523_v3  ;;  %2897 = vmatpush1.msra.mxu1 %v6529_v6 }
 0xb2c   : > { %2827 = vmatprep.subr.mxu0 %v6535_v40  ;;  %2898 = vmatprep.subr.mxu1 %v6541_v37 }
 0xb2d   : > { %2828 = vmatpush1.msra.mxu0 %v6547_v49  ;;  %2899 = vmatpush1.msra.mxu1 %v6553_v39 }
 0xb2e   : > { %2829 = vmatprep.subr.mxu0 %v6559_v47  ;;  %2900 = vmatprep.subr.mxu1 %v6565_v41 }
 0xb2f   : > { %2830 = vmatpush1.msra.mxu0 %v6571_v56  ;;  %2901 = vmatpush1.msra.mxu1 %v6577_v13 }
 0xb30   : > { %2831 = vmatprep.subr.mxu0 %v6583_v14  ;;  %2902 = vmatprep.subr.mxu1 %v6589_v15 }
 0xb31   : > { %2832 = vmatpush1.msra.mxu0 %v6595_v16  ;;  %2903 = vmatpush1.msra.mxu1 %v6601_v17 }
 0xb32   : > { %2833 = vmatprep.subr.mxu0 %v6607_v18  ;;  %2904 = vmatprep.subr.mxu1 %v6613_v19 }
 0xb33   : > { %2834 = vmatpush1.msra.mxu0 %v6619_v20  ;;  %2905 = vmatpush1.msra.mxu1 %v6625_v21 }
 0xb34   : > { %2835 = vmatprep.subr.mxu0 %v6631_v22  ;;  %2906 = vmatprep.subr.mxu1 %v6637_v23 }
 0xb35   : > { %2836 = vmatpush1.msra.mxu0 %v6643_v24  ;;  %2907 = vmatpush1.msra.mxu1 %v6649_v25 }
 0xb36   : > { %2837 = vmatprep.subr.mxu0 %v6655_v26  ;;  %2908 = vmatprep.subr.mxu1 %v6661_v27 }
 0xb37   : > { %2838 = vmatpush1.msra.mxu0 %v6667_v28  ;;  %2909 = vmatpush1.msra.mxu1 %v6673_v30 }
 0xb38   : > { %2839 = vmatprep.subr.mxu0 %v6679_v32  ;;  %2910 = vmatprep.subr.mxu1 %v6685_v46 }
 0xb39   : > { %2840 = vmatpush1.msra.mxu0 %v6691_v29  ;;  %2911 = vmatpush1.msra.mxu1 %v6697_v59 }
 0xb3a   : > { %2841 = vmatprep.subr.mxu0 %v6703_v50  ;;  %2912 = vmatprep.subr.mxu1 %v6829_v52 }
 0xb3b   : > { %2842 = vmatpush1.msra.mxu0 %v6710_v38  ;;  %2913 = vmatpush1.msra.mxu1 %v6836_v33 }
 0xb3c   : > { %2843 = vmatprep.subr.mxu0 %v6717_v34  ;;  %2914 = vmatprep.subr.mxu1 %v6843_v0 }
 0xb3d   : > { %2844 = vmatpush1.msra.mxu0 %v6724_v44  ;;  %2915 = vmatpush1.msra.mxu1 %v6850_v53 }
 0xb3e   : > { %2845 = vmatprep.subr.mxu0 %v6731_v42  ;;  %2916 = vmatprep.subr.mxu1 %v6857_v51  ;;  %v2642_v51 = vld [vmem:[#allocation2 + $0xe8] sm:$0xff] }
 0xb3f   : > { %2846 = vmatpush1.msra.mxu0 %v6738_v55  ;;  %2917 = vmatpush1.msra.mxu1 %v6864_v11  ;;  %v2643_v11 = vld [vmem:[#allocation2 + $0x78] sm:$0xff] }
 0xb40   : > { %2847 = vmatprep.subr.mxu0 %v7693_v54  ;;  %2918 = vmatprep.subr.mxu1 %v6871_v1 }
 0xb41   : > { %2848 = vmatpush1.msra.mxu0 %v7695_v7  ;;  %2919 = vmatpush1.msra.mxu1 %v6878_v43 }
 0xb42   : > { %2849 = vmatprep.subr.mxu0 %v7697_v58  ;;  %2920 = vmatprep.subr.mxu1 %v6885_v61  ;;  %v2641_v61 = vld [vmem:[#allocation2 + $0x1f0] sm:$0xff] }
 0xb43   : > { %2850 = vmatpush1.msra.mxu0 %v7699_v63  ;;  %2921 = vmatpush1.msra.mxu1 %v6892_v2  ;;  %v2640_v2 = vld [vmem:[#allocation2 + $0x1a0] sm:$0xff] }
 0xb44   : > { %2851 = vmatprep.subr.mxu0 %v6898_v60  ;;  %2922 = vmatprep.subr.mxu1 %v6904_v48  ;;  %v7706_v60 = vld [vmem:[#allocation14_spill] sm:$0xff] }
 0xb45   : > { %2852 = vmatpush1.msra.mxu0 %v6910_v12  ;;  %2885 = vmatprep.mubr.f32.mxu0 %v7704_v31  ;;  %v7707_v48 = vld [vmem:[#allocation30_spill] sm:$0xff] }
 0xb46   : > { %2923 = vmatpush1.msra.mxu1 %v6917_v10  ;;  %2956 = vmatprep.mubr.f32.mxu1 %v7704_v31 }
 0xb47   : > { %2998 = vmatprep.subr.mxu0 %v7706_v60  ;;  %3069 = vmatprep.subr.mxu1 %v7707_v48 }
 0xbe6   : > { %v2710_v63 = vpop.f32.mrf.mxu0  ;;  %v2781_v1 = vpop.f32.mrf.mxu1 }
 0xbe7   : > { %v2786_v58 = vadd.f32 %v2710_v63, %v2640_v2  ;;  %v2788_v60 = vadd.f32 %v2781_v1, %v2642_v51  ;;  %v7711_v1 = vld [vmem:[#allocation23_spill] sm:$0xff] }
 0xbe8   : > { %v2712_v12 = vpop.f32.mrf.mxu0  ;;  %v2783_v55 = vpop.f32.mrf.mxu1 }
 0xbe9   : > { %v3998_v43 = vmul.f32 -1.442695, %v2786_v58  ;;  %v2787_v7 = vadd.f32 %v2712_v12, %v2641_v61  ;;  %v2789_v10 = vadd.f32 %v2783_v55, %v2643_v11  ;;  %v7714_v12 = vld [vmem:[#allocation29_spill] sm:$0xff] }
 0xbeb   : > { %4332 = vpow2.f32 %v3998_v43  ;;  %v3999_v54 = vmul.f32 -1.442695, %v2787_v7  ;;  %v4000_v31 = vmul.f32 -1.442695, %v2789_v10  ;;  %v7716_v10 = vld [vmem:[#allocation17_spill] sm:$0xff] }
 0xbed   : > { %4334 = vpow2.f32 %v3999_v54 }
 0xbee   : > { %4336 = vpow2.f32 %v4000_v31  ;;  %v7715_v31 = vld [vmem:[#allocation31_spill] sm:$0xff] }
 0xbf8   : > { %v4333_v42 = vpop.eup %4332 }
 0xbf9   : > { %v2793_v53 = vadd.f32 1.0, %v4333_v42 }
 0xbfa   : > { %v4335_v48 = vpop.eup %4334 }
 0xbfb   : > { %4338 = vrcp.f32 %v2793_v53  ;;  %v2799_v44 = vadd.f32 1.0, %v4335_v48  ;;  %v4337_v58 = vpop.eup %4336  ;;  %v7710_v53 = vld [vmem:[#allocation20_spill] sm:$0xff]  ;;  %v7713_v48 = vld [vmem:[#allocation26_spill] sm:$0xff] }
 0xbfc   : > { %4340 = vtanh.f32 %v2788_v60  ;;  %v2806_v7 = vadd.f32 1.0, %v4337_v58  ;;  %v7712_v60 = vld [vmem:[#allocation22_spill] sm:$0xff]  ;;  %v7717_v58 = vld [vmem:[#allocation19_spill] sm:$0xff] }
 0xbfd   : > { %4342 = vrcp.f32 %v2799_v44  ;;  %v7708_v44 = vld [vmem:[#allocation16_spill] sm:$0xff] }
 0xbfe   : > { %4344 = vrcp.f32 %v2806_v7  ;;  %v7721_v7 = vld [vmem:[#allocation32_spill] sm:$0xff] }
 0xc08   : > { %v4339_v61 = vpop.eup %4338 }
 0xc09   : > { %v4341_v43 = vpop.eup %4340 }
 0xc0a   : > { %v4343_v63 = vpop.eup %4342  ;;  %v2810_v54 = vmul.f32 %v4341_v43, %v4339_v61  ;;  %v7718_v61 = vld [vmem:[#allocation21_spill] sm:$0xff] }
 0xc0b   : > { %v2809_v2 = vmul.f32 %v4343_v63, %v6784_v57  ;;  %v4345_v42 = vpop.eup %4344  ;;  %v7709_v57 = vld [vmem:[#allocation18_spill] sm:$0xff]  ;;  %v7719_v43 = vld [vmem:[#allocation25_spill] sm:$0xff]  ;;  %v7720_v63 = vld [vmem:[#allocation24_spill] sm:$0xff] }
 0xc0d   : > { %v6924_v55 = vadd.f32 %v2810_v54, %v2809_v2  ;;  %v7722_v54 = vld [vmem:[#allocation27_spill] sm:$0xff]  ;;  %v7723_v2 = vld [vmem:[#allocation33_spill] sm:$0xff] }
 0xc0f   : > { %4346 = vtanh.f32 %v6924_v55 }
 0xc1c   : > { %v4347_v51 = vpop.eup %4346 }
 0xc1d   : > { %v2813_v11 = vmul.f32 %v4347_v51, %v4345_v42  ;;  %v7724_v42 = vld [vmem:[#allocation15_spill] sm:$0xff]  ;;  %v7725_v51 = vmov 0.0  }
 0xc1f   : > { %2886 = vmatmul.mubr.f32.vlgmr.msra.gmra.mxu0 %v2813_v11  ;;  %2957 = vmatmul.mubr.f32.vlgmr.msra.gmra.mxu1 %v2813_v11  ;;  %v7726_v11 = vld [vmem:[#allocation28_spill] sm:$0xff] }
 0xc20   : > { %2999 = vmatpush1.msra.mxu0 %v6475_v62  ;;  %3070 = vmatpush1.msra.mxu1 %v6481_v8 }
 0xc21   : > { %3000 = vmatprep.subr.mxu0 %v6487_v5  ;;  %3071 = vmatprep.subr.mxu1 %v6493_v36 }
 0xc22   : > { %3001 = vmatpush1.msra.mxu0 %v6499_v9  ;;  %3072 = vmatpush1.msra.mxu1 %v6505_v45 }
 0xc23   : > { %3002 = vmatprep.subr.mxu0 %v6511_v4  ;;  %3073 = vmatprep.subr.mxu1 %v6517_v35 }
 0xc24   : > { %3003 = vmatpush1.msra.mxu0 %v6523_v3  ;;  %3074 = vmatpush1.msra.mxu1 %v6529_v6 }
 0xc25   : > { %3004 = vmatprep.subr.mxu0 %v6535_v40  ;;  %3075 = vmatprep.subr.mxu1 %v6541_v37 }
 0xc26   : > { %3005 = vmatpush1.msra.mxu0 %v6547_v49  ;;  %3076 = vmatpush1.msra.mxu1 %v6553_v39 }
 0xc27   : > { %3006 = vmatprep.subr.mxu0 %v6559_v47  ;;  %3077 = vmatprep.subr.mxu1 %v6565_v41 }
 0xc28   : > { %3007 = vmatpush1.msra.mxu0 %v6571_v56  ;;  %3078 = vmatpush1.msra.mxu1 %v6577_v13 }
 0xc29   : > { %3008 = vmatprep.subr.mxu0 %v6583_v14  ;;  %3079 = vmatprep.subr.mxu1 %v6589_v15 }
 0xc2a   : > { %3009 = vmatpush1.msra.mxu0 %v6595_v16  ;;  %3080 = vmatpush1.msra.mxu1 %v6601_v17 }
 0xc2b   : > { %3010 = vmatprep.subr.mxu0 %v6607_v18  ;;  %3081 = vmatprep.subr.mxu1 %v6613_v19 }
 0xc2c   : > { %3011 = vmatpush1.msra.mxu0 %v6619_v20  ;;  %3082 = vmatpush1.msra.mxu1 %v6625_v21 }
 0xc2d   : > { %3012 = vmatprep.subr.mxu0 %v6631_v22  ;;  %3083 = vmatprep.subr.mxu1 %v6637_v23 }
 0xc2e   : > { %3013 = vmatpush1.msra.mxu0 %v6643_v24  ;;  %3084 = vmatpush1.msra.mxu1 %v6649_v25 }
 0xc2f   : > { %3014 = vmatprep.subr.mxu0 %v6655_v26  ;;  %3085 = vmatprep.subr.mxu1 %v6661_v27 }
 0xc30   : > { %3015 = vmatpush1.msra.mxu0 %v6667_v28  ;;  %3086 = vmatpush1.msra.mxu1 %v6673_v30 }
 0xc31   : > { %3016 = vmatprep.subr.mxu0 %v6679_v32  ;;  %3087 = vmatprep.subr.mxu1 %v6685_v46 }
 0xc32   : > { %3017 = vmatpush1.msra.mxu0 %v6691_v29  ;;  %3088 = vmatpush1.msra.mxu1 %v6697_v59 }
 0xc33   : > { %3018 = vmatprep.subr.mxu0 %v6703_v50  ;;  %3089 = vmatprep.subr.mxu1 %v6829_v52 }
 0xc34   : > { %3019 = vmatpush1.msra.mxu0 %v6710_v38  ;;  %3090 = vmatpush1.msra.mxu1 %v6836_v33 }
 0xc35   : > { %3020 = vmatprep.subr.mxu0 %v6717_v34  ;;  %3091 = vmatprep.subr.mxu1 %v6843_v0 }
 0xc36   : > { %3021 = vmatpush1.msra.mxu0 %v7708_v44  ;;  %3092 = vmatpush1.msra.mxu1 %v7709_v57 }
 0xc37   : > { %3022 = vmatprep.subr.mxu0 %v7710_v53  ;;  %3093 = vmatprep.subr.mxu1 %v7711_v1  ;;  %v2819_v1 = vld [vmem:[#allocation2 + $0x1d8] sm:$0xff] }
 0xc38   : > { %3023 = vmatpush1.msra.mxu0 %v7712_v60  ;;  %3094 = vmatpush1.msra.mxu1 %v7713_v48  ;;  %v2820_v48 = vld [vmem:[#allocation2 + $0xd0] sm:$0xff] }
 0xc39   : > { %3024 = vmatprep.subr.mxu0 %v7714_v12  ;;  %3095 = vmatprep.subr.mxu1 %v7715_v31 }
 0xc3a   : > { %3025 = vmatpush1.msra.mxu0 %v7716_v10  ;;  %3096 = vmatpush1.msra.mxu1 %v7717_v58  ;;  %v7727_v58 = vld [vmem:[#allocation14_spill] sm:$0xff]  ;;  %v2818_v10 = vld [vmem:[#allocation2 + $0x90] sm:$0xff] }
 0xc3b   : > { %3026 = vmatprep.subr.mxu0 %v7718_v61  ;;  %3097 = vmatprep.subr.mxu1 %v7719_v43  ;;  %v7728_v61 = vld [vmem:[#allocation30_spill] sm:$0xff]  ;;  %v2817_v43 = vld [vmem:[#allocation2 + $0x70] sm:$0xff] }
 0xc3c   : > { %3027 = vmatpush1.msra.mxu0 %v7720_v63  ;;  %3098 = vmatpush1.msra.mxu1 %v7721_v7 }
 0xc3d   : > { %3028 = vmatprep.subr.mxu0 %v7722_v54  ;;  %3099 = vmatprep.subr.mxu1 %v7723_v2 }
 0xc3e   : > { %3029 = vmatpush1.msra.mxu0 %v7724_v42  ;;  %3062 = vmatprep.mubr.f32.mxu0 %v7725_v51 }
 0xc3f   : > { %3100 = vmatpush1.msra.mxu1 %v7726_v11  ;;  %3133 = vmatprep.mubr.f32.mxu1 %v7725_v51 }
 0xc40   : > { %3175 = vmatprep.subr.mxu0 %v7727_v58  ;;  %3246 = vmatprep.subr.mxu1 %v7728_v61 }
 0xcdf   : > { %v2887_v63 = vpop.f32.mrf.mxu0  ;;  %v2958_v2 = vpop.f32.mrf.mxu1 }
 0xce0   : > { %v2963_v7 = vadd.f32 %v2887_v63, %v2817_v43  ;;  %v2965_v58 = vadd.f32 %v2958_v2, %v2819_v1  ;;  %v7734_v2 = vld [vmem:[#allocation26_spill] sm:$0xff] }
 0xce1   : > { %v2889_v31 = vpop.f32.mrf.mxu0  ;;  %v2960_v60 = vpop.f32.mrf.mxu1 }
 0xce2   : > { %v4001_v54 = vmul.f32 -1.442695, %v2963_v7  ;;  %v2964_v12 = vadd.f32 %v2889_v31, %v2818_v10  ;;  %v2966_v11 = vadd.f32 %v2960_v60, %v2820_v48 }
 0xce4   : > { %4348 = vpow2.f32 %v4001_v54  ;;  %v4002_v42 = vmul.f32 -1.442695, %v2964_v12  ;;  %v4003_v51 = vmul.f32 -1.442695, %v2966_v11  ;;  %v7737_v11 = vld [vmem:[#allocation17_spill] sm:$0xff] }
 0xce6   : > { %4350 = vpow2.f32 %v4002_v42  ;;  %v7735_v42 = vld [vmem:[#allocation29_spill] sm:$0xff] }
 0xce7   : > { %4352 = vpow2.f32 %v4003_v51  ;;  %v7736_v51 = vld [vmem:[#allocation31_spill] sm:$0xff] }
 0xcf1   : > { %v4349_v53 = vpop.eup %4348 }
 0xcf2   : > { %v2970_v57 = vadd.f32 1.0, %v4349_v53 }
 0xcf3   : > { %v4351_v61 = vpop.eup %4350 }
 0xcf4   : > { %4354 = vrcp.f32 %v2970_v57  ;;  %v2976_v44 = vadd.f32 1.0, %v4351_v61  ;;  %v4353_v43 = vpop.eup %4352  ;;  %v7731_v57 = vld [vmem:[#allocation20_spill] sm:$0xff]  ;;  %v7733_v61 = vld [vmem:[#allocation22_spill] sm:$0xff] }
 0xcf5   : > { %4356 = vtanh.f32 %v2965_v58  ;;  %v2983_v12 = vadd.f32 1.0, %v4353_v43  ;;  %v7732_v58 = vld [vmem:[#allocation23_spill] sm:$0xff] }
 0xcf6   : > { %4358 = vrcp.f32 %v2976_v44  ;;  %v7730_v44 = vld [vmem:[#allocation18_spill] sm:$0xff]  ;;  %v7738_v43 = vld [vmem:[#allocation19_spill] sm:$0xff] }
 0xcf7   : > { %4360 = vrcp.f32 %v2983_v12  ;;  %v7742_v12 = vld [vmem:[#allocation32_spill] sm:$0xff] }
 0xd01   : > { %v4355_v31 = vpop.eup %4354 }
 0xd02   : > { %v4357_v10 = vpop.eup %4356 }
 0xd03   : > { %v4359_v63 = vpop.eup %4358  ;;  %v2987_v7 = vmul.f32 %v4357_v10, %v4355_v31  ;;  %v7739_v31 = vld [vmem:[#allocation21_spill] sm:$0xff] }
 0xd04   : > { %v2986_v54 = vmul.f32 %v4359_v63, %v6924_v55  ;;  %v4361_v53 = vpop.eup %4360  ;;  %v7729_v55 = vld [vmem:[#allocation16_spill] sm:$0xff]  ;;  %v7740_v10 = vld [vmem:[#allocation25_spill] sm:$0xff] }
 0xd05   : > { %v7741_v63 = vld [vmem:[#allocation24_spill] sm:$0xff] }
 0xd06   : > { %v6994_v60 = vadd.f32 %v2987_v7, %v2986_v54  ;;  %v7743_v7 = vld [vmem:[#allocation27_spill] sm:$0xff]  ;;  %v7744_v54 = vld [vmem:[#allocation33_spill] sm:$0xff] }
 0xd08   : > { %4362 = vtanh.f32 %v6994_v60 }
 0xd15   : > { %v4363_v1 = vpop.eup %4362 }
 0xd16   : > { %v2990_v48 = vmul.f32 %v4363_v1, %v4361_v53  ;;  %v7745_v53 = vld [vmem:[#allocation15_spill] sm:$0xff]  ;;  %v7746_v1 = vmov 0.0  }
 0xd18   : > { %3063 = vmatmul.mubr.f32.vlgmr.msra.gmra.mxu0 %v2990_v48  ;;  %3134 = vmatmul.mubr.f32.vlgmr.msra.gmra.mxu1 %v2990_v48  ;;  %v7747_v48 = vld [vmem:[#allocation28_spill] sm:$0xff] }
 0xd19   : > { %3176 = vmatpush1.msra.mxu0 %v6475_v62  ;;  %3247 = vmatpush1.msra.mxu1 %v6481_v8 }
 0xd1a   : > { %3177 = vmatprep.subr.mxu0 %v6487_v5  ;;  %3248 = vmatprep.subr.mxu1 %v6493_v36 }
 0xd1b   : > { %3178 = vmatpush1.msra.mxu0 %v6499_v9  ;;  %3249 = vmatpush1.msra.mxu1 %v6505_v45 }
 0xd1c   : > { %3179 = vmatprep.subr.mxu0 %v6511_v4  ;;  %3250 = vmatprep.subr.mxu1 %v6517_v35 }
 0xd1d   : > { %3180 = vmatpush1.msra.mxu0 %v6523_v3  ;;  %3251 = vmatpush1.msra.mxu1 %v6529_v6 }
 0xd1e   : > { %3181 = vmatprep.subr.mxu0 %v6535_v40  ;;  %3252 = vmatprep.subr.mxu1 %v6541_v37 }
 0xd1f   : > { %3182 = vmatpush1.msra.mxu0 %v6547_v49  ;;  %3253 = vmatpush1.msra.mxu1 %v6553_v39 }
 0xd20   : > { %3183 = vmatprep.subr.mxu0 %v6559_v47  ;;  %3254 = vmatprep.subr.mxu1 %v6565_v41 }
 0xd21   : > { %3184 = vmatpush1.msra.mxu0 %v6571_v56  ;;  %3255 = vmatpush1.msra.mxu1 %v6577_v13 }
 0xd22   : > { %3185 = vmatprep.subr.mxu0 %v6583_v14  ;;  %3256 = vmatprep.subr.mxu1 %v6589_v15 }
 0xd23   : > { %3186 = vmatpush1.msra.mxu0 %v6595_v16  ;;  %3257 = vmatpush1.msra.mxu1 %v6601_v17 }
 0xd24   : > { %3187 = vmatprep.subr.mxu0 %v6607_v18  ;;  %3258 = vmatprep.subr.mxu1 %v6613_v19 }
 0xd25   : > { %3188 = vmatpush1.msra.mxu0 %v6619_v20  ;;  %3259 = vmatpush1.msra.mxu1 %v6625_v21 }
 0xd26   : > { %3189 = vmatprep.subr.mxu0 %v6631_v22  ;;  %3260 = vmatprep.subr.mxu1 %v6637_v23 }
 0xd27   : > { %3190 = vmatpush1.msra.mxu0 %v6643_v24  ;;  %3261 = vmatpush1.msra.mxu1 %v6649_v25 }
 0xd28   : > { %3191 = vmatprep.subr.mxu0 %v6655_v26  ;;  %3262 = vmatprep.subr.mxu1 %v6661_v27 }
 0xd29   : > { %3192 = vmatpush1.msra.mxu0 %v6667_v28  ;;  %3263 = vmatpush1.msra.mxu1 %v6673_v30 }
 0xd2a   : > { %3193 = vmatprep.subr.mxu0 %v6679_v32  ;;  %3264 = vmatprep.subr.mxu1 %v6685_v46 }
 0xd2b   : > { %3194 = vmatpush1.msra.mxu0 %v6691_v29  ;;  %3265 = vmatpush1.msra.mxu1 %v6697_v59 }
 0xd2c   : > { %3195 = vmatprep.subr.mxu0 %v6703_v50  ;;  %3266 = vmatprep.subr.mxu1 %v6829_v52 }
 0xd2d   : > { %3196 = vmatpush1.msra.mxu0 %v6710_v38  ;;  %3267 = vmatpush1.msra.mxu1 %v6836_v33 }
 0xd2e   : > { %3197 = vmatprep.subr.mxu0 %v6717_v34  ;;  %3268 = vmatprep.subr.mxu1 %v6843_v0 }
 0xd2f   : > { %3198 = vmatpush1.msra.mxu0 %v7729_v55  ;;  %3269 = vmatpush1.msra.mxu1 %v7730_v44 }
 0xd30   : > { %3199 = vmatprep.subr.mxu0 %v7731_v57  ;;  %3270 = vmatprep.subr.mxu1 %v7732_v58  ;;  %v2996_v58 = vld [vmem:[#allocation2 + $0xa8] sm:$0xff] }
 0xd31   : > { %3200 = vmatpush1.msra.mxu0 %v7733_v61  ;;  %3271 = vmatpush1.msra.mxu1 %v7734_v2  ;;  %v2997_v2 = vld [vmem:[#allocation2 + $0x1c8] sm:$0xff] }
 0xd32   : > { %3201 = vmatprep.subr.mxu0 %v7735_v42  ;;  %3272 = vmatprep.subr.mxu1 %v7736_v51 }
 0xd33   : > { %3202 = vmatpush1.msra.mxu0 %v7737_v11  ;;  %3273 = vmatpush1.msra.mxu1 %v7738_v43  ;;  %v7748_v43 = vld [vmem:[#allocation14_spill] sm:$0xff] }
 0xd34   : > { %3203 = vmatprep.subr.mxu0 %v7739_v31  ;;  %3274 = vmatprep.subr.mxu1 %v7740_v10  ;;  %v7749_v31 = vld [vmem:[#allocation30_spill] sm:$0xff]  ;;  %v2994_v10 = vld [vmem:[#allocation2 + $0xb8] sm:$0xff] }
 0xd35   : > { %3204 = vmatpush1.msra.mxu0 %v7741_v63  ;;  %3275 = vmatpush1.msra.mxu1 %v7742_v12  ;;  %v2995_v11 = vld [vmem:[#allocation2 + $0x88] sm:$0xff] }
 0xd36   : > { %3205 = vmatprep.subr.mxu0 %v7743_v7  ;;  %3276 = vmatprep.subr.mxu1 %v7744_v54 }
 0xd37   : > { %3206 = vmatpush1.msra.mxu0 %v7745_v53  ;;  %3239 = vmatprep.mubr.f32.mxu0 %v7746_v1 }
 0xd38   : > { %3277 = vmatpush1.msra.mxu1 %v7747_v48  ;;  %3310 = vmatprep.mubr.f32.mxu1 %v7746_v1 }
 0xd39   : > { %3352 = vmatprep.subr.mxu0 %v7748_v43  ;;  %3423 = vmatprep.subr.mxu1 %v7749_v31 }
 0xdd8   : > { %v3064_v63 = vpop.f32.mrf.mxu0  ;;  %v3135_v54 = vpop.f32.mrf.mxu1 }
 0xdd9   : > { %v3140_v12 = vadd.f32 %v3064_v63, %v2994_v10  ;;  %v3142_v43 = vadd.f32 %v3135_v54, %v2996_v58 }
 0xdda   : > { %v3066_v51 = vpop.f32.mrf.mxu0  ;;  %v3137_v61 = vpop.f32.mrf.mxu1 }
 0xddb   : > { %v4004_v7 = vmul.f32 -1.442695, %v3140_v12  ;;  %v3141_v42 = vadd.f32 %v3066_v51, %v2995_v11  ;;  %v3143_v48 = vadd.f32 %v3137_v61, %v2997_v2 }
 0xddd   : > { %4364 = vpow2.f32 %v4004_v7  ;;  %v4005_v53 = vmul.f32 -1.442695, %v3141_v42  ;;  %v4006_v1 = vmul.f32 -1.442695, %v3143_v48 }
 0xddf   : > { %4366 = vpow2.f32 %v4005_v53 }
 0xde0   : > { %4368 = vpow2.f32 %v4006_v1 }
 0xdea   : > { %v4365_v57 = vpop.eup %4364 }
 0xdeb   : > { %v3147_v44 = vadd.f32 1.0, %v4365_v57 }
 0xdec   : > { %v4367_v31 = vpop.eup %4366 }
 0xded   : > { %4370 = vrcp.f32 %v3147_v44  ;;  %v3153_v55 = vadd.f32 1.0, %v4367_v31  ;;  %v4369_v10 = vpop.eup %4368 }
 0xdee   : > { %4372 = vtanh.f32 %v3142_v43  ;;  %v3160_v42 = vadd.f32 1.0, %v4369_v10 }
 0xdef   : > { %4374 = vrcp.f32 %v3153_v55 }
 0xdf0   : > { %4376 = vrcp.f32 %v3160_v42  ;;  %v4560_v42 = vld [vmem:[%s7356_s2 + $0x1d8] sm:$0xff] }
 0xdfa   : > { %v4371_v51 = vpop.eup %4370 }
 0xdfb   : > { %v4373_v11 = vpop.eup %4372 }
 0xdfc   : > { %v4375_v63 = vpop.eup %4374  ;;  %v3164_v12 = vmul.f32 %v4373_v11, %v4371_v51  ;;  %v4557_v51 = vld [vmem:[%s7356_s2 + $0x1e0] sm:$0xff]  ;;  %v4558_v11 = vld [vmem:[%s7356_s2 + $0x1f0] sm:$0xff] }
 0xdfd   : > { %v3163_v7 = vmul.f32 %v4375_v63, %v6994_v60  ;;  %v4377_v57 = vpop.eup %4376  ;;  %v4559_v63 = vld [vmem:[%s7356_s2 + $0x1c8] sm:$0xff] }
 0xdff   : > { %v7064_v61 = vadd.f32 %v3164_v12, %v3163_v7  ;;  %v4561_v12 = vld [vmem:[%s7356_s2 + $0x1c0] sm:$0xff]  ;;  %v4562_v7 = vld [vmem:[%s7356_s2 + $0x1d0] sm:$0xff] }
 0xe01   : > { %4378 = vtanh.f32 %v7064_v61 }
 0xe0e   : > { %v4379_v58 = vpop.eup %4378 }
 0xe0f   : > { %v3167_v2 = vmul.f32 %v4379_v58, %v4377_v57  ;;  %v4564_v57 = vld [vmem:[%s7356_s2 + $0x1b8] sm:$0xff]  ;;  %v4565_v58 = vld [vmem:[%s7356_s2 + $0x1a0] sm:$0xff] }
 0xe11   : > { %3240 = vmatmul.mubr.f32.vlgmr.msra.gmra.mxu0 %v3167_v2  ;;  %3311 = vmatmul.mubr.f32.vlgmr.msra.gmra.mxu1 %v3167_v2  ;;  %v4566_v2 = vld [vmem:[%s7356_s2 + $0x1b0] sm:$0xff] }
 0xe12   : > { %3353 = vmatpush1.msra.mxu0 %v6475_v62  ;;  %3424 = vmatpush1.msra.mxu1 %v6481_v8  ;;  %v7750_v62 = vld [vmem:[#allocation16_spill] sm:$0xff]  ;;  %v7751_v8 = vld [vmem:[#allocation18_spill] sm:$0xff] }
 0xe13   : > { %3354 = vmatprep.subr.mxu0 %v6487_v5  ;;  %3425 = vmatprep.subr.mxu1 %v6493_v36  ;;  %v7752_v5 = vld [vmem:[#allocation20_spill] sm:$0xff]  ;;  %v7753_v36 = vld [vmem:[#allocation23_spill] sm:$0xff] }
 0xe14   : > { %3355 = vmatpush1.msra.mxu0 %v6499_v9  ;;  %3426 = vmatpush1.msra.mxu1 %v6505_v45  ;;  %v7754_v9 = vld [vmem:[#allocation22_spill] sm:$0xff] }
 0xe15   : > { %3356 = vmatprep.subr.mxu0 %v6511_v4  ;;  %3427 = vmatprep.subr.mxu1 %v6517_v35  ;;  %v7755_v45 = vld [vmem:[#allocation26_spill] sm:$0xff]  ;;  %v7756_v4 = vld [vmem:[#allocation29_spill] sm:$0xff]  ;;  %v7757_v35 = vld [vmem:[#allocation31_spill] sm:$0xff] }
 0xe16   : > { %3357 = vmatpush1.msra.mxu0 %v6523_v3  ;;  %3428 = vmatpush1.msra.mxu1 %v6529_v6  ;;  %v7758_v3 = vld [vmem:[#allocation17_spill] sm:$0xff]  ;;  %v7759_v6 = vld [vmem:[#allocation19_spill] sm:$0xff] }
 0xe17   : > { %3358 = vmatprep.subr.mxu0 %v6535_v40  ;;  %3429 = vmatprep.subr.mxu1 %v6541_v37  ;;  %v7760_v40 = vld [vmem:[#allocation21_spill] sm:$0xff] }
 0xe18   : > { %3359 = vmatpush1.msra.mxu0 %v6547_v49  ;;  %3430 = vmatpush1.msra.mxu1 %v6553_v39  ;;  %v7761_v37 = vld [vmem:[#allocation25_spill] sm:$0xff]  ;;  %v7762_v49 = vld [vmem:[#allocation24_spill] sm:$0xff] }
 0xe19   : > { %3360 = vmatprep.subr.mxu0 %v6559_v47  ;;  %3431 = vmatprep.subr.mxu1 %v6565_v41  ;;  %v7763_v39 = vld [vmem:[#allocation32_spill] sm:$0xff]  ;;  %v7764_v47 = vld [vmem:[#allocation27_spill] sm:$0xff]  ;;  %v7765_v41 = vld [vmem:[#allocation33_spill] sm:$0xff] }
 0xe1a   : > { %3361 = vmatpush1.msra.mxu0 %v6571_v56  ;;  %3432 = vmatpush1.msra.mxu1 %v6577_v13  ;;  %v7766_v56 = vld [vmem:[#allocation15_spill] sm:$0xff]  ;;  %v7767_v13 = vmov 0.0  }
 0xe1b   : > { %3362 = vmatprep.subr.mxu0 %v6583_v14  ;;  %3433 = vmatprep.subr.mxu1 %v6589_v15  ;;  %v7768_v14 = vld [vmem:[#allocation28_spill] sm:$0xff]  ;;  %v4556_v15 = vld [vmem:[%s7356_s2 + $0x1e8] sm:$0xff] }
 0xe1c   : > { %3363 = vmatpush1.msra.mxu0 %v6595_v16  ;;  %3434 = vmatpush1.msra.mxu1 %v6601_v17  ;;  %v7769_v16 = vld [vmem:[#allocation30_spill] sm:$0xff]  ;;  %v3171_v17 = vld [vmem:[#allocation2 + $0x170] sm:$0xff] }
 0xe1d   : > { %3364 = vmatprep.subr.mxu0 %v6607_v18  ;;  %3435 = vmatprep.subr.mxu1 %v6613_v19  ;;  %v3172_v19 = vld [vmem:[#allocation2 + $0x178] sm:$0xff] }
 0xe1e   : > { %3365 = vmatpush1.msra.mxu0 %v6619_v20  ;;  %3436 = vmatpush1.msra.mxu1 %v6625_v21 }
 0xe1f   : > { %3366 = vmatprep.subr.mxu0 %v6631_v22  ;;  %3437 = vmatprep.subr.mxu1 %v6637_v23 }
 0xe20   : > { %3367 = vmatpush1.msra.mxu0 %v6643_v24  ;;  %3438 = vmatpush1.msra.mxu1 %v6649_v25 }
 0xe21   : > { %3368 = vmatprep.subr.mxu0 %v6655_v26  ;;  %3439 = vmatprep.subr.mxu1 %v6661_v27  ;;  %v3174_v26 = vld [vmem:[#allocation2 + $0x190] sm:$0xff] }
 0xe22   : > { %3369 = vmatpush1.msra.mxu0 %v6667_v28  ;;  %3440 = vmatpush1.msra.mxu1 %v6673_v30  ;;  %v3173_v30 = vld [vmem:[#allocation2 + $0x68] sm:$0xff] }
 0xe23   : > { %3370 = vmatprep.subr.mxu0 %v6679_v32  ;;  %3441 = vmatprep.subr.mxu1 %v6685_v46 }
 0xe24   : > { %3371 = vmatpush1.msra.mxu0 %v6691_v29  ;;  %3442 = vmatpush1.msra.mxu1 %v6697_v59 }
 0xe25   : > { %3372 = vmatprep.subr.mxu0 %v6703_v50  ;;  %3443 = vmatprep.subr.mxu1 %v6829_v52 }
 0xe26   : > { %3373 = vmatpush1.msra.mxu0 %v6710_v38  ;;  %3444 = vmatpush1.msra.mxu1 %v6836_v33 }
 0xe27   : > { %3374 = vmatprep.subr.mxu0 %v6717_v34  ;;  %3445 = vmatprep.subr.mxu1 %v6843_v0 }
 0xe28   : > { %3375 = vmatpush1.msra.mxu0 %v7750_v62  ;;  %3446 = vmatpush1.msra.mxu1 %v7751_v8  ;;  %v4567_v62 = vld [vmem:[%s7356_s2 + $0x188] sm:$0xff] }
 0xe29   : > { %3376 = vmatprep.subr.mxu0 %v7752_v5  ;;  %3447 = vmatprep.subr.mxu1 %v7753_v36  ;;  %v4568_v5 = vld [vmem:[%s7356_s2 + $0x198] sm:$0xff] }
 0xe2a   : > { %3377 = vmatpush1.msra.mxu0 %v7754_v9  ;;  %3448 = vmatpush1.msra.mxu1 %v7755_v45  ;;  %v4569_v9 = vld [vmem:[%s7356_s2 + $0x180] sm:$0xff] }
 0xe2b   : > { %3378 = vmatprep.subr.mxu0 %v7756_v4  ;;  %3449 = vmatprep.subr.mxu1 %v7757_v35  ;;  %v4570_v4 = vld [vmem:[%s7356_s2 + $0x190] sm:$0xff] }
 0xe2c   : > { %3379 = vmatpush1.msra.mxu0 %v7758_v3  ;;  %3450 = vmatpush1.msra.mxu1 %v7759_v6  ;;  %v4571_v3 = vld [vmem:[%s7356_s2 + $0x168] sm:$0xff] }
 0xe2d   : > { %3380 = vmatprep.subr.mxu0 %v7760_v40  ;;  %3451 = vmatprep.subr.mxu1 %v7761_v37  ;;  %v4572_v40 = vld [vmem:[%s7356_s2 + $0x178] sm:$0xff] }
 0xe2e   : > { %3381 = vmatpush1.msra.mxu0 %v7762_v49  ;;  %3452 = vmatpush1.msra.mxu1 %v7763_v39  ;;  %v4573_v49 = vld [vmem:[%s7356_s2 + $0x160] sm:$0xff] }
 0xe2f   : > { %3382 = vmatprep.subr.mxu0 %v7764_v47  ;;  %3453 = vmatprep.subr.mxu1 %v7765_v41 }
 0xe30   : > { %3383 = vmatpush1.msra.mxu0 %v7766_v56  ;;  %3416 = vmatprep.mubr.f32.mxu0 %v7767_v13 }
 0xe31   : > { %3454 = vmatpush1.msra.mxu1 %v7768_v14  ;;  %3487 = vmatprep.mubr.f32.mxu1 %v7767_v13 }
 0xe32   : > { %3529 = vmatprep.subr.mxu0 %v4556_v15  ;;  %3600 = vmatprep.subr.mxu1 %v7769_v16  ;;  %v4574_v15 = vld [vmem:[%s7356_s2 + $0x170] sm:$0xff]  ;;  %v4575_v16 = vld [vmem:[%s7356_s2 + $0x148] sm:$0xff] }
 0xed1   : > { %v3241_v18 = vpop.f32.mrf.mxu0  ;;  %v3312_v24 = vpop.f32.mrf.mxu1 }
 0xed2   : > { %v3317_v20 = vadd.f32 %v3241_v18, %v3171_v17  ;;  %v3319_v29 = vadd.f32 %v3312_v24, %v3173_v30  ;;  %v4576_v17 = vld [vmem:[%s7356_s2 + $0x158] sm:$0xff]  ;;  %v4577_v18 = vld [vmem:[%s7356_s2 + $0x140] sm:$0xff]  ;;  %v4583_v24 = vld [vmem:[%s7356_s2 + $0x108] sm:$0xff] }
 0xed3   : > { %v3243_v21 = vpop.f32.mrf.mxu0  ;;  %v3314_v27 = vpop.f32.mrf.mxu1  ;;  %v4588_v30 = vld [vmem:[%s7356_s2 + $0xf8] sm:$0xff] }
 0xed4   : > { %v4007_v22 = vmul.f32 -1.442695, %v3317_v20  ;;  %v3318_v23 = vadd.f32 %v3243_v21, %v3172_v19  ;;  %v3320_v28 = vadd.f32 %v3314_v27, %v3174_v26  ;;  %v4578_v19 = vld [vmem:[%s7356_s2 + $0x150] sm:$0xff]  ;;  %v4579_v20 = vld [vmem:[%s7356_s2 + $0x128] sm:$0xff]  ;;  %v4580_v21 = vld [vmem:[%s7356_s2 + $0x138] sm:$0xff] }
 0xed5   : > { %v4585_v26 = vld [vmem:[%s7356_s2 + $0x100] sm:$0xff]  ;;  %v4586_v27 = vld [vmem:[%s7356_s2 + $0x110] sm:$0xff] }
 0xed6   : > { %4380 = vpow2.f32 %v4007_v22  ;;  %v4008_v25 = vmul.f32 -1.442695, %v3318_v23  ;;  %v4009_v32 = vmul.f32 -1.442695, %v3320_v28  ;;  %v4581_v22 = vld [vmem:[%s7356_s2 + $0x120] sm:$0xff]  ;;  %v4582_v23 = vld [vmem:[%s7356_s2 + $0x130] sm:$0xff] }
 0xed7   : > { %v4587_v28 = vld [vmem:[%s7356_s2 + $0xe8] sm:$0xff] }
 0xed8   : > { %4382 = vpow2.f32 %v4008_v25  ;;  %v4584_v25 = vld [vmem:[%s7356_s2 + $0x118] sm:$0xff] }
 0xed9   : > { %4384 = vpow2.f32 %v4009_v32  ;;  %v4589_v32 = vld [vmem:[%s7356_s2 + $0xe0] sm:$0xff] }
 0xee3   : > { %v4381_v46 = vpop.eup %4380 }
 0xee4   : > { %v3324_v59 = vadd.f32 1.0, %v4381_v46  ;;  %v4590_v46 = vld [vmem:[%s7356_s2 + $0xf0] sm:$0xff] }
 0xee5   : > { %v4383_v50 = vpop.eup %4382 }
 0xee6   : > { %4386 = vrcp.f32 %v3324_v59  ;;  %v3330_v38 = vadd.f32 1.0, %v4383_v50  ;;  %v4385_v34 = vpop.eup %4384  ;;  %v4592_v59 = vld [vmem:[%s7356_s2 + $0xd8] sm:$0xff]  ;;  %v4593_v50 = vld [vmem:[%s7356_s2 + $0xc0] sm:$0xff] }
 0xee7   : > { %4388 = vtanh.f32 %v3319_v29  ;;  %v3337_v31 = vadd.f32 1.0, %v4385_v34  ;;  %v4591_v29 = vld [vmem:[%s7356_s2 + $0xc8] sm:$0xff] }
 0xee8   : > { %4390 = vrcp.f32 %v3330_v38  ;;  %v4594_v38 = vld [vmem:[%s7356_s2 + $0xd0] sm:$0xff]  ;;  %v4595_v34 = vld [vmem:[%s7356_s2 + $0xa8] sm:$0xff] }
 0xee9   : > { %4392 = vrcp.f32 %v3337_v31 }
 0xef3   : > { %v4387_v60 = vpop.eup %4386 }
 0xef4   : > { %v4389_v55 = vpop.eup %4388 }
 0xef5   : > { %v4391_v44 = vpop.eup %4390  ;;  %v3341_v54 = vmul.f32 %v4389_v55, %v4387_v60  ;;  %v4596_v60 = vld [vmem:[%s7356_s2 + $0xa0] sm:$0xff]  ;;  %v4597_v55 = vld [vmem:[%s7356_s2 + $0x88] sm:$0xff] }
 0xef6   : > { %v3340_v53 = vmul.f32 %v4391_v44, %v7064_v61  ;;  %v4393_v48 = vpop.eup %4392  ;;  %v4563_v61 = vld [vmem:[%s7356_s2 + $0x1a8] sm:$0xff]  ;;  %v4598_v44 = vld [vmem:[%s7356_s2 + $0x80] sm:$0xff] }
 0xef8   : > { %v7136_v1 = vadd.f32 %v3341_v54, %v3340_v53 }
 0xefa   : > { %4394 = vtanh.f32 %v7136_v1 }
 0xf07   : > { %v4395_v43 = vpop.eup %4394 }
 0xf08   : > { %v3344_v10 = vmul.f32 %v4395_v43, %v4393_v48 }
 0xf0a   : > { %3417 = vmatmul.mubr.f32.vlgmr.msra.gmra.mxu0 %v3344_v10  ;;  %3488 = vmatmul.mubr.f32.vlgmr.msra.gmra.mxu1 %v3344_v10  ;;  %v3350_v10 = vld [vmem:[#allocation2 + $0xc0] sm:$0xff] }
 0xf0b   : > { %3530 = vmatpush1.msra.mxu0 %v4557_v51  ;;  %3601 = vmatpush1.msra.mxu1 %v4558_v11 }
 0xf0c   : > { %3531 = vmatprep.subr.mxu0 %v4559_v63  ;;  %3602 = vmatprep.subr.mxu1 %v4560_v42 }
 0xf0d   : > { %3532 = vmatpush1.msra.mxu0 %v4561_v12  ;;  %3603 = vmatpush1.msra.mxu1 %v4562_v7 }
 0xf0e   : > { %3533 = vmatprep.subr.mxu0 %v4563_v61  ;;  %3604 = vmatprep.subr.mxu1 %v4564_v57 }
 0xf0f   : > { %3534 = vmatpush1.msra.mxu0 %v4565_v58  ;;  %3605 = vmatpush1.msra.mxu1 %v4566_v2 }
 0xf10   : > { %3535 = vmatprep.subr.mxu0 %v4567_v62  ;;  %3606 = vmatprep.subr.mxu1 %v4568_v5 }
 0xf11   : > { %3536 = vmatpush1.msra.mxu0 %v4569_v9  ;;  %3607 = vmatpush1.msra.mxu1 %v4570_v4 }
 0xf12   : > { %3537 = vmatprep.subr.mxu0 %v4571_v3  ;;  %3608 = vmatprep.subr.mxu1 %v4572_v40  ;;  %v3525_v40 = vld [vmem:[#allocation2 + $0x158] sm:$0xff] }
 0xf13   : > { %3538 = vmatpush1.msra.mxu0 %v4573_v49  ;;  %3609 = vmatpush1.msra.mxu1 %v4574_v15  ;;  %v3526_v15 = vld [vmem:[#allocation2 + $0x10] sm:$0xff] }
 0xf14   : > { %3539 = vmatprep.subr.mxu0 %v4575_v16  ;;  %3610 = vmatprep.subr.mxu1 %v4576_v17 }
 0xf15   : > { %3540 = vmatpush1.msra.mxu0 %v4577_v18  ;;  %3611 = vmatpush1.msra.mxu1 %v4578_v19 }
 0xf16   : > { %3541 = vmatprep.subr.mxu0 %v4579_v20  ;;  %3612 = vmatprep.subr.mxu1 %v4580_v21 }
 0xf17   : > { %3542 = vmatpush1.msra.mxu0 %v4581_v22  ;;  %3613 = vmatpush1.msra.mxu1 %v4582_v23 }
 0xf18   : > { %3543 = vmatprep.subr.mxu0 %v4583_v24  ;;  %3614 = vmatprep.subr.mxu1 %v4584_v25  ;;  %v3527_v24 = vld [vmem:[#allocation2 + $0x58] sm:$0xff] }
 0xf19   : > { %3544 = vmatpush1.msra.mxu0 %v4585_v26  ;;  %3615 = vmatpush1.msra.mxu1 %v4586_v27 }
 0xf1a   : > { %3545 = vmatprep.subr.mxu0 %v4587_v28  ;;  %3616 = vmatprep.subr.mxu1 %v4588_v30 }
 0xf1b   : > { %3546 = vmatpush1.msra.mxu0 %v4589_v32  ;;  %3617 = vmatpush1.msra.mxu1 %v4590_v46 }
 0xf1c   : > { %3547 = vmatprep.subr.mxu0 %v4591_v29  ;;  %3618 = vmatprep.subr.mxu1 %v4592_v59 }
 0xf1d   : > { %3548 = vmatpush1.msra.mxu0 %v4593_v50  ;;  %3619 = vmatpush1.msra.mxu1 %v4594_v38 }
 0xf1e   : > { %3549 = vmatprep.subr.mxu0 %v4595_v34  ;;  %3620 = vmatprep.subr.mxu1 %v6829_v52  ;;  %v4599_v52 = vld [vmem:[%s7356_s2 + $0x68] sm:$0xff] }
 0xf1f   : > { %3550 = vmatpush1.msra.mxu0 %v4596_v60  ;;  %3621 = vmatpush1.msra.mxu1 %v6836_v33  ;;  %v4600_v33 = vld [vmem:[%s7356_s2 + $0x60] sm:$0xff] }
 0xf20   : > { %3551 = vmatprep.subr.mxu0 %v4597_v55  ;;  %3622 = vmatprep.subr.mxu1 %v6843_v0  ;;  %v4601_v0 = vld [vmem:[%s7356_s2 + $0x48] sm:$0xff] }
 0xf21   : > { %3552 = vmatpush1.msra.mxu0 %v4598_v44  ;;  %3623 = vmatpush1.msra.mxu1 %v7751_v8  ;;  %v4602_v8 = vld [vmem:[%s7356_s2 + $0x40] sm:$0xff] }
 0xf22   : > { %3553 = vmatprep.subr.mxu0 %v4599_v52  ;;  %3624 = vmatprep.subr.mxu1 %v7753_v36  ;;  %v4603_v36 = vld [vmem:[%s7356_s2 + $0x28] sm:$0xff] }
 0xf23   : > { %3554 = vmatpush1.msra.mxu0 %v4600_v33  ;;  %3625 = vmatpush1.msra.mxu1 %v7755_v45  ;;  %v4604_v45 = vld [vmem:[%s7356_s2 + $0x20] sm:$0xff] }
 0xf24   : > { %3555 = vmatprep.subr.mxu0 %v4601_v0  ;;  %3626 = vmatprep.subr.mxu1 %v7757_v35  ;;  %v3348_v35 = vld [vmem:[#allocation2 + $0x198] sm:$0xff] }
 0xf25   : > { %3556 = vmatpush1.msra.mxu0 %v4602_v8  ;;  %3627 = vmatpush1.msra.mxu1 %v7759_v6 }
 0xf26   : > { %3557 = vmatprep.subr.mxu0 %v4603_v36  ;;  %3628 = vmatprep.subr.mxu1 %v7761_v37  ;;  %v3349_v37 = vld [vmem:[#allocation2 + $0x38] sm:$0xff] }
 0xf27   : > { %3558 = vmatpush1.msra.mxu0 %v4604_v45  ;;  %3629 = vmatpush1.msra.mxu1 %v7763_v39 }
 0xf28   : > { %3559 = vmatprep.subr.mxu0 %v7764_v47  ;;  %3630 = vmatprep.subr.mxu1 %v7765_v41  ;;  %v3351_v41 = vld [vmem:[#allocation2 + $0x1c0] sm:$0xff] }
 0xf29   : > { %3560 = vmatpush1.msra.mxu0 %v7766_v56  ;;  %3593 = vmatprep.mubr.f32.mxu0 %v7767_v13 }
 0xf2a   : > { %3631 = vmatpush1.msra.mxu1 %v7768_v14  ;;  %3664 = vmatprep.mubr.f32.mxu1 %v7767_v13 }
 0xfca   : > { %v3418_v6 = vpop.f32.mrf.mxu0  ;;  %v3489_v39 = vpop.f32.mrf.mxu1 }
 0xfcb   : > { %v3494_v31 = vadd.f32 %v3418_v6, %v3348_v35  ;;  %v3496_v14 = vadd.f32 %v3489_v39, %v3350_v10 }
 0xfcc   : > { %v3420_v54 = vpop.f32.mrf.mxu0  ;;  %v3491_v43 = vpop.f32.mrf.mxu1 }
 0xfcd   : > { %v4010_v53 = vmul.f32 -1.442695, %v3494_v31  ;;  %v3495_v48 = vadd.f32 %v3420_v54, %v3349_v37  ;;  %v3497_v56 = vadd.f32 %v3491_v43, %v3351_v41 }
 0xfcf   : > { %4396 = vpow2.f32 %v4010_v53  ;;  %v4011_v47 = vmul.f32 -1.442695, %v3495_v48  ;;  %v4012_v51 = vmul.f32 -1.442695, %v3497_v56 }
 0xfd1   : > { %4398 = vpow2.f32 %v4011_v47 }
 0xfd2   : > { %4400 = vpow2.f32 %v4012_v51 }
 0xfdc   : > { %v4397_v11 = vpop.eup %4396 }
 0xfdd   : > { %v3501_v63 = vadd.f32 1.0, %v4397_v11 }
 0xfde   : > { %v4399_v13 = vpop.eup %4398 }
 0xfdf   : > { %4402 = vrcp.f32 %v3501_v63  ;;  %v3507_v42 = vadd.f32 1.0, %v4399_v13  ;;  %v4401_v12 = vpop.eup %4400 }
 0xfe0   : > { %4404 = vtanh.f32 %v3496_v14  ;;  %v3514_v58 = vadd.f32 1.0, %v4401_v12 }
 0xfe1   : > { %4406 = vrcp.f32 %v3507_v42 }
 0xfe2   : > { %4408 = vrcp.f32 %v3514_v58 }
 0xfec   : > { %v4403_v7 = vpop.eup %4402 }
 0xfed   : > { %v4405_v61 = vpop.eup %4404 }
 0xfee   : > { %v4407_v57 = vpop.eup %4406  ;;  %v3518_v2 = vmul.f32 %v4405_v61, %v4403_v7 }
 0xfef   : > { %v3517_v62 = vmul.f32 %v4407_v57, %v7136_v1  ;;  %v4409_v9 = vpop.eup %4408  ;;  %v3528_v1 = vld [vmem:[#allocation2 + $0xa0] sm:$0xff] }
 0xff1   : > { %v3519_v5 = vadd.f32 %v3518_v2, %v3517_v62 }
 0xff3   : > { %4410 = vtanh.f32 %v3519_v5 }
0x1000   : > { %v4411_v4 = vpop.eup %4410 }
0x1001   : > { %v3521_v3 = vmul.f32 %v4411_v4, %v4409_v9 }
0x1003   : > { %3594 = vmatmul.mubr.f32.vlgmr.msra.gmra.mxu0 %v3521_v3  ;;  %3665 = vmatmul.mubr.f32.vlgmr.msra.gmra.mxu1 %v3521_v3 }
0x10c3   : > { %v3595_v49 = vpop.f32.mrf.mxu0  ;;  %v3666_v20 = vpop.f32.mrf.mxu1 }
0x10c4   : > { %v3671_v16 = vadd.f32 %v3595_v49, %v3525_v40  ;;  %v3673_v27 = vadd.f32 %v3666_v20, %v3527_v24 }
0x10c5   : > { %v3597_v17 = vpop.f32.mrf.mxu0  ;;  %v3668_v22 = vpop.f32.mrf.mxu1 }
0x10c6   : > { %v4013_v18 = vmul.f32 -1.442695, %v3671_v16  ;;  %v3672_v19 = vadd.f32 %v3597_v17, %v3526_v15  ;;  %v3674_v23 = vadd.f32 %v3668_v22, %v3528_v1 }
0x10c8   : > { %4412 = vpow2.f32 %v4013_v18  ;;  %v4014_v21 = vmul.f32 -1.442695, %v3672_v19  ;;  %v4015_v25 = vmul.f32 -1.442695, %v3674_v23 }
0x10ca   : > { %4414 = vpow2.f32 %v4014_v21 }
0x10cb   : > { %4416 = vpow2.f32 %v4015_v25 }
0x10d5   : > { %v4413_v26 = vpop.eup %4412 }
0x10d6   : > { %v3678_v28 = vadd.f32 1.0, %v4413_v26 }
0x10d7   : > { %v4415_v30 = vpop.eup %4414 }
0x10d8   : > { %4418 = vrcp.f32 %v3678_v28  ;;  %v3684_v32 = vadd.f32 1.0, %v4415_v30  ;;  %v4417_v46 = vpop.eup %4416 }
0x10d9   : > { %4420 = vtanh.f32 %v3673_v27  ;;  %v3691_v38 = vadd.f32 1.0, %v4417_v46 }
0x10da   : > { %4422 = vrcp.f32 %v3684_v32 }
0x10db   : > { %4424 = vrcp.f32 %v3691_v38 }
0x10e5   : > { %v4419_v29 = vpop.eup %4418 }
0x10e6   : > { %v4421_v59 = vpop.eup %4420 }
0x10e7   : > { %v4423_v50 = vpop.eup %4422  ;;  %v3695_v34 = vmul.f32 %v4421_v59, %v4419_v29 }
0x10e8   : > { %v3694_v60 = vmul.f32 %v4423_v50, %v3519_v5  ;;  %v4425_v44 = vpop.eup %4424 }
0x10ea   : > { %v3696_v55 = vadd.f32 %v3695_v34, %v3694_v60 }
0x10ec   : > { %4426 = vtanh.f32 %v3696_v55  ;;  %3700 = vst [vmem:[#allocation4] sm:$0xff] %v3696_v55 }
0x10f8   : > { %3704 = sbr.rel (%p4016_p10) target bundleno = 4578 (0x11e2), region = 60 }
0x10f9   : > { %v4427_v52 = vpop.eup %4426 }
0x10fa   : > { %v3698_v33 = vmul.f32 %v4427_v52, %v4425_v44 }
0x10fc   : > { %3699 = vst [vmem:[#allocation3] sm:$0xff] %v3698_v33 }
0x10fd   : > { %v3720_v0 = vld [vmem:[#allocation8 + $0x78] sm:$0xff]  ;;  %v4765_v8 = vmov 0.0   ;;  %v3719_v36 = vld [vmem:[#allocation8 + $0x70] sm:$0xff]  ;;  %vm4766_vm1 = vmmov 0   ;;  %v3718_v45 = vld [vmem:[#allocation8 + $0x68] sm:$0xff] }
0x10fe   : > { %4039 = vmatprep.subr.mxu0 %v4765_v8  ;;  %4071 = vmatprep.mubr.msk.f32.mxu0 %vm4766_vm1, %v4765_v8  ;;  %v3717_v35 = vld [vmem:[#allocation8 + $0x60] sm:$0xff]  ;;  %v3716_v6 = vld [vmem:[#allocation8 + $0x58] sm:$0xff]  ;;  %v3715_v37 = vld [vmem:[#allocation8 + $0x50] sm:$0xff] }
0x10ff   : > { %4040 = vmatpush3.msra.mxu0 %v3720_v0  ;;  %v3714_v31 = vld [vmem:[#allocation8 + $0x48] sm:$0xff]  ;;  %v3713_v54 = vld [vmem:[#allocation8 + $0x40] sm:$0xff]  ;;  %v3712_v53 = vld [vmem:[#allocation8 + $0x38] sm:$0xff] }
0x1100   : > { %4041 = vmatprep.subr.mxu0 %v4765_v8  ;;  %v3711_v48 = vld [vmem:[#allocation8 + $0x30] sm:$0xff]  ;;  %v3710_v39 = vld [vmem:[#allocation8 + $0x28] sm:$0xff]  ;;  %v3709_v47 = vld [vmem:[#allocation8 + $0x20] sm:$0xff] }
0x1101   : > { %4042 = vmatpush3.msra.mxu0 %v3719_v36  ;;  %v3708_v41 = vld [vmem:[#allocation8 + $0x18] sm:$0xff]  ;;  %v3707_v43 = vld [vmem:[#allocation8 + $0x10] sm:$0xff]  ;;  %v3706_v56 = vld [vmem:[#allocation8 + $0x8] sm:$0xff] }
0x1102   : > { %4043 = vmatprep.subr.mxu0 %v4765_v8  ;;  %v3705_v10 = vld [vmem:[#allocation8] sm:$0xff]  ;;  %v4017_v51 = vld [vmem:[%s7359_s5] ss:$0 sm:$0xff] }
0x1103   : > { %4044 = vmatpush3.msra.mxu0 %v3718_v45 }
0x1104   : > { %4045 = vmatprep.subr.mxu0 %v4765_v8 }
0x1105   : > { %4046 = vmatpush3.msra.mxu0 %v3717_v35 }
0x1106   : > { %4047 = vmatprep.subr.mxu0 %v4765_v8 }
0x1107   : > { %4048 = vmatpush3.msra.mxu0 %v3716_v6 }
0x1108   : > { %4049 = vmatprep.subr.mxu0 %v4765_v8 }
0x1109   : > { %4050 = vmatpush3.msra.mxu0 %v3715_v37 }
0x110a   : > { %4051 = vmatprep.subr.mxu0 %v4765_v8 }
0x110b   : > { %4052 = vmatpush3.msra.mxu0 %v3714_v31 }
0x110c   : > { %4053 = vmatprep.subr.mxu0 %v4765_v8 }
0x110d   : > { %4054 = vmatpush3.msra.mxu0 %v3713_v54 }
0x110e   : > { %4055 = vmatprep.subr.mxu0 %v4765_v8 }
0x110f   : > { %4056 = vmatpush3.msra.mxu0 %v3712_v53 }
0x1110   : > { %4057 = vmatprep.subr.mxu0 %v4765_v8 }
0x1111   : > { %4058 = vmatpush3.msra.mxu0 %v3711_v48 }
0x1112   : > { %4059 = vmatprep.subr.mxu0 %v4765_v8 }
0x1113   : > { %4060 = vmatpush3.msra.mxu0 %v3710_v39 }
0x1114   : > { %4061 = vmatprep.subr.mxu0 %v4765_v8 }
0x1115   : > { %4062 = vmatpush3.msra.mxu0 %v3709_v47 }
0x1116   : > { %4063 = vmatprep.subr.mxu0 %v4765_v8 }
0x1117   : > { %4064 = vmatpush3.msra.mxu0 %v3708_v41 }
0x1118   : > { %4065 = vmatprep.subr.mxu0 %v4765_v8 }
0x1119   : > { %4066 = vmatpush3.msra.mxu0 %v3707_v43 }
0x111a   : > { %4067 = vmatprep.subr.mxu0 %v4765_v8 }
0x111b   : > { %4068 = vmatpush3.msra.mxu0 %v3706_v56 }
0x111c   : > { %4069 = vmatprep.subr.mxu0 %v4765_v8 }
0x111d   : > { %4070 = vmatpush3.msra.mxu0 %v3705_v10 }
0x111e   : > { %4072 = vmatmul.mubr.f32.vlgmr.msra.gmra.mxu0 %v3698_v33 }
0x11de   : > { %v3794_v11 = vpop.f32.mrf.mxu0 }
0x11df   : > { %v3795_v14 = vadd.f32 %v4017_v51, %v3794_v11 }
0x11e0   : > { %v4073_v63 = vpop.f32.mrf.mxu0 }
0x11e1   : > { %3798 = vst [vmem:[%s295_s16] sm:$0xff] %v3795_v14 }
0x11e2 PF: > { %s4019_s13 = sshll.u32 %s4745_s25, 7  ;;  %s3813_s3 = sshll.u32 %s295_s16, 4  ;;  %s3814_s3 = int_to_ptr.vmem [resolvable:$true] %s3813_s3 }
0x11e3   : > { %s3811_s29 = scalar_lea.hbm %s7360_s6, %s4019_s13  ;;  %s7770_s30 = sand.u32 1, %s4733_s22  }
0x11e4   : > { %s3800_s4 = scalar_lea.sflag [#allocation7], %s7770_s30  ;;  %s4657_s18 = scalar_lea.vmem %s3814_s3, 128 }
0x11e5   : > { %p4658_p13 = scmp.ne.s32.totalorder %s3814_s3, %s4657_s18  ;;  %p7771_p0 = scmp.ne.s32.totalorder %s7500_s10, 0 }
0x11e6   : > { %s4767_s20 = smov [#allocation10]  }
0x11e7   : > { %p4659_p1 = pnand %p4658_p13, %p7771_p0  ;;  %s4661_s14 = sshll.u32 %s4767_s20, 4  ;;  %s4662_s14 = int_to_ptr.vmem [resolvable:$false] %s4661_s14 }
0x11e8   : > { %s4663_s24 = scalar_lea.vmem %s4662_s14, 256  ;;  %p4664_p8 = scmp.lt.s32.totalorder %s3814_s3, %s4662_s14 }
0x11e9   : > { %p4660_p7 = pneg %p4659_p1  ;;  %p4665_p11 = scmp.lt.s32.totalorder %s4663_s24, %s4657_s18 }
0x11eb   : > { %p4666_p12 = por %p4665_p11, %p4664_p8 }
0x11ed   : > { %p4667_p2 = pnand %p4666_p12, %p4660_p7 }
0x11ef   : > { %4670 = shalt.err (!%p4667_p2)
}
0x11f0   : > { %s4671_s25 = scalar_lea.hbm %s3811_s29, 128  ;;  %s4675_s17 = scalar_lea.hbm %s7360_s6, 256 }
0x11f1   : > { %p4672_p4 = scmp.ne.s32.totalorder %s3811_s29, %s4671_s25  ;;  %p4676_p3 = scmp.lt.s32.totalorder %s3811_s29, %s7360_s6 }
0x11f2   : > { %p4677_p9 = scmp.lt.s32.totalorder %s4675_s17, %s4671_s25 }
0x11f3   : > { %p4673_p6 = pnand %p4672_p4, %p7771_p0 }
0x11f4   : > { %p4678_p10 = por %p4677_p9, %p4676_p3 }
0x11f5   : > { %p4674_p5 = pneg %p4673_p6 }
0x11f7   : > { %p4679_p13 = pnand %p4678_p10, %p4674_p5 }
0x11f9   : > { %4682 = shalt.err (!%p4679_p13)
}
0x11fa   : > { %4082 = dma.vmem_to_hbm [thread:$0]  (%p7771_p0), %s3814_s3, 128, %s3811_s29, %s3800_s4  }
0x11fb PF: > { %p4099_p1 = scmp.ge.s32.totalorder %s4757_s28, 2  ;;  %s3825_s9 = sand.u32 1, %s4729_s21  }
0x11fc   : > { %p7772_p7 = scmp.ne.s32.totalorder %s7501_s11, 0  ;;  %s3826_s30 = scalar_lea.sflag [#allocation7], %s3825_s9 }
0x11fe   : > { %p4092_p8 = pnand %p4099_p1, %p7772_p7 }
0x1200   : > { %p4093_p11 = pneg %p4092_p8 }
0x1202   : > { %4724 = dma.done.wait (%p4093_p11), %s3826_s30, 128  }
0x1203   : > { %4726 = vsyncadd (%p4093_p11), %s3826_s30, 4294967168  ;;  %s21_s28 = sadd.s32 1, %s4757_s28   ;;  %s7773_s21 = smov %s4733_s22 }
0x1204   : > { %p18_p12 = scmp.ge.s32.totalorder %s21_s28, 6   ;;  %s7774_s22 = smov %s4737_s23 }
0x1205   : > { %s7775_s23 = smov %s4880_s15  ;;  %s7776_s24 = smov %s4749_s26 }
0x1206   : > { %s7777_s25 = smov %s4753_s27  ;;  %s7778_s26 = smov %s7781_s7 }
0x1207   : > { %s7779_s27 = smov %s7785_s8  ;;  %20 = sbr.rel (!%p18_p12) target bundleno = 10 (0xa), region = 112 }
0x120c   :  { %3831 = vsyncpa [#allocation6], 1 }
0x120d   :  { %3833 = vsyncpa [#allocation6 + $0x1], 1 }
0x120e   :  { %3834 = vsyncpa [#allocation9], 1 }
0x120f   :  { %3835 = vsyncpa [#allocation7], 1 }
0x1210   :  { %3837 = vsyncpa [#allocation7 + $0x1], 1 }

</bundles_post_ra>
